<compile_context>
chip_gen: v7x
topology: tpu7x:2x2x1
jax: 0.10.0
libtpu: 0.0.40
codegen_flags: <defaults>
</compile_context>

<pallas_src>
import jax
import jax.numpy as jnp
from jax.experimental import pallas as pl
from jax.experimental.pallas import tpu as pltpu

REPLAY_BATCH = 32
H = 100
HID = REPLAY_BATCH * H                       # 3200
TILE = 640                                   # 3200 = 5 * 640, 640 % 128 == 0
N_TILES = HID // TILE                        # 5 column tiles of W2 / row tiles of W3
N_CORES = 2                                  # leading "parallel" axis (v7x megacore)
N_TILES_PER_CORE = -(-N_TILES // N_CORES)    # ceil -> 3 (uneven 3/2 split)


def _tile_idx(c, k):
    # Global W2 column tile handled at grid point (c, k). The dummy last step of
    # core 1 clamps to the previous tile -> same block index, no extra DMA; its
    # compute is skipped inside the kernel.
    return jnp.minimum(c * N_TILES_PER_CORE + k, N_TILES - 1)


def mlp_kernel(x_ref, w1_ref, b1_ref, w2_ref, b2_ref, w3_ref, o_ref, h1_sc):
    c = pl.program_id(0)          # "core" / partial-sum row
    k = pl.program_id(1)          # column-tile step within this core

    # First step on each core: layer-1 activation + zero the resident output
    # block (which doubles as the layer-3 accumulator).
    @pl.when(k == 0)
    def _():
        h1 = jnp.dot(x_ref[...], w1_ref[...],
                     preferred_element_type=jnp.float32) + b1_ref[...]
        h1_sc[...] = jnp.maximum(h1, 0.0).astype(jnp.bfloat16)
        o_ref[...] = jnp.zeros_like(o_ref)

    # Skip the padding step (core 1 only owns 2 real tiles out of its 3 steps).
    @pl.when(c * N_TILES_PER_CORE + k < N_TILES)
    def _():
        h2 = jnp.dot(h1_sc[...], w2_ref[...],
                     preferred_element_type=jnp.float32) + b2_ref[...]
        h2 = jnp.maximum(h2, 0.0).astype(jnp.bfloat16)
        # Dropout(0.2): identity in eval mode.
        part = jnp.dot(h2, w3_ref[...], preferred_element_type=jnp.float32)
        o_ref[...] += part.reshape(1, 1, REPLAY_BATCH)


def model_forward(x, params):
    """params as produced by prepare_params(); returns a (32,) f32 vector."""
    w1, b1r, w2, b2r, w3, b3 = params
    xf = x.reshape(1, REPLAY_BATCH).astype(jnp.bfloat16)   # flatten -> (1, 32)

    partial = pl.pallas_call(
        mlp_kernel,
        out_shape=jax.ShapeDtypeStruct((N_CORES, 1, REPLAY_BATCH), jnp.float32),
        grid_spec=pltpu.PrefetchScalarGridSpec(
            num_scalar_prefetch=0,
            grid=(N_CORES, N_TILES_PER_CORE),
            in_specs=[
                pl.BlockSpec((1, REPLAY_BATCH), lambda c, k: (0, 0)),        # x
                pl.BlockSpec((REPLAY_BATCH, HID), lambda c, k: (0, 0)),      # W1
                pl.BlockSpec((1, HID), lambda c, k: (0, 0)),                 # b1
                pl.BlockSpec((HID, TILE),                                    # W2 cols
                             lambda c, k: (0, _tile_idx(c, k))),
                pl.BlockSpec((1, TILE),                                      # b2 tile
                             lambda c, k: (0, _tile_idx(c, k))),
                pl.BlockSpec((TILE, REPLAY_BATCH),                           # W3 rows
                             lambda c, k: (_tile_idx(c, k), 0)),
            ],
            out_specs=pl.BlockSpec((1, 1, REPLAY_BATCH), lambda c, k: (c, 0, 0)),
            scratch_shapes=[
                pltpu.VMEM((1, HID), jnp.bfloat16),    # layer-1 activation
            ],
        ),
        compiler_params=pltpu.CompilerParams(
            dimension_semantics=("parallel", "arbitrary"),
            vmem_limit_bytes=32 << 20,
        ),
    )(xf, w1, b1r, w2, b2r, w3)

    # Reduce the per-core partial sums and add the final bias (2 x 32 floats).
    return partial.sum(axis=0).reshape(REPLAY_BATCH) + b3


def init_params(key):
    """f32 parameters; weights stored as (in_features, out_features)."""
    k1, k2, k3, k4, k5, k6 = jax.random.split(key, 6)
    s1 = 1.0 / jnp.sqrt(REPLAY_BATCH)
    s2 = 1.0 / jnp.sqrt(HID)
    w1 = jax.random.uniform(k1, (REPLAY_BATCH, HID), jnp.float32, -s1, s1)
    b1 = jax.random.uniform(k2, (HID,), jnp.float32, -s1, s1)
    w2 = jax.random.uniform(k3, (HID, HID), jnp.float32, -s2, s2)
    b2 = jax.random.uniform(k4, (HID,), jnp.float32, -s2, s2)
    w3 = jax.random.uniform(k5, (HID, REPLAY_BATCH), jnp.float32, -s2, s2)
    b3 = jax.random.uniform(k6, (REPLAY_BATCH,), jnp.float32, -s2, s2)
    return (w1, b1, w2, b2, w3, b3)


def prepare_params(params):
    """One-time conversion: bf16 weights (halves the HBM stream), f32 biases."""
    w1, b1, w2, b2, w3, b3 = params
    return (w1.astype(jnp.bfloat16),
            b1.reshape(1, HID).astype(jnp.float32),
            w2.astype(jnp.bfloat16),
            b2.reshape(1, HID).astype(jnp.float32),
            w3.astype(jnp.bfloat16),
            b3.astype(jnp.float32))


if __name__ == "__main__":
    key = jax.random.PRNGKey(0)
    kp, kx = jax.random.split(key)
    params = prepare_params(init_params(kp))
    # Any input whose total size is REPLAY_BATCH=32 (the module flattens it).
    x = jax.random.normal(kx, (4, 8), dtype=jnp.float32)

    y = model_forward(x, params)
    jax.block_until_ready(y)

    # Pure-JAX reference following the same bf16-weight / f32-accumulate path.
    w1, b1r, w2, b2r, w3, b3 = params
    xb = x.reshape(1, REPLAY_BATCH).astype(jnp.bfloat16)
    h1 = jnp.maximum(
        jnp.dot(xb, w1, preferred_element_type=jnp.float32) + b1r, 0.0
    ).astype(jnp.bfloat16)
    h2 = jnp.maximum(
        jnp.dot(h1, w2, preferred_element_type=jnp.float32) + b2r, 0.0
    ).astype(jnp.bfloat16)
    y_ref = (jnp.dot(h2, w3, preferred_element_type=jnp.float32) + b3
             ).reshape(REPLAY_BATCH)

    assert y.shape == (REPLAY_BATCH,)
    assert jnp.allclose(y, y_ref, atol=1e-2, rtol=1e-2), (
        float(jnp.max(jnp.abs(y - y_ref))))

    print("KERNEL_OK")
</pallas_src>

<mosaic_0001>
module attributes {stable_mosaic.version = 11 : i64} {
  func.func @mlp_kernel(%arg0: i32, %arg1: i32, %arg2: memref<1x32xbf16, #tpu.memory_space<vmem>>, %arg3: memref<32x3200xbf16, #tpu.memory_space<vmem>>, %arg4: memref<1x3200xf32, #tpu.memory_space<vmem>>, %arg5: memref<3200x640xbf16, #tpu.memory_space<vmem>>, %arg6: memref<1x640xf32, #tpu.memory_space<vmem>>, %arg7: memref<640x32xbf16, #tpu.memory_space<vmem>>, %arg8: memref<1x1x32xf32, #tpu.memory_space<vmem>>, %arg9: memref<1x3200xbf16, #tpu.memory_space<vmem>>) attributes {dimension_semantics = [#tpu.dimension_semantics<parallel>, #tpu.dimension_semantics<arbitrary>], iteration_bounds = array<i64: 2, 3>, scalar_prefetch = 0 : i64, scratch_operands = 1 : i64, tpu.core_type = #tpu.core_type<tc>, window_params = [{pipeline_mode = #tpu.pipeline_mode<synchronous>, transform_indices = @transform_0, window_bounds = array<i64: 1, 32>}, {pipeline_mode = #tpu.pipeline_mode<synchronous>, transform_indices = @transform_1, window_bounds = array<i64: 32, 3200>}, {pipeline_mode = #tpu.pipeline_mode<synchronous>, transform_indices = @transform_2, window_bounds = array<i64: 1, 3200>}, {transform_indices = @transform_3, window_bounds = array<i64: 3200, 640>}, {transform_indices = @transform_4, window_bounds = array<i64: 1, 640>}, {transform_indices = @transform_5, window_bounds = array<i64: 640, 32>}, {transform_indices = @transform_6, window_bounds = array<i64: 1, 1, 32>}]} {
    %c0_i32 = arith.constant 0 : i32
    %0 = arith.cmpi eq, %arg1, %c0_i32 : i32
    %1 = arith.extui %0 : i1 to i32
    %c0_i32_0 = arith.constant 0 : i32
    %2 = arith.cmpi ne, %1, %c0_i32_0 : i32
    scf.if %2 {
      %c0 = arith.constant 0 : index
      %c0_2 = arith.constant 0 : index
      %8 = vector.load %arg2[%c0, %c0_2] : memref<1x32xbf16, #tpu.memory_space<vmem>>, vector<1x32xbf16>
      %c0_3 = arith.constant 0 : index
      %c0_4 = arith.constant 0 : index
      %9 = vector.load %arg3[%c0_3, %c0_4] : memref<32x3200xbf16, #tpu.memory_space<vmem>>, vector<32x3200xbf16>
      %cst = arith.constant dense<0.000000e+00> : vector<1x3200xf32>
      %10 = tpu.matmul %8, %9, %cst {dimension_numbers = #tpu.dot_dimension_numbers<[1], [0], [0], [1], [0, 0, 1, 1], [], []>} : vector<1x32xbf16>, vector<32x3200xbf16>, vector<1x3200xf32> -> vector<1x3200xf32>
      %c0_5 = arith.constant 0 : index
      %c0_6 = arith.constant 0 : index
      %11 = vector.load %arg4[%c0_5, %c0_6] : memref<1x3200xf32, #tpu.memory_space<vmem>>, vector<1x3200xf32>
      %12 = arith.addf %10, %11 : vector<1x3200xf32>
      %cst_7 = arith.constant 0.000000e+00 : f32
      %13 = vector.broadcast %cst_7 : f32 to vector<1x3200xf32>
      %14 = arith.maximumf %12, %13 : vector<1x3200xf32>
      %15 = arith.truncf %14 : vector<1x3200xf32> to vector<1x3200xbf16>
      %c0_8 = arith.constant 0 : index
      %c0_9 = arith.constant 0 : index
      %16 = vector.load %arg9[%c0_8, %c0_9] : memref<1x3200xbf16, #tpu.memory_space<vmem>>, vector<1x3200xbf16>
      tpu.vector_store %arg9[%c0_8, %c0_9], %15 {strides = array<i32>} : memref<1x3200xbf16, #tpu.memory_space<vmem>>, vector<1x3200xbf16>,
      %cst_10 = arith.constant 0.000000e+00 : f32
      %17 = vector.broadcast %cst_10 : f32 to vector<1x1x32xf32>
      %c0_11 = arith.constant 0 : index
      %c0_12 = arith.constant 0 : index
      %c0_13 = arith.constant 0 : index
      %18 = vector.load %arg8[%c0_11, %c0_12, %c0_13] : memref<1x1x32xf32, #tpu.memory_space<vmem>>, vector<1x1x32xf32>
      tpu.vector_store %arg8[%c0_11, %c0_12, %c0_13], %17 {strides = array<i32>} : memref<1x1x32xf32, #tpu.memory_space<vmem>>, vector<1x1x32xf32>,
    } else {
    }
    %c3_i32 = arith.constant 3 : i32
    %3 = arith.muli %arg0, %c3_i32 : i32
    %4 = arith.addi %3, %arg1 : i32
    %c5_i32 = arith.constant 5 : i32
    %5 = arith.cmpi slt, %4, %c5_i32 : i32
    %6 = arith.extui %5 : i1 to i32
    %c0_i32_1 = arith.constant 0 : i32
    %7 = arith.cmpi ne, %6, %c0_i32_1 : i32
    scf.if %7 {
      %c0 = arith.constant 0 : index
      %c0_2 = arith.constant 0 : index
      %8 = vector.load %arg9[%c0, %c0_2] : memref<1x3200xbf16, #tpu.memory_space<vmem>>, vector<1x3200xbf16>
      %c0_3 = arith.constant 0 : index
      %c0_4 = arith.constant 0 : index
      %9 = vector.load %arg5[%c0_3, %c0_4] : memref<3200x640xbf16, #tpu.memory_space<vmem>>, vector<3200x640xbf16>
      %cst = arith.constant dense<0.000000e+00> : vector<1x640xf32>
      %10 = tpu.matmul %8, %9, %cst {dimension_numbers = #tpu.dot_dimension_numbers<[1], [0], [0], [1], [0, 0, 1, 1], [], []>} : vector<1x3200xbf16>, vector<3200x640xbf16>, vector<1x640xf32> -> vector<1x640xf32>
      %c0_5 = arith.constant 0 : index
      %c0_6 = arith.constant 0 : index
      %11 = vector.load %arg6[%c0_5, %c0_6] : memref<1x640xf32, #tpu.memory_space<vmem>>, vector<1x640xf32>
      %12 = arith.addf %10, %11 : vector<1x640xf32>
      %cst_7 = arith.constant 0.000000e+00 : f32
      %13 = vector.broadcast %cst_7 : f32 to vector<1x640xf32>
      %14 = arith.maximumf %12, %13 : vector<1x640xf32>
      %15 = arith.truncf %14 : vector<1x640xf32> to vector<1x640xbf16>
      %c0_8 = arith.constant 0 : index
      %c0_9 = arith.constant 0 : index
      %16 = vector.load %arg7[%c0_8, %c0_9] : memref<640x32xbf16, #tpu.memory_space<vmem>>, vector<640x32xbf16>
      %cst_10 = arith.constant dense<0.000000e+00> : vector<1x32xf32>
      %17 = tpu.matmul %15, %16, %cst_10 {dimension_numbers = #tpu.dot_dimension_numbers<[1], [0], [0], [1], [0, 0, 1, 1], [], []>} : vector<1x640xbf16>, vector<640x32xbf16>, vector<1x32xf32> -> vector<1x32xf32>
      %c0_11 = arith.constant 0 : index
      %c0_12 = arith.constant 0 : index
      %c0_13 = arith.constant 0 : index
      %18 = vector.load %arg8[%c0_11, %c0_12, %c0_13] : memref<1x1x32xf32, #tpu.memory_space<vmem>>, vector<1x1x32xf32>
      %19 = vector.shape_cast %17 : vector<1x32xf32> to vector<1x1x32xf32>
      %20 = arith.addf %18, %19 : vector<1x1x32xf32>
      %c0_14 = arith.constant 0 : index
      %c0_15 = arith.constant 0 : index
      %c0_16 = arith.constant 0 : index
      %21 = vector.load %arg8[%c0_14, %c0_15, %c0_16] : memref<1x1x32xf32, #tpu.memory_space<vmem>>, vector<1x1x32xf32>
      tpu.vector_store %arg8[%c0_14, %c0_15, %c0_16], %20 {strides = array<i32>} : memref<1x1x32xf32, #tpu.memory_space<vmem>>, vector<1x1x32xf32>,
    } else {
    }
    return
  }
  func.func @transform_0(%arg0: i32, %arg1: i32) -> (i32, i32) {
    %c0_i32 = arith.constant 0 : i32
    %c0_i32_0 = arith.constant 0 : i32
    %c0_i32_1 = arith.constant 0 : i32
    return %c0_i32, %c0_i32_0 : i32, i32
  }
  func.func @transform_1(%arg0: i32, %arg1: i32) -> (i32, i32) {
    %c0_i32 = arith.constant 0 : i32
    %c0_i32_0 = arith.constant 0 : i32
    %c0_i32_1 = arith.constant 0 : i32
    return %c0_i32, %c0_i32_0 : i32, i32
  }
  func.func @transform_2(%arg0: i32, %arg1: i32) -> (i32, i32) {
    %c0_i32 = arith.constant 0 : i32
    %c0_i32_0 = arith.constant 0 : i32
    %c0_i32_1 = arith.constant 0 : i32
    return %c0_i32, %c0_i32_0 : i32, i32
  }
  func.func @transform_3(%arg0: i32, %arg1: i32) -> (i32, i32) {
    %c3_i32 = arith.constant 3 : i32
    %0 = arith.muli %arg0, %c3_i32 : i32
    %1 = arith.addi %0, %arg1 : i32
    %c4_i32 = arith.constant 4 : i32
    %2 = arith.minsi %1, %c4_i32 : i32
    %c0_i32 = arith.constant 0 : i32
    %c0_i32_0 = arith.constant 0 : i32
    return %c0_i32, %2 : i32, i32
  }
  func.func @transform_4(%arg0: i32, %arg1: i32) -> (i32, i32) {
    %c3_i32 = arith.constant 3 : i32
    %0 = arith.muli %arg0, %c3_i32 : i32
    %1 = arith.addi %0, %arg1 : i32
    %c4_i32 = arith.constant 4 : i32
    %2 = arith.minsi %1, %c4_i32 : i32
    %c0_i32 = arith.constant 0 : i32
    %c0_i32_0 = arith.constant 0 : i32
    return %c0_i32, %2 : i32, i32
  }
  func.func @transform_5(%arg0: i32, %arg1: i32) -> (i32, i32) {
    %c3_i32 = arith.constant 3 : i32
    %0 = arith.muli %arg0, %c3_i32 : i32
    %1 = arith.addi %0, %arg1 : i32
    %c4_i32 = arith.constant 4 : i32
    %2 = arith.minsi %1, %c4_i32 : i32
    %c0_i32 = arith.constant 0 : i32
    %c0_i32_0 = arith.constant 0 : i32
    return %2, %c0_i32 : i32, i32
  }
  func.func @transform_6(%arg0: i32, %arg1: i32) -> (i32, i32, i32) {
    %c0_i32 = arith.constant 0 : i32
    %c0_i32_0 = arith.constant 0 : i32
    %c0_i32_1 = arith.constant 0 : i32
    return %arg0, %c0_i32, %c0_i32_0 : i32, i32, i32
  }
}

</mosaic_0001>

<bundles_post_ra>
// kernel: tpu_custom_call.1
= control target key start
LH: loop header
LB: loop body
LE: loop exit
PB: predicated region body
PF: predicated region fallthrough
CT: control target
= control target key end

     0   :  { %s15993_s0 = inlined_call_operand.hbm [shape: bf16[1,32], index: 0, kind: input, shape index: {}]   ;;  %s15994_s1 = inlined_call_operand.hbm [shape: bf16[32,3200], index: 1, kind: input, shape index: {}]   ;;  %s15995_s2 = inlined_call_operand.hbm [shape: f32[1,3200], index: 2, kind: input, shape index: {}]   ;;  %s15996_s3 = inlined_call_operand.hbm [shape: bf16[3200,3200], index: 3, kind: input, shape index: {}]   ;;  %s15997_s4 = inlined_call_operand.hbm [shape: f32[1,3200], index: 4, kind: input, shape index: {}]   ;;  %s15998_s5 = inlined_call_operand.vmem [shape: bf16[3200,32], index: 5, kind: input, shape index: {}]   ;;  %s15999_s6 = inlined_call_operand.hbm [shape: f32[2,1,32], index: 6, kind: output, shape index: {}]  }
   0x1   :  { %16026 = sst [smem:[#allocation29_spill]] %s15994_s1 }
   0x2   :  { %16027 = sst [smem:[#allocation30_spill]] %s15996_s3 }
   0x3   :  { %16028 = sst [smem:[#allocation31_spill]] %s15998_s5 }
   0x4   :  { %16029 = sst [smem:[#allocation32_spill]] %s15999_s6 }
   0x5   :  { %11 = vsyncpa [#allocation4], 0 }
   0x6   :  { %12 = vsyncpa [#allocation7], 0 }
   0x7   :  { %13 = vsyncpa [#allocation10], 0 }
   0x8   :  { %15 = vsyncpa [#allocation10 + $0x1], 0 }
   0x9   :  { %16 = vsyncpa [#allocation5], 0 }
   0xa   :  { %18 = vsyncpa [#allocation5 + $0x1], 0  ;;  %s14143_s21 = smov 0   ;;  %s14145_s22 = smov 0  }
   0xb   :  { %s14147_s23 = smov 0   ;;  %s14149_s24 = smov 0  }
   0xc   :  { %s14151_s25 = smov 0   ;;  %s14153_s26 = smov 0  }
   0xd   :  { %s14155_s27 = smov 0   ;;  %s14157_s28 = smov 0  }
   0xe   :  { %s14159_s29 = smov 0   ;;  %s14161_s30 = smov 0  }
   0xf   :  { %s14163_s7 = smov 0  }
  0x10 LB: > { %16030 = sst [smem:[#allocation17_spill]] %s14048_s21  ;;  %s14197_s8 = sadd.s32 4294967295, %s14088_s7   ;;  %s14088_s7 = sphi %s14163_s7, %s24_s7   ;;  %s14084_s30 = sphi %s14161_s30, %s16102_s30   ;;  %s14080_s29 = sphi %s14159_s29, %s16101_s29   ;;  %s14076_s28 = sphi %s14157_s28, %s16108_s28   ;;  %s14072_s27 = sphi %s14155_s27, %s16099_s27   ;;  %s14068_s26 = sphi %s14153_s26, %s16107_s26   ;;  %s14064_s25 = sphi %s14151_s25, %s16106_s25   ;;  %s14060_s24 = sphi %s14149_s24, %s16105_s24   ;;  %s14056_s23 = sphi %s14147_s23, %s16098_s23   ;;  %s14052_s22 = sphi %s14145_s22, %s16104_s22   ;;  %s14048_s21 = sphi %s14143_s21, %s16103_s21  }
  0x11   : > { %16031 = sst [smem:[#allocation18_spill]] %s14056_s23  ;;  %s10525_s9 = sadd.s32 4294967294, %s14088_s7  }
  0x12   : > { %16032 = sst [smem:[#allocation19_spill]] %s14072_s27  ;;  %p121_p0 = scmp.ne.s32.totalorder %s14068_s26, %s14064_s25 }
  0x13   : > { %16033 = sst [smem:[#allocation20_spill]] %s14076_s28  ;;  %p122_p1 = scmp.eq.s32.totalorder %s14088_s7, 0 }
  0x14   : > { %16034 = sst [smem:[#allocation21_spill]] %s14080_s29  ;;  %p127_p2 = scmp.ne.s32.totalorder %s14064_s25, %s14060_s24 }
  0x15   : > { %16035 = sst [smem:[#allocation22_spill]] %s14084_s30  ;;  %p16002_p3 = scmp.eq.s32.totalorder %s14197_s8, 0 }
  0x16   : > { %16036 = sst [smem:[#allocation23_spill]] %s14088_s7  ;;  %p14207_p4 = por %p122_p1, %p121_p0 }
  0x17   : > { %p218_p5 = scmp.ne.s32.totalorder %s14056_s23, %s14052_s22  ;;  %p14215_p6 = por %p16002_p3, %p127_p2 }
  0x18   : > { %p219_p7 = scmp.eq.s32.totalorder %s14197_s8, 5  ;;  %p224_p8 = scmp.ne.s32.totalorder %s14052_s22, %s14048_s21 }
  0x19   : > { %s16038_s13 = scalar_select %p14215_p6, 1, 0 }
  0x1a   : > { %p225_p9 = scmp.eq.s32.totalorder %s10525_s9, 5  ;;  %p14222_p10 = por %p219_p7, %p218_p5 }
  0x1b   : > { %p10526_p11 = scmp.ge.s32.totalorder %s14088_s7, 1  ;;  %p232_p13 = scmp.lt.s32.totalorder %s14088_s7, 7 }
  0x1c   : > { %s16039_s14 = scalar_select %p14222_p10, 1, 0 }
  0x1d   : > { %p14227_p12 = por %p225_p9, %p224_p8  ;;  %p14232_p0 = pnand %p10526_p11, %p232_p13 }
  0x1e   : > { %16040 = sst [smem:[#allocation24_spill]] %s16039_s14  ;;  %s14090_s17 = smov [#allocation6]  }
  0x1f   : > { %s16041_s15 = scalar_select %p14227_p12, 1, 0 }
  0x20   : > { %s16043_s16 = scalar_select %p14232_p0, 1, 0 }
  0x21   : > { %16042 = sst [smem:[#allocation25_spill]] %s16041_s15  ;;  %s255_s18 = sshll.u32 %s14090_s17, 4  ;;  %s256_s18 = int_to_ptr.vmem [resolvable:$true] %s255_s18 }
  0x22   : > { %p12161_p1 = pneg %p14232_p0  ;;  %p12185_p2 = scmp.lt.s32.totalorder %s14088_s7, 6 }
  0x23   : > { %s16046_s1 = sld [smem:[#allocation29_spill]] }
  0x24   : > { %p14241_p5 = pnand %p12161_p1, %p16002_p3  ;;  %p14247_p7 = pnand %p12185_p2, %p14207_p4 }
  0x26   : > { %s16044_s19 = scalar_select %p14241_p5, 1, 0 }
  0x27   : > { %s16045_s20 = scalar_select %p14247_p7, 1, 0 }
  0x28   : > { %p14259_p9 = pneg %p14241_p5 }
  0x29   : > { %s13814_s10 = scalar_lea.hbm %s16046_s1, 6400 }
  0x2a   : > { %p13815_p8 = scmp.ne.s32.totalorder %s16046_s1, %s13814_s10  ;;  %p13821_p13 = scmp.lt.u32.totalorder %s13814_s10, %s16046_s1 }
  0x2b   : > { %s16047_s15 = scalar_select %p14259_p9, 1, 0 }
  0x2c   : > { %p13817_p11 = pnand %p14259_p9, %p13815_p8 }
  0x2e   : > { %p13818_p4 = pneg %p13817_p11 }
  0x30   : > { %p13823_p1 = pnand %p13821_p13, %p13818_p4 }
  0x32   : > { %13826 = shalt.err (!%p13823_p1)
}
  0x33   : > { %s13827_s24 = scalar_lea.vmem %s256_s18, 6400  ;;  %p13835_p10 = scmp.lt.s32.totalorder %s256_s18, %s256_s18 }
  0x34   : > { %p13828_p2 = scmp.ne.s32.totalorder %s256_s18, %s13827_s24  ;;  %p13836_p6 = scmp.lt.s32.totalorder %s13827_s24, %s13827_s24 }
  0x36   : > { %p13830_p3 = pnand %p13828_p2, %p14259_p9  ;;  %p13837_p0 = por %p13836_p6, %p13835_p10 }
  0x38   : > { %p13831_p12 = pneg %p13830_p3 }
  0x3a   : > { %p13838_p7 = pnand %p13837_p0, %p13831_p12 }
  0x3c   : > { %13841 = shalt.err (!%p13838_p7)
}
  0x3d   : > { %s16011_s11 = smov 1600   ;;  %s14092_s21 = smov 100  }
  0x3e   : > { %12167 = dma.hbm_to_vmem [thread:$0]  (!%p14241_p5), %s16046_s1, 6400, %s256_s18, [#allocation7], %s16011_s11, %s16011_s11, %s14092_s21  }
  0x3f   : > { %s33_s17 = sadd.s32 1, %s14080_s29  ;;  %s36_s12 = sadd.s32 1, %s14084_s30 }
  0x40   : > { %p34_p3 = scmp.ge.s32.totalorder %s33_s17, 3  ;;  %s103_s24 = smul.u32 3, %s14084_s30 }
  0x41   : > { %s280_s6 = sand.u32 1, %s14088_s7   ;;  %s16012_s14 = sand.u32 1, %s14068_s26  }
  0x42   : > { %s16110_s17 = smov (%p34_p3, %s33_s17), 0  ;;  %s16112_s12 = smov (!%p34_p3, %s36_s12), %s14084_s30 }
  0x43   : > { %16048 = sst [smem:[#allocation26_spill]] %s16110_s17  ;;  %s104_s5 = sadd.s32 %s14080_s29, %s103_s24 }
  0x44   : > { %p38_p6 = scmp.ge.s32.totalorder %s16112_s12, 2  ;;  %p105_p10 = scmp.lt.s32.totalorder %s104_s5, 4 }
  0x45   : > { %s12139_s27 = smul.u32 8000, %s16012_s14  ;;  %s16050_s1 = sadd.s32 1, %s14056_s23 }
  0x46   : > { %s16114_s12 = smov (%p38_p6, %s16112_s12), 0  ;;  %s16116_s5 = smov (!%p105_p10, %s104_s5), 4 }
  0x47   : > { %16049 = sst [smem:[#allocation27_spill]] %s16114_s12  ;;  %s107_s18 = smul.u32 3, %s16114_s12 }
  0x48   : > { %s205_s21 = ssub.s32 %s14084_s30, %s16114_s12  ;;  %s11660_s9 = smul.u32 320, %s16116_s5 }
  0x49   : > { %p206_p12 = scmp.eq.s32.totalorder %s205_s21, 0  ;;  %s108_s10 = sadd.s32 %s107_s18, %s16110_s17 }
  0x4a   : > { %p109_p0 = scmp.lt.s32.totalorder %s108_s10, 4  ;;  %s284_s24 = scalar_lea.vmem [#allocation9], %s12139_s27 }
  0x4b   : > { %s295_s11 = sshll.u32 %s284_s24, 4  ;;  %s16052_s3 = sld [smem:[#allocation30_spill]]  ;;  %s14307_s11 = int_to_ptr.vmem [resolvable:$true] %s295_s11 }
  0x4c   : > { %s14300_s14 = scalar_select %p206_p12, %s14056_s23, %s16050_s1  }
  0x4d   : > { %s16118_s10 = smov (!%p109_p0, %s108_s10), 4  ;;  %s14314_s27 = scalar_lea.sflag [#allocation10], %s280_s6 }
  0x4e   : > { %16051 = sst [smem:[#allocation28_spill]] %s14300_s14  ;;  %s111_s18 = ssub.s32 %s16116_s5, %s16118_s10 }
  0x4f   : > { %p14310_p7 = scmp.eq.s32.totalorder %s111_s18, 0  ;;  %p16054_p11 = scmp.ne.s32.totalorder %s16045_s20, 0 }
  0x51   : > { %s14305_s28 = scalar_lea.hbm %s16052_s3, %s11660_s9  ;;  %p16024_p4 = pneg %p16054_p11 }
  0x52   : > { %s13842_s1 = scalar_lea.hbm %s14305_s28, 128000  ;;  %s13847_s9 = scalar_lea.hbm %s16052_s3, 640000 }
  0x53   : > { %p13843_p8 = scmp.ne.s32.totalorder %s14305_s28, %s13842_s1  ;;  %p13848_p2 = scmp.lt.u32.totalorder %s14305_s28, %s16052_s3 }
  0x54   : > { %p13849_p3 = scmp.lt.u32.totalorder %s13847_s9, %s13842_s1  ;;  %p13851_p10 = scmp.lt.u32.totalorder %s13842_s1, %s14305_s28 }
  0x55   : > { %p13845_p13 = pnand %p16024_p4, %p13843_p8 }
  0x56   : > { %p13850_p6 = por %p13849_p3, %p13848_p2 }
  0x57   : > { %p13846_p1 = pneg %p13845_p13 }
  0x58   : > { %p13852_p12 = por %p13851_p10, %p13850_p6 }
  0x5a   : > { %p13853_p0 = pnand %p13852_p12, %p13846_p1 }
  0x5c   : > { %13856 = shalt.err (!%p13853_p0)
}
  0x5d   : > { %s13857_s6 = scalar_lea.vmem %s14307_s11, 128000  ;;  %s14093_s18 = smov [#allocation9]  }
  0x5e   : > { %p13858_p8 = scmp.ne.s32.totalorder %s14307_s11, %s13857_s6  ;;  %s13862_s29 = sshll.u32 %s14093_s18, 4  ;;  %s13863_s29 = int_to_ptr.vmem [resolvable:$false] %s13862_s29 }
  0x5f   : > { %s13864_s7 = scalar_lea.vmem %s13863_s29, 256000  ;;  %p13865_p9 = scmp.lt.s32.totalorder %s14307_s11, %s13863_s29 }
  0x60   : > { %p13860_p13 = pnand %p13858_p8, %p16024_p4  ;;  %p13866_p2 = scmp.lt.s32.totalorder %s13864_s7, %s13857_s6 }
  0x62   : > { %p13861_p5 = pneg %p13860_p13  ;;  %p13867_p3 = por %p13866_p2, %p13865_p9 }
  0x64   : > { %p13868_p6 = pnand %p13867_p3, %p13861_p5 }
  0x66   : > { %13871 = shalt.err (!%p13868_p6)
}
  0x67   : > { %s14094_s1 = smov 320   ;;  %s14095_s9 = smov 20  }
  0x68   : > { %s16055_s24 = smov 1600   ;;  %s16056_s10 = sadd.s32 1, %s14068_s26 }
  0x69   : > { %12174 = dma.hbm_to_vmem [thread:$0]  (!%p16054_p11), %s14305_s28, 128000, %s14307_s11, %s14314_s27, %s16055_s24, %s14094_s1, %s14095_s9  }
  0x6a   : > { %s14348_s18 = scalar_select %p14310_p7, %s14068_s26, %s16056_s10  }
  0x6b   : > { %s14096_s6 = smov [#allocation3]   ;;  %s14097_s7 = smov [#allocation8]  }
  0x6c   : > { %s245_s29 = sshll.u32 %s14096_s6, 4  ;;  %s269_s3 = sshll.u32 %s14097_s7, 4  ;;  %s246_s29 = int_to_ptr.vmem [resolvable:$true] %s245_s29  ;;  %s270_s3 = int_to_ptr.vmem [resolvable:$true] %s269_s3 }
  0x6d   : > { %s13872_s30 = scalar_lea.hbm %s15993_s0, 16  ;;  %p16057_p9 = scmp.ne.s32.totalorder %s16047_s15, 0 }
  0x6e   : > { %p13873_p5 = scmp.ne.s32.totalorder %s15993_s0, %s13872_s30  ;;  %p13879_p7 = scmp.lt.u32.totalorder %s13872_s30, %s15993_s0 }
  0x70   : > { %p13875_p1 = pnand %p13873_p5, %p16057_p9 }
  0x72   : > { %p13876_p10 = pneg %p13875_p1 }
  0x74   : > { %p13881_p12 = pnand %p13879_p7, %p13876_p10 }
  0x76   : > { %13884 = shalt.err (!%p13881_p12)
}
  0x77   : > { %s13885_s21 = scalar_lea.vmem %s246_s29, 16  ;;  %s13892_s17 = scalar_lea.vmem %s246_s29, 32 }
  0x78   : > { %p13886_p0 = scmp.ne.s32.totalorder %s246_s29, %s13885_s21  ;;  %p13893_p2 = scmp.lt.s32.totalorder %s246_s29, %s246_s29 }
  0x79   : > { %p13894_p3 = scmp.lt.s32.totalorder %s13892_s17, %s13885_s21 }
  0x7a   : > { %p13888_p8 = pnand %p13886_p0, %p16057_p9 }
  0x7b   : > { %p13895_p6 = por %p13894_p3, %p13893_p2 }
  0x7c   : > { %p13889_p13 = pneg %p13888_p8 }
  0x7e   : > { %p13896_p4 = pnand %p13895_p6, %p13889_p13 }
  0x80   : > { %13899 = shalt.err (!%p13896_p4)
}
  0x81   : > { %p16058_p5 = scmp.ne.s32.totalorder %s16044_s19, 0  ;;  %s16059_s30 = sand.u32 1, %s14068_s26  }
  0x82   : > { %s12140_s12 = smul.u32 5, %s16059_s30  ;;  %s13900_s24 = scalar_lea.hbm %s15995_s2, 400 }
  0x83   : > { %12164 = dma.hbm_to_vmem [thread:$0]  (!%p16058_p5), %s15993_s0, 16, %s246_s29, [#allocation4]  }
  0x84   : > { %p13901_p1 = scmp.ne.s32.totalorder %s15995_s2, %s13900_s24  ;;  %p13907_p7 = scmp.lt.u32.totalorder %s13900_s24, %s15995_s2 }
  0x86   : > { %p13903_p4 = pnand %p13901_p1, %p16057_p9 }
  0x88   : > { %p13904_p10 = pneg %p13903_p4 }
  0x8a   : > { %p13909_p12 = pnand %p13907_p7, %p13904_p10 }
  0x8c   : > { %13912 = shalt.err (!%p13909_p12)
}
  0x8d   : > { %s13913_s29 = scalar_lea.vmem %s270_s3, 400  ;;  %s13920_s11 = scalar_lea.vmem %s270_s3, 416 }
  0x8e   : > { %p13914_p0 = scmp.ne.s32.totalorder %s270_s3, %s13913_s29  ;;  %p13921_p2 = scmp.lt.s32.totalorder %s270_s3, %s270_s3 }
  0x8f   : > { %p13922_p3 = scmp.lt.s32.totalorder %s13920_s11, %s13913_s29 }
  0x90   : > { %p13916_p8 = pnand %p13914_p0, %p16057_p9 }
  0x91   : > { %p13923_p6 = por %p13922_p3, %p13921_p2 }
  0x92   : > { %p13917_p13 = pneg %p13916_p8 }
  0x94   : > { %p13924_p11 = pnand %p13923_p6, %p13917_p13 }
  0x96   : > { %13927 = shalt.err (!%p13924_p11)
}
  0x97   : > { %12170 = dma.hbm_to_vmem [thread:$0]  (!%p16058_p5), %s15995_s2, 400, %s270_s3, [#allocation7]  }
  0x98   : > { %s11661_s23 = smul.u32 80, %s16116_s5  ;;  %s309_s14 = scalar_lea.vmem [#allocation11], %s12140_s12 }
  0x99   : > { %s321_s30 = sshll.u32 %s309_s14, 4  ;;  %p16060_p1 = scmp.ne.s32.totalorder %s16045_s20, 0  ;;  %s322_s30 = int_to_ptr.vmem [resolvable:$true] %s321_s30 }
  0x9a   : > { %s319_s9 = scalar_lea.hbm %s15997_s4, %s11661_s23  ;;  %s13933_s6 = scalar_lea.hbm %s15997_s4, 400 }
  0x9b   : > { %s13928_s24 = scalar_lea.hbm %s319_s9, 80  ;;  %p16061_p11 = pneg %p16060_p1 }
  0x9c   : > { %p13929_p9 = scmp.ne.s32.totalorder %s319_s9, %s13928_s24  ;;  %p13934_p5 = scmp.lt.u32.totalorder %s319_s9, %s15997_s4 }
  0x9d   : > { %p13935_p7 = scmp.lt.u32.totalorder %s13933_s6, %s13928_s24  ;;  %p13937_p0 = scmp.lt.u32.totalorder %s13928_s24, %s319_s9 }
  0x9e   : > { %p13931_p4 = pnand %p13929_p9, %p16061_p11 }
  0x9f   : > { %p13936_p12 = por %p13935_p7, %p13934_p5 }
  0xa0   : > { %p13932_p10 = pneg %p13931_p4 }
  0xa1   : > { %p13938_p8 = por %p13937_p0, %p13936_p12 }
  0xa3   : > { %p13939_p13 = pnand %p13938_p8, %p13932_p10 }
  0xa5   : > { %13942 = shalt.err (!%p13939_p13)
}
  0xa6   : > { %s13943_s5 = scalar_lea.vmem %s322_s30, 80  ;;  %p16062_p3 = pmov %p16061_p11 }
  0xa7   : > { %p13944_p2 = scmp.ne.s32.totalorder %s322_s30, %s13943_s5  ;;  %s14098_s12 = smov [#allocation11]  }
  0xa8   : > { %s13948_s28 = sshll.u32 %s14098_s12, 4  ;;  %s13949_s28 = int_to_ptr.vmem [resolvable:$false] %s13948_s28 }
  0xa9   : > { %p13946_p6 = pnand %p13944_p2, %p16062_p3  ;;  %s13950_s29 = scalar_lea.vmem %s13949_s28, 160 }
  0xaa   : > { %p13951_p11 = scmp.lt.s32.totalorder %s322_s30, %s13949_s28  ;;  %p13952_p4 = scmp.lt.s32.totalorder %s13950_s29, %s13943_s5 }
  0xab   : > { %p13947_p9 = pneg %p13946_p6 }
  0xac   : > { %p13953_p5 = por %p13952_p4, %p13951_p11 }
  0xae   : > { %p13954_p7 = pnand %p13953_p5, %p13947_p9 }
  0xb0   : > { %13957 = shalt.err (!%p13954_p7)
}
  0xb1   : > { %12177 = dma.hbm_to_vmem [thread:$0]  (!%p16060_p1), %s319_s9, 80, %s322_s30, %s14314_s27  }
  0xb2   : > { %p16063_p10 = scmp.ne.s32.totalorder %s16043_s16, 0 }
  0xb3   : > { %p16064_p12 = scmp.eq.s32.totalorder (!%p16063_p10), %s14197_s8, 0 }
  0xb4   : > { %347 = sbr.rel (%p16063_p10) target bundleno = 1974 (0x7b6), region = 44 }
  0xbb   : > { %14031 = dma.done.wait (%p16064_p12), [#allocation4], 16   ;;  %p16065_p0 = pmov %p16064_p12 }
  0xbd   : > { %14033 = vsyncadd (%p16065_p0), [#allocation4], 4294967280  ;;  %p16066_p8 = pmov %p16065_p0 }
  0xbe   : > { %p16067_p13 = pmov %p16065_p0 }
  0xbf   : > { %14035 = dma.done.wait (%p16066_p8), [#allocation7], 6800  }
  0xc0   : > { %14037 = vsyncadd (%p16067_p13), [#allocation7], 4294960496  ;;  %s361_s20 = sand.u32 1, %s14197_s8   ;;  %s363_s27 = sand.u32 1, %s14064_s25  }
  0xc1   : > { %s12141_s11 = smul.u32 8000, %s363_s27  ;;  %s362_s16 = scalar_lea.sflag [#allocation10], %s361_s20 }
  0xc2   : > { %p16068_p1 = scmp.ne.s32.totalorder %s16038_s13, 0 }
  0xc3   : > { %s14419_s21 = scalar_lea.vmem [#allocation9], %s12141_s11 }
  0xc4   : > { %14039 = dma.done.wait (%p16068_p1), %s362_s16, 128080  }
  0xc5   : > { %14041 = vsyncadd (%p16068_p1), %s362_s16, 4294839216  ;;  %s16069_s17 = sld [smem:[#allocation20_spill]]  ;;  %s16070_s23 = sld [smem:[#allocation19_spill]] }
  0xc6   : > { %s14425_s14 = smul.u32 5, %s363_s27  ;;  %s414_s30 = sand.u32 1, %s14052_s22  }
  0xc7   : > { %s16071_s10 = sld [smem:[#allocation31_spill]]  ;;  %s14442_s3 = scalar_lea.vmem [#allocation12], %s414_s30 }
  0xc8   : > { %s374_s7 = scalar_lea.vmem [#allocation11], %s14425_s14 }
  0xcb   : > { %s426_s15 = smul.u32 3, %s16069_s17  ;;  %p10538_p6 = scmp.ne.s32.totalorder %s16070_s23, 0 }
  0xcc   : > { %v12293_v0 = vld [vmem:[#allocation6 + $0x4] ss:$100 sps:$4 sm:$0xff] (!%p10538_p6)   ;;  %v12295_v1 = vld [vmem:[#allocation6 + $0xc] ss:$100 sps:$4 sm:$0xff] (!%p10538_p6)   ;;  %v14099_v2 = vmov (!%p10538_p6), 0   ;;  %vm1702_vm0 = vcmask (!%p10538_p6), 253952   ;;  %v758_v53 = vlaneseq (!%p10538_p6) }
  0xcd   : > { %s14430_s8 = sadd.s32 %s16070_s23, %s426_s15  ;;  %919 = vmatprep.mubr.bf16.mxu0 (!%p10538_p6), %v14099_v2  ;;  %960 = vmatprep.mubr.bf16.mxu1 (!%p10538_p6), %v14099_v2  ;;  %v12297_v3 = vld [vmem:[#allocation6] ss:$100 sps:$4 sm:$0xff] (!%p10538_p6)   ;;  %v12298_v4 = vld [vmem:[#allocation6 + $0x8] ss:$100 sps:$4 sm:$0xff] (!%p10538_p6)   ;;  %v14100_v5 = vmov (!%p10538_p6), 0.0   ;;  %vm883_vm1 = vcmask (!%p10538_p6), 261120  }
  0xce   : > { %p428_p2 = scmp.lt.s32.totalorder %s14430_s8, 4  ;;  %887 = vmatprep.subr.bf16.mxu0 (!%p10538_p6), %v12293_v0  ;;  %1703 = vst.msk [vmem:[%s14442_s3] sm:$0x1] (!%p10538_p6), %vm1702_vm0, %v14100_v5  ;;  %928 = vmatprep.subr.bf16.mxu1 (!%p10538_p6), %v12295_v1  ;;  %v12299_v6 = vld [vmem:[#allocation6 + $0xcc] ss:$100 sps:$4 sm:$0xff] (!%p10538_p6)   ;;  %vm14101_vm2 = vmmov (!%p10538_p6), 0  }
  0xcf   : > { %888 = vmatpush1.bf16.msra.mxu0 (!%p10538_p6), %v12297_v3  ;;  %929 = vmatpush1.bf16.msra.mxu1 (!%p10538_p6), %v12298_v4  ;;  %v12301_v7 = vld [vmem:[#allocation6 + $0xd4] ss:$100 sps:$4 sm:$0xff] (!%p10538_p6)   ;;  %v12303_v8 = vld [vmem:[#allocation6 + $0xc8] ss:$100 sps:$4 sm:$0xff] (!%p10538_p6)   ;;  %v14449_v10 = vld [vmem:[#allocation3] sm:$0x1] (!%p10538_p6) }
  0xd0   : > { %s429_s1 = scalar_select %p428_p2, %s14430_s8, 4 }
  0xd1   : > { %889 = vmatprep.subr.bf16.mxu0 (!%p10538_p6), %v12299_v6  ;;  %v12304_v9 = vld [vmem:[#allocation6 + $0xd0] ss:$100 sps:$4 sm:$0xff] (!%p10538_p6)   ;;  %930 = vmatprep.subr.bf16.mxu1 (!%p10538_p6), %v12301_v7  ;;  %v12308_v13 = vld [vmem:[#allocation6 + $0x18] ss:$100 sps:$4 sm:$0xff] (!%p10538_p6)   ;;  %v12316_v16 = vld [vmem:[#allocation6 + $0xe4] ss:$100 sps:$4 sm:$0xff] (!%p10538_p6)  }
  0xd2   : > { %s430_s9 = smul.u32 80, %s429_s1  ;;  %v12305_v11 = vld [vmem:[#allocation6 + $0x10] ss:$100 sps:$4 sm:$0xff] (!%p10538_p6)   ;;  %v12310_v14 = vld [vmem:[#allocation6 + $0x1c] ss:$100 sps:$4 sm:$0xff] (!%p10538_p6)   ;;  %v759_v54 = vshrl.u32 (!%p10538_p6), %v758_v53, 7 }
  0xd3   : > { %444 = sbr.rel (%p10538_p6) target bundleno = 486 (0x1e6), region = 68  ;;  %v12307_v12 = vld [vmem:[#allocation6 + $0x14] ss:$100 sps:$4 sm:$0xff] (!%p10538_p6)   ;;  %890 = vmatpush1.bf16.msra.mxu0 (!%p10538_p6), %v12303_v8  ;;  %931 = vmatpush1.bf16.msra.mxu1 (!%p10538_p6), %v12304_v9  ;;  %v12313_v15 = vld [vmem:[#allocation6 + $0xdc] ss:$100 sps:$4 sm:$0xff] (!%p10538_p6)   ;;  %vm1659_vm3 = vcmask (!%p10538_p6), 1040384  }
  0xd4   : > { %p431_p3 = scmp.lt.s32.totalorder %s430_s9, 399  ;;  %969 = vmatprep.subr.bf16.mxu0 (!%p10538_p6), %v12307_v12  ;;  %1010 = vmatprep.subr.bf16.mxu1 (!%p10538_p6), %v12310_v14  ;;  %v12311_v17 = vld [vmem:[#allocation6 + $0xd8] ss:$100 sps:$4 sm:$0xff] (!%p10538_p6)   ;;  %v12314_v18 = vld [vmem:[#allocation6 + $0xe0] ss:$100 sps:$4 sm:$0xff] (!%p10538_p6)   ;;  %vm1662_vm5 = vcmask (!%p10538_p6), 1041409  }
  0xd5   : > { %v12319_v19 = vld [vmem:[#allocation6 + $0x24] ss:$100 sps:$4 sm:$0xff] (!%p10538_p6)   ;;  %v12322_v20 = vld [vmem:[#allocation6 + $0x2c] ss:$100 sps:$4 sm:$0xff] (!%p10538_p6)   ;;  %v12328_v24 = vld [vmem:[#allocation6 + $0xf4] ss:$100 sps:$4 sm:$0xff] (!%p10538_p6)  }
  0xd6   : > { %s16120_s9 = smov (!%p431_p3, %s430_s9), 399  ;;  %10590 = vmatmul.mubr.msk.bf16.vlgmr.msra.gmra.mrb[0].mxu0 (!%p10538_p6), %vm883_vm1, %v14449_v10  ;;  %10591 = vmatmul.mubr.msk.bf16.vlgmr.msra.gmra.mrb[0].mxu1 (!%p10538_p6), %vm883_vm1, %v14449_v10  ;;  %v12317_v21 = vld [vmem:[#allocation6 + $0x20] ss:$100 sps:$4 sm:$0xff] (!%p10538_p6)   ;;  %v12320_v22 = vld [vmem:[#allocation6 + $0x28] ss:$100 sps:$4 sm:$0xff] (!%p10538_p6)   ;;  %v14490_v55 = vsub.s32 (!%p10538_p6), 0, %v759_v54 }
  0xd7   : > { %s10537_s13 = sshll.u32 %s16120_s9, 2  ;;  %970 = vmatpush1.bf16.msra.mxu0 (!%p10538_p6), %v12305_v11  ;;  %1011 = vmatpush1.bf16.msra.mxu1 (!%p10538_p6), %v12308_v13  ;;  %v12325_v23 = vld [vmem:[#allocation6 + $0xec] ss:$100 sps:$4 sm:$0xff] (!%p10538_p6)   ;;  %v12331_v27 = vld [vmem:[#allocation6 + $0x34] ss:$100 sps:$4 sm:$0xff] (!%p10538_p6)   ;;  %v14492_v56 = vsub.s32 (!%p10538_p6), 2, %v759_v54 }
  0xd8   : > { %s14437_s6 = scalar_lea.vmem %s16071_s10, %s10537_s13  ;;  %971 = vmatprep.subr.bf16.mxu0 (!%p10538_p6), %v12313_v15  ;;  %1012 = vmatprep.subr.bf16.mxu1 (!%p10538_p6), %v12316_v16  ;;  %v12323_v25 = vld [vmem:[#allocation6 + $0xe8] ss:$100 sps:$4 sm:$0xff] (!%p10538_p6)   ;;  %v12326_v26 = vld [vmem:[#allocation6 + $0xf0] ss:$100 sps:$4 sm:$0xff] (!%p10538_p6)   ;;  %v12334_v28 = vld [vmem:[#allocation6 + $0x3c] ss:$100 sps:$4 sm:$0xff] (!%p10538_p6)  }
  0xd9   : > { %1001 = vmatprep.mubr.bf16.mxu0 (!%p10538_p6), %v14099_v2  ;;  %1042 = vmatprep.mubr.bf16.mxu1 (!%p10538_p6), %v14099_v2  ;;  %v12329_v29 = vld [vmem:[#allocation6 + $0x30] ss:$100 sps:$4 sm:$0xff] (!%p10538_p6)   ;;  %v12332_v30 = vld [vmem:[#allocation6 + $0x38] ss:$100 sps:$4 sm:$0xff] (!%p10538_p6)   ;;  %v12340_v32 = vld [vmem:[#allocation6 + $0x104] ss:$100 sps:$4 sm:$0xff] (!%p10538_p6)  }
  0xda   : > { %v12337_v31 = vld [vmem:[#allocation6 + $0xfc] ss:$100 sps:$4 sm:$0xff]   ;;  %v12343_v35 = vld [vmem:[#allocation6 + $0x44] ss:$100 sps:$4 sm:$0xff]   ;;  %v12346_v36 = vld [vmem:[#allocation6 + $0x4c] ss:$100 sps:$4 sm:$0xff]  }
  0xdb   : > { %972 = vmatpush1.bf16.msra.mxu0 %v12311_v17  ;;  %1013 = vmatpush1.bf16.msra.mxu1 %v12314_v18  ;;  %v12335_v33 = vld [vmem:[#allocation6 + $0xf8] ss:$100 sps:$4 sm:$0xff]   ;;  %v12338_v34 = vld [vmem:[#allocation6 + $0x100] ss:$100 sps:$4 sm:$0xff]   ;;  %v12344_v38 = vld [vmem:[#allocation6 + $0x48] ss:$100 sps:$4 sm:$0xff]  }
  0xdc   : > { %1051 = vmatprep.subr.bf16.mxu0 %v12319_v19  ;;  %1092 = vmatprep.subr.bf16.mxu1 %v12322_v20  ;;  %v12341_v37 = vld [vmem:[#allocation6 + $0x40] ss:$100 sps:$4 sm:$0xff]   ;;  %v12349_v39 = vld [vmem:[#allocation6 + $0x10c] ss:$100 sps:$4 sm:$0xff]   ;;  %v12352_v40 = vld [vmem:[#allocation6 + $0x114] ss:$100 sps:$4 sm:$0xff]  }
  0xdd   : > { %v12347_v41 = vld [vmem:[#allocation6 + $0x108] ss:$100 sps:$4 sm:$0xff]   ;;  %v12350_v42 = vld [vmem:[#allocation6 + $0x110] ss:$100 sps:$4 sm:$0xff]   ;;  %v12358_v44 = vld [vmem:[#allocation6 + $0x5c] ss:$100 sps:$4 sm:$0xff]  }
  0xde   : > { %10592 = vmatmul.mubr.msk.bf16.vlgmr.msra.gmra.mrb[4].mxu0 %vm883_vm1, %v14449_v10  ;;  %10593 = vmatmul.mubr.msk.bf16.vlgmr.msra.gmra.mrb[4].mxu1 %vm883_vm1, %v14449_v10  ;;  %v12355_v43 = vld [vmem:[#allocation6 + $0x54] ss:$100 sps:$4 sm:$0xff]   ;;  %v12361_v47 = vld [vmem:[#allocation6 + $0x11c] ss:$100 sps:$4 sm:$0xff]   ;;  %v12364_v48 = vld [vmem:[#allocation6 + $0x124] ss:$100 sps:$4 sm:$0xff]  }
  0xdf   : > { %1052 = vmatpush1.bf16.msra.mxu0 %v12317_v21  ;;  %1093 = vmatpush1.bf16.msra.mxu1 %v12320_v22  ;;  %v12353_v45 = vld [vmem:[#allocation6 + $0x50] ss:$100 sps:$4 sm:$0xff]   ;;  %v12356_v46 = vld [vmem:[#allocation6 + $0x58] ss:$100 sps:$4 sm:$0xff]   ;;  %v12362_v50 = vld [vmem:[#allocation6 + $0x120] ss:$100 sps:$4 sm:$0xff]  }
  0xe0   : > { %1053 = vmatprep.subr.bf16.mxu0 %v12325_v23  ;;  %1094 = vmatprep.subr.bf16.mxu1 %v12328_v24  ;;  %v12359_v49 = vld [vmem:[#allocation6 + $0x118] ss:$100 sps:$4 sm:$0xff]   ;;  %v12365_v51 = vld [vmem:[#allocation6 + $0x60] ss:$100 sps:$4 sm:$0xff]   ;;  %v12366_v52 = vld [vmem:[#allocation6 + $0x128] ss:$100 sps:$4 sm:$0xff]  }
  0xe1   : > { %1083 = vmatprep.mubr.bf16.mxu0 %v14099_v2  ;;  %1124 = vmatprep.mubr.bf16.mxu1 %v14099_v2  ;;  %vm1660_vm4 = vsmask.f32 256  ;;  %vm1663_vm6 = vsmask.f32 1280  ;;  %v14498_v58 = vld [vmem:[#allocation8] sm:$0xff]  ;;  %v14500_v59 = vsub.s32 1, %v759_v54 }
  0xe2   : > { %vm14494_vm7 = vmand %vm1659_vm3, %vm1660_vm4  ;;  %v14502_v60 = vsub.s32 3, %v759_v54  ;;  %vm1666_vm9 = vcmask 1042434   ;;  %vm1667_vm10 = vsmask.f32 2304  ;;  %v14102_v62 = vmov 1966171168  }
  0xe3   : > { %1054 = vmatpush1.bf16.msra.mxu0 %v12323_v25  ;;  %1095 = vmatpush1.bf16.msra.mxu1 %v12326_v26  ;;  %vm14504_vm8 = vmand %vm1662_vm5, %vm1663_vm6  ;;  %v1499_v63 = vunpack.c.l.s4 %v14102_v62  ;;  %v761_v0 = vrot.slane %v14498_v58, %v14490_v55  ;;  %v769_v1 = vrot.slane %v14498_v58, %v14492_v56  ;;  %vm1670_vm13 = vcmask 1043459  }
  0xe4   : > { %1133 = vmatprep.subr.bf16.mxu0 %v12331_v27  ;;  %1174 = vmatprep.subr.bf16.mxu1 %v12334_v28  ;;  %vm1665_vm11 = vmor %vm14504_vm8, %vm14494_vm7  ;;  %v773_v3 = vrot.slane %v14498_v58, %v14502_v60  ;;  %vm1671_vm14 = vsmask.f32 3328  ;;  %v14520_v7 = vsub.s32 4, %v759_v54  ;;  %v14522_v12 = vsub.s32 6, %v759_v54 }
  0xe5   : > { %vm1668_vm12 = vmand %vm1666_vm9, %vm1667_vm10  ;;  %v1500_v6 = vunpack.c.0.s8 %v1499_v63  ;;  %v14524_v13 = vsub.s32 5, %v759_v54  ;;  %v14535_v19 = vsub.s32 7, %v759_v54  ;;  %vm1678_vm5 = vcmask 1045509  }
  0xe6   : > { %10594 = vmatmul.mubr.msk.bf16.vlgmr.msra.gmra.mrb[8].mxu0 %vm883_vm1, %v14449_v10  ;;  %10595 = vmatmul.mubr.msk.bf16.vlgmr.msra.gmra.mrb[8].mxu1 %vm883_vm1, %v14449_v10  ;;  %vm14531_vm15 = vmor %vm1668_vm12, %vm1665_vm11  ;;  %v777_v28 = vrot.slane %v14498_v58, %v14520_v7  ;;  %vm1679_vm6 = vsmask.f32 5376  ;;  %vm1682_vm10 = vcmask 1046534   ;;  %vm1683_vm11 = vsmask.f32 6400 }
  0xe7   : > { %1134 = vmatpush1.bf16.msra.mxu0 %v12329_v29  ;;  %1175 = vmatpush1.bf16.msra.mxu1 %v12332_v30  ;;  %vm14539_vm0 = vmand %vm1670_vm13, %vm1671_vm14  ;;  %v14543_v26 = vsub.s32 %v1500_v6, %v759_v54  ;;  %v785_v29 = vrot.slane %v14498_v58, %v14522_v12  ;;  %vm1686_vm14 = vcmask 1047559  }
  0xe8   : > { %1135 = vmatprep.subr.bf16.mxu0 %v12337_v31  ;;  %1176 = vmatprep.subr.bf16.mxu1 %v12340_v32  ;;  %vm1673_vm3 = vmor %vm14539_vm0, %vm14531_vm15  ;;  %v781_v32 = vrot.slane %v14498_v58, %v14524_v13  ;;  %vm1687_vm15 = vsmask.f32 7424 }
  0xe9   : > { %1165 = vmatprep.mubr.bf16.mxu0 %v14099_v2  ;;  %1206 = vmatprep.mubr.bf16.mxu1 %v14099_v2  ;;  %vm14573_vm9 = vmand %vm1678_vm5, %vm1679_vm6 }
  0xea   : > { %vm1684_vm13 = vmand %vm1682_vm10, %vm1683_vm11 }
  0xeb   : > { %1136 = vmatpush1.bf16.msra.mxu0 %v12335_v33  ;;  %1177 = vmatpush1.bf16.msra.mxu1 %v12338_v34  ;;  %v789_v33 = vrot.slane %v14498_v58, %v14535_v19 }
  0xec   : > { %1215 = vmatprep.subr.bf16.mxu0 %v12343_v35  ;;  %1256 = vmatprep.subr.bf16.mxu1 %v12346_v36 }
  0xee   : > { %10596 = vmatmul.mubr.msk.bf16.vlgmr.msra.gmra.mrb[12].mxu0 %vm883_vm1, %v14449_v10  ;;  %10597 = vmatmul.mubr.msk.bf16.vlgmr.msra.gmra.mrb[12].mxu1 %vm883_vm1, %v14449_v10 }
  0xef   : > { %1216 = vmatpush1.bf16.msra.mxu0 %v12341_v37  ;;  %1257 = vmatpush1.bf16.msra.mxu1 %v12344_v38 }
  0xf0   : > { %1217 = vmatprep.subr.bf16.mxu0 %v12349_v39  ;;  %1258 = vmatprep.subr.bf16.mxu1 %v12352_v40 }
  0xf1   : > { %1247 = vmatprep.mubr.bf16.mxu0 %v14099_v2  ;;  %1288 = vmatprep.mubr.bf16.mxu1 %v14099_v2 }
  0xf3   : > { %1218 = vmatpush1.bf16.msra.mxu0 %v12347_v41  ;;  %1259 = vmatpush1.bf16.msra.mxu1 %v12350_v42 }
  0xf4   : > { %1297 = vmatprep.subr.bf16.mxu0 %v12355_v43  ;;  %1338 = vmatprep.subr.bf16.mxu1 %v12358_v44 }
  0xf6   : > { %10598 = vmatmul.mubr.msk.bf16.vlgmr.msra.gmra.mrb[16].mxu0 %vm883_vm1, %v14449_v10  ;;  %10599 = vmatmul.mubr.msk.bf16.vlgmr.msra.gmra.mrb[16].mxu1 %vm883_vm1, %v14449_v10 }
  0xf7   : > { %1298 = vmatpush1.bf16.msra.mxu0 %v12353_v45  ;;  %1339 = vmatpush1.bf16.msra.mxu1 %v12356_v46 }
  0xf8   : > { %1299 = vmatprep.subr.bf16.mxu0 %v12361_v47  ;;  %1340 = vmatprep.subr.bf16.mxu1 %v12364_v48  ;;  %v14569_v48 = vld [vmem:[#allocation8 + $0x8] sm:$0xff] }
  0xf9   : > { %1329 = vmatprep.mubr.bf16.mxu0 %v14099_v2  ;;  %1370 = vmatprep.mubr.bf16.mxu1 %v14099_v2  ;;  %v765_v2 = vrot.slane %v14498_v58, %v14500_v59  ;;  %v793_v61 = vrot.slane %v14569_v48, %v14490_v55  ;;  %v801_v62 = vrot.slane %v14569_v48, %v14492_v56 }
  0xfb   : > { %1300 = vmatpush1.bf16.msra.mxu0 %v12359_v49  ;;  %1341 = vmatpush1.bf16.msra.mxu1 %v12362_v50 }
  0xfc   : > { %11991 = vmatprep.subr.bf16.mxu0 %v14100_v5 }
  0xfe   : > { %10600 = vmatmul.mubr.msk.bf16.vlgmr.msra.gmra.mrb[20].mxu0 %vm883_vm1, %v14449_v10  ;;  %10601 = vmatmul.mubr.msk.bf16.vlgmr.msra.gmra.mrb[20].mxu1 %vm883_vm1, %v14449_v10 }
  0xff   : > { %11992 = vmatpush3.bf16.msra.mxu0 %v12365_v51  ;;  %11995 = vmatprep.mubr.msk.bf16.mxu0 %vm14101_vm2, %v14100_v5  ;;  %vm1675_vm2 = vsmask.f32 4352 }
 0x100   : > { %11993 = vmatprep.subr.bf16.mxu0 %v14100_v5 }
 0x103   : > { %11994 = vmatpush3.bf16.msra.mxu0 %v12366_v52 }
 0x106   : > { %11996 = vmatmul.mubr.msk.bf16.vlgmr.msra.gmra.mrb[24].mxu0 %vm883_vm1, %v14449_v10  ;;  %vm1674_vm1 = vcmask 1044484  }
 0x107   : > { %vm1676_vm4 = vmand %vm1674_vm1, %vm1675_vm2 }
 0x108   : > { %vm14565_vm8 = vmor %vm1676_vm4, %vm1673_vm3 }
 0x109   : > { %vm1681_vm12 = vmor %vm14573_vm9, %vm14565_vm8 }
 0x10a   : > { %vm14597_vm0 = vmor %vm1684_vm13, %vm1681_vm12 }
 0x10b   : > { %vm1688_vm1 = vmand %vm1686_vm14, %vm1687_vm15 }
 0x10c   : > { %vm14613_vm2 = vmor %vm1688_vm1, %vm14597_vm0 }
 0x1a9   : > { %v921_v4 = vpop.f32.mrb[0].mxu0  ;;  %v962_v5 = vpop.f32.mrb[0].mxu1 }
 0x1aa   : > { %v922_v8 = vadd.f32 %v921_v4, %v761_v0  ;;  %v963_v9 = vadd.f32 %v962_v5, %v769_v1  ;;  %v923_v10 = vpop.f32.mrb[1].mxu0  ;;  %v964_v11 = vpop.f32.mrb[1].mxu1  ;;  %v797_v1 = vrot.slane %v14569_v48, %v14500_v59 }
 0x1ab   : > { %v924_v15 = vadd.f32 %v923_v10, %v765_v2  ;;  %v965_v16 = vadd.f32 %v964_v11, %v773_v3  ;;  %v925_v17 = vpop.f32.mrb[2].mxu0  ;;  %v966_v18 = vpop.f32.mrb[2].mxu1  ;;  %v805_v2 = vrot.slane %v14569_v48, %v14502_v60 }
 0x1ac   : > { %v1419_v21 = vmax.f32 %v922_v8, 0.0  ;;  %v1421_v22 = vmax.f32 %v963_v9, 0.0  ;;  %v926_v23 = vpop.f32.mrb[3].mxu0  ;;  %v967_v24 = vpop.f32.mrb[3].mxu1 }
 0x1ad   : > { %v1420_v25 = vmax.f32 %v924_v15, 0.0  ;;  %v1422_v27 = vmax.f32 %v965_v16, 0.0 }
 0x1af   : > { %v10603_v30 = vpack.c.bf16 %v1420_v25, %v1419_v21  ;;  %v10604_v31 = vpack.c.bf16 %v1422_v27, %v1421_v22 }
 0x1b1   : > { %v1504_v34 = vrot.slane %v10603_v30, %v14543_v26  ;;  %v1511_v35 = vrot.slane %v10604_v31, %v14543_v26  ;;  %v1003_v36 = vpop.f32.mrb[4].mxu0  ;;  %v1044_v37 = vpop.f32.mrb[4].mxu1  ;;  %v809_v30 = vrot.slane %v14569_v48, %v14520_v7  ;;  %v817_v31 = vrot.slane %v14569_v48, %v14522_v12 }
 0x1b2   : > { %v1004_v38 = vadd.f32 %v1003_v36, %v777_v28  ;;  %v1045_v39 = vadd.f32 %v1044_v37, %v785_v29  ;;  %v1005_v40 = vpop.f32.mrb[5].mxu0  ;;  %v1046_v41 = vpop.f32.mrb[5].mxu1 }
 0x1b3   : > { %v1526_v43 = vcombine.low %v1504_v34, %v1511_v35  ;;  %v1006_v44 = vadd.f32 %v1005_v40, %v781_v32  ;;  %v1047_v45 = vadd.f32 %v1046_v41, %v789_v33  ;;  %v1007_v46 = vpop.f32.mrb[6].mxu0  ;;  %v1048_v47 = vpop.f32.mrb[6].mxu1  ;;  %v813_v32 = vrot.slane %v14569_v48, %v14524_v13  ;;  %v1690_v34 = vld [vmem:[#allocation2] sm:$0xff] }
 0x1b4   : > { %v1423_v50 = vmax.f32 %v1004_v38, 0.0  ;;  %v1425_v51 = vmax.f32 %v1045_v39, 0.0  ;;  %v1008_v52 = vpop.f32.mrb[7].mxu0  ;;  %v1049_v53 = vpop.f32.mrb[7].mxu1  ;;  %v821_v38 = vrot.slane %v14569_v48, %v14535_v19  ;;  %v500_v48 = vld [vmem:[#allocation8 + $0x10] sm:$0xff] }
 0x1b5   : > { %v1424_v54 = vmax.f32 %v1006_v44, 0.0  ;;  %v1426_v58 = vmax.f32 %v1047_v45, 0.0  ;;  %v1534_v25 = vrot.slane %v1526_v43, %v14543_v26 }
 0x1b7   : > { %v10605_v63 = vpack.c.bf16 %v1424_v54, %v1423_v50  ;;  %v10606_v0 = vpack.c.bf16 %v1426_v58, %v1425_v51 }
 0x1b9   : > { %v1518_v3 = vrot.slane %v10605_v63, %v14543_v26  ;;  %v1525_v4 = vrot.slane %v10606_v0, %v14543_v26  ;;  %v1085_v5 = vpop.f32.mrb[8].mxu0  ;;  %v1126_v6 = vpop.f32.mrb[8].mxu1 }
 0x1ba   : > { %v1086_v8 = vadd.f32 %v1085_v5, %v793_v61  ;;  %v1127_v9 = vadd.f32 %v1126_v6, %v801_v62  ;;  %v1087_v10 = vpop.f32.mrb[9].mxu0  ;;  %v1128_v11 = vpop.f32.mrb[9].mxu1  ;;  %v829_v5 = vrot.slane %v500_v48, %v14500_v59  ;;  %v837_v6 = vrot.slane %v500_v48, %v14502_v60 }
 0x1bb   : > { %v1527_v15 = vcombine.low %v1518_v3, %v1525_v4  ;;  %v1088_v16 = vadd.f32 %v1087_v10, %v797_v1  ;;  %v1129_v17 = vadd.f32 %v1128_v11, %v805_v2  ;;  %v1089_v18 = vpop.f32.mrb[10].mxu0  ;;  %v1130_v20 = vpop.f32.mrb[10].mxu1  ;;  %v825_v1 = vrot.slane %v500_v48, %v14490_v55 }
 0x1bc   : > { %v1427_v21 = vmax.f32 %v1086_v8, 0.0  ;;  %v1429_v22 = vmax.f32 %v1127_v9, 0.0  ;;  %v1090_v23 = vpop.f32.mrb[11].mxu0  ;;  %v1131_v24 = vpop.f32.mrb[11].mxu1  ;;  %v833_v2 = vrot.slane %v500_v48, %v14492_v56 }
 0x1bd   : > { %v1541_v27 = vrot.slane %v1527_v15, %v14543_v26  ;;  %v1428_v28 = vmax.f32 %v1088_v16, 0.0  ;;  %v1430_v29 = vmax.f32 %v1129_v17, 0.0 }
 0x1bf   : > { %v1542_v35 = vcombine.low %v1534_v25, %v1541_v27  ;;  %v10607_v36 = vpack.c.bf16 %v1428_v28, %v1427_v21  ;;  %v10608_v37 = vpack.c.bf16 %v1430_v29, %v1429_v22  ;;  %v841_v29 = vrot.slane %v500_v48, %v14520_v7 }
 0x1c1   : > { %v1553_v39 = vrot.slane %v10607_v36, %v14543_v26  ;;  %v1560_v40 = vrot.slane %v10608_v37, %v14543_v26  ;;  %v1167_v41 = vpop.f32.mrb[12].mxu0  ;;  %v1208_v42 = vpop.f32.mrb[12].mxu1  ;;  %v1691_v43 = vsel %vm14613_vm2, %v1542_v35, %v1690_v34  ;;  %v853_v37 = vrot.slane %v500_v48, %v14535_v19 }
 0x1c2   : > { %v1168_v44 = vadd.f32 %v1167_v41, %v809_v30  ;;  %v1209_v45 = vadd.f32 %v1208_v42, %v817_v31  ;;  %v1169_v46 = vpop.f32.mrb[13].mxu0  ;;  %v1210_v47 = vpop.f32.mrb[13].mxu1  ;;  %1692 = vst [vmem:[#allocation2] sm:$0xff] %v1691_v43  ;;  %v849_v30 = vrot.slane %v500_v48, %v14522_v12  ;;  %v845_v31 = vrot.slane %v500_v48, %v14524_v13 }
 0x1c3   : > { %v1575_v49 = vcombine.low %v1553_v39, %v1560_v40  ;;  %v1170_v50 = vadd.f32 %v1169_v46, %v813_v32  ;;  %v1211_v51 = vadd.f32 %v1210_v47, %v821_v38  ;;  %v1171_v52 = vpop.f32.mrb[14].mxu0  ;;  %v1212_v53 = vpop.f32.mrb[14].mxu1  ;;  %v1693_v32 = vld [vmem:[#allocation2 + $0x8] sm:$0xff] }
 0x1c4   : > { %v1431_v54 = vmax.f32 %v1168_v44, 0.0  ;;  %v1433_v58 = vmax.f32 %v1209_v45, 0.0  ;;  %v1172_v61 = vpop.f32.mrb[15].mxu0  ;;  %v1213_v62 = vpop.f32.mrb[15].mxu1 }
 0x1c5   : > { %v1432_v63 = vmax.f32 %v1170_v50, 0.0  ;;  %v1434_v0 = vmax.f32 %v1211_v51, 0.0  ;;  %v1583_v60 = vrot.slane %v1575_v49, %v14543_v26  ;;  %v10589_v61 = vld [vmem:[#allocation8 + $0x18] ss:$0 sm:$0xff] }
 0x1c7   : > { %v10609_v3 = vpack.c.bf16 %v1432_v63, %v1431_v54  ;;  %v10610_v4 = vpack.c.bf16 %v1434_v0, %v1433_v58 }
 0x1c9   : > { %v1567_v8 = vrot.slane %v10609_v3, %v14543_v26  ;;  %v1574_v9 = vrot.slane %v10610_v4, %v14543_v26  ;;  %v1249_v10 = vpop.f32.mrb[16].mxu0  ;;  %v1290_v11 = vpop.f32.mrb[16].mxu1 }
 0x1ca   : > { %v1250_v14 = vadd.f32 %v1249_v10, %v825_v1  ;;  %v1291_v15 = vadd.f32 %v1290_v11, %v833_v2  ;;  %v1251_v16 = vpop.f32.mrb[17].mxu0  ;;  %v1292_v17 = vpop.f32.mrb[17].mxu1  ;;  %v1696_v11 = vld [vmem:[#allocation2 + $0x10] sm:$0xff] }
 0x1cb   : > { %v1576_v18 = vcombine.low %v1567_v8, %v1574_v9  ;;  %v1252_v55 = vadd.f32 %v1251_v16, %v829_v5  ;;  %v1293_v20 = vadd.f32 %v1292_v17, %v837_v6  ;;  %v1253_v56 = vpop.f32.mrb[18].mxu0  ;;  %v1294_v21 = vpop.f32.mrb[18].mxu1  ;;  %v1699_v17 = vld [vmem:[#allocation2 + $0x18] sm:$0x1] }
 0x1cc   : > { %v1435_v22 = vmax.f32 %v1250_v14, 0.0  ;;  %v1437_v23 = vmax.f32 %v1291_v15, 0.0  ;;  %v1254_v59 = vpop.f32.mrb[19].mxu0  ;;  %v1295_v24 = vpop.f32.mrb[19].mxu1 }
 0x1cd   : > { %v1590_v25 = vrot.slane %v1576_v18, %v14543_v26  ;;  %v1436_v27 = vmax.f32 %v1252_v55, 0.0  ;;  %v1438_v28 = vmax.f32 %v1293_v20, 0.0 }
 0x1cf   : > { %v1591_v34 = vcombine.low %v1583_v60, %v1590_v25  ;;  %v10611_v35 = vpack.c.bf16 %v1436_v27, %v1435_v22  ;;  %v10612_v36 = vpack.c.bf16 %v1438_v28, %v1437_v23 }
 0x1d1   : > { %v1602_v38 = vrot.slane %v10611_v35, %v14543_v26  ;;  %v1609_v39 = vrot.slane %v10612_v36, %v14543_v26  ;;  %v1331_v40 = vpop.f32.mrb[20].mxu0  ;;  %v1372_v41 = vpop.f32.mrb[20].mxu1  ;;  %v1694_v42 = vsel %vm14613_vm2, %v1591_v34, %v1693_v32 }
 0x1d2   : > { %v1332_v7 = vadd.f32 %v1331_v40, %v841_v29  ;;  %v1373_v43 = vadd.f32 %v1372_v41, %v849_v30  ;;  %v1333_v12 = vpop.f32.mrb[21].mxu0  ;;  %v1374_v44 = vpop.f32.mrb[21].mxu1  ;;  %1695 = vst [vmem:[#allocation2 + $0x8] sm:$0xff] %v1694_v42 }
 0x1d3   : > { %v1624_v13 = vcombine.low %v1602_v38, %v1609_v39  ;;  %v1334_v45 = vadd.f32 %v1333_v12, %v845_v31  ;;  %v1375_v46 = vadd.f32 %v1374_v44, %v853_v37  ;;  %v1335_v47 = vpop.f32.mrb[22].mxu0  ;;  %v1376_v49 = vpop.f32.mrb[22].mxu1 }
 0x1d4   : > { %v1439_v19 = vmax.f32 %v1332_v7, 0.0  ;;  %v1441_v50 = vmax.f32 %v1373_v43, 0.0  ;;  %v1336_v51 = vpop.f32.mrb[23].mxu0  ;;  %v1377_v52 = vpop.f32.mrb[23].mxu1 }
 0x1d5   : > { %v1440_v53 = vmax.f32 %v1334_v45, 0.0  ;;  %v1442_v48 = vmax.f32 %v1375_v46, 0.0  ;;  %v1632_v8 = vrot.slane %v1624_v13, %v14543_v26 }
 0x1d7   : > { %v10613_v54 = vpack.c.bf16 %v1440_v53, %v1439_v19  ;;  %v10614_v58 = vpack.c.bf16 %v1442_v48, %v1441_v50 }
 0x1d9   : > { %v1616_v62 = vrot.slane %v10613_v54, %v14543_v26  ;;  %v1623_v63 = vrot.slane %v10614_v58, %v14543_v26  ;;  %v1413_v0 = vpop.f32.mrb[24].mxu0 }
 0x1da   : > { %v1414_v1 = vadd.f32 %v10589_v61, %v1413_v0  ;;  %v11997_v2 = vpop.f32.mrb[25].mxu0 }
 0x1db   : > { %v1625_v3 = vcombine.low %v1616_v62, %v1623_v63  ;;  %v1416_v4 = vpop.f32.mrb[26].mxu0 }
 0x1dc   : > { %v1443_v5 = vmax.f32 %v1414_v1, 0.0  ;;  %v11998_v6 = vpop.f32.mrb[27].mxu0 }
 0x1dd   : > { %v1639_v9 = vrot.slane %v1625_v3, %v14543_v26 }
 0x1de   : > { %v1468_v10 = vpack.c.bf16 %v1443_v5, %v1443_v5 }
 0x1df   : > { %v1640_v14 = vcombine.low %v1632_v8, %v1639_v9 }
 0x1e0   : > { %v1647_v15 = vrot.slane %v1468_v10, %v14543_v26 }
 0x1e1   : > { %v1697_v16 = vsel %vm14613_vm2, %v1640_v14, %v1696_v11 }
 0x1e2   : > { %v1654_v18 = vrot.slane %v1647_v15, %v14543_v26  ;;  %1698 = vst [vmem:[#allocation2 + $0x10] sm:$0xff] %v1697_v16 }
 0x1e4   : > { %v1700_v55 = vsel %vm14494_vm7, %v1654_v18, %v1699_v17 }
 0x1e5   : > { %1701 = vst [vmem:[#allocation2 + $0x18] sm:$0x1] %v1700_v55 }
 0x1e6 PF: > { %p10615_p9 = scmp.ge.s32.totalorder %s14430_s8, 5 }
 0x1e7   : > { %v12367_v26 = vld [vmem:[%s14419_s21 + $0x4] ss:$20 sps:$4 sm:$0xff] (!%p10615_p9)   ;;  %v12369_v33 = vld [vmem:[%s14419_s21 + $0xc] ss:$20 sps:$4 sm:$0xff] (!%p10615_p9)   ;;  %v12372_v20 = vld [vmem:[%s14419_s21 + $0x8] ss:$20 sps:$4 sm:$0xff] (!%p10615_p9)   ;;  %v2923_v51 = vlaneseq (!%p10615_p9) }
 0x1e8   : > { %1709 = sbr.rel (%p10615_p9) target bundleno = 1947 (0x79b), region = 72  ;;  %8331 = vmatprep.subr.bf16.mxu0 (!%p10615_p9), %v12367_v26  ;;  %v12371_v57 = vld [vmem:[%s14419_s21] ss:$20 sps:$4 sm:$0xff] (!%p10615_p9)   ;;  %8864 = vmatprep.subr.bf16.mxu1 (!%p10615_p9), %v12369_v33  ;;  %v12377_v22 = vld [vmem:[%s14419_s21 + $0x28] ss:$20 sps:$4 sm:$0xff] (!%p10615_p9)   ;;  %vm14106_vm7 = vmmov (!%p10615_p9), 0  }
 0x1e9   : > { %v12373_v56 = vld [vmem:[%s14419_s21 + $0x2c] ss:$20 sps:$4 sm:$0xff] (!%p10615_p9)   ;;  %8332 = vmatpush1.bf16.msra.mxu0 (!%p10615_p9), %v12371_v57  ;;  %8865 = vmatpush1.bf16.msra.mxu1 (!%p10615_p9), %v12372_v20  ;;  %v12375_v21 = vld [vmem:[%s14419_s21 + $0x34] ss:$20 sps:$4 sm:$0xff] (!%p10615_p9)   ;;  %v12378_v23 = vld [vmem:[%s14419_s21 + $0x30] ss:$20 sps:$4 sm:$0xff] (!%p10615_p9)  }
 0x1ea   : > { %8333 = vmatprep.subr.bf16.mxu0 (!%p10615_p9), %v12373_v56  ;;  %8866 = vmatprep.subr.bf16.mxu1 (!%p10615_p9), %v12375_v21  ;;  %v12379_v59 = vld [vmem:[%s14419_s21 + $0x54] ss:$20 sps:$4 sm:$0xff] (!%p10615_p9)   ;;  %v12381_v24 = vld [vmem:[%s14419_s21 + $0x5c] ss:$20 sps:$4 sm:$0xff] (!%p10615_p9)   ;;  %v12384_v25 = vld [vmem:[%s14419_s21 + $0x58] ss:$20 sps:$4 sm:$0xff] (!%p10615_p9)  }
 0x1eb   : > { %v12383_v60 = vld [vmem:[%s14419_s21 + $0x50] ss:$20 sps:$4 sm:$0xff] (!%p10615_p9)   ;;  %v12389_v29 = vld [vmem:[%s14419_s21 + $0x78] ss:$20 sps:$4 sm:$0xff] (!%p10615_p9)   ;;  %v12390_v30 = vld [vmem:[%s14419_s21 + $0x80] ss:$20 sps:$4 sm:$0xff] (!%p10615_p9)  }
 0x1ec   : > { %v12385_v27 = vld [vmem:[%s14419_s21 + $0x7c] ss:$20 sps:$4 sm:$0xff] (!%p10615_p9)   ;;  %v12387_v28 = vld [vmem:[%s14419_s21 + $0x84] ss:$20 sps:$4 sm:$0xff] (!%p10615_p9)   ;;  %v12393_v32 = vld [vmem:[%s14419_s21 + $0xac] ss:$20 sps:$4 sm:$0xff] (!%p10615_p9)  }
 0x1ed   : > { %8334 = vmatpush1.bf16.msra.mxu0 (!%p10615_p9), %v12377_v22  ;;  %8867 = vmatpush1.bf16.msra.mxu1 (!%p10615_p9), %v12378_v23  ;;  %v12391_v31 = vld [vmem:[%s14419_s21 + $0xa4] ss:$20 sps:$4 sm:$0xff] (!%p10615_p9)   ;;  %v12395_v34 = vld [vmem:[%s14419_s21 + $0xa0] ss:$20 sps:$4 sm:$0xff] (!%p10615_p9)   ;;  %v12396_v35 = vld [vmem:[%s14419_s21 + $0xa8] ss:$20 sps:$4 sm:$0xff] (!%p10615_p9)  }
 0x1ee   : > { %8335 = vmatprep.subr.bf16.mxu0 (!%p10615_p9), %v12379_v59  ;;  %8868 = vmatprep.subr.bf16.mxu1 (!%p10615_p9), %v12381_v24  ;;  %v12397_v36 = vld [vmem:[%s14419_s21 + $0xcc] ss:$20 sps:$4 sm:$0xff] (!%p10615_p9)   ;;  %v12399_v37 = vld [vmem:[%s14419_s21 + $0xd4] ss:$20 sps:$4 sm:$0xff] (!%p10615_p9)   ;;  %v12402_v39 = vld [vmem:[%s14419_s21 + $0xd0] ss:$20 sps:$4 sm:$0xff] (!%p10615_p9)  }
 0x1ef   : > { %v12401_v38 = vld [vmem:[%s14419_s21 + $0xc8] ss:$20 sps:$4 sm:$0xff]   ;;  %v12407_v42 = vld [vmem:[%s14419_s21 + $0xf0] ss:$20 sps:$4 sm:$0xff]   ;;  %v12408_v7 = vld [vmem:[%s14419_s21 + $0xf8] ss:$20 sps:$4 sm:$0xff]  }
 0x1f0   : > { %v12403_v40 = vld [vmem:[%s14419_s21 + $0xf4] ss:$20 sps:$4 sm:$0xff]   ;;  %v12405_v41 = vld [vmem:[%s14419_s21 + $0xfc] ss:$20 sps:$4 sm:$0xff]   ;;  %v12411_v12 = vld [vmem:[%s14419_s21 + $0x124] ss:$20 sps:$4 sm:$0xff]  }
 0x1f1   : > { %8336 = vmatpush1.bf16.msra.mxu0 %v12383_v60  ;;  %8869 = vmatpush1.bf16.msra.mxu1 %v12384_v25  ;;  %v12409_v43 = vld [vmem:[%s14419_s21 + $0x11c] ss:$20 sps:$4 sm:$0xff]   ;;  %v12413_v44 = vld [vmem:[%s14419_s21 + $0x118] ss:$20 sps:$4 sm:$0xff]   ;;  %v12414_v13 = vld [vmem:[%s14419_s21 + $0x120] ss:$20 sps:$4 sm:$0xff]  }
 0x1f2   : > { %8337 = vmatprep.subr.bf16.mxu0 %v12385_v27  ;;  %8870 = vmatprep.subr.bf16.mxu1 %v12387_v28  ;;  %v12415_v45 = vld [vmem:[%s14419_s21 + $0x144] ss:$20 sps:$4 sm:$0xff]   ;;  %v12417_v46 = vld [vmem:[%s14419_s21 + $0x14c] ss:$20 sps:$4 sm:$0xff]   ;;  %v12420_v49 = vld [vmem:[%s14419_s21 + $0x148] ss:$20 sps:$4 sm:$0xff]  }
 0x1f3   : > { %v12419_v47 = vld [vmem:[%s14419_s21 + $0x140] ss:$20 sps:$4 sm:$0xff]   ;;  %v14103_v19 = vmov 1966171168   ;;  %v12425_v48 = vld [vmem:[%s14419_s21 + $0x168] ss:$20 sps:$4 sm:$0xff]  }
 0x1f4   : > { %v2921_v50 = vunpack.c.l.s4 %v14103_v19  ;;  %v12421_v52 = vld [vmem:[%s14419_s21 + $0x16c] ss:$20 sps:$4 sm:$0xff]   ;;  %v12423_v53 = vld [vmem:[%s14419_s21 + $0x174] ss:$20 sps:$4 sm:$0xff]   ;;  %v14689_v58 = vshrl.u32 %v2923_v51, 7  ;;  %vm10369_vm3 = vcmask 253952  }
 0x1f5   : > { %8338 = vmatpush1.bf16.msra.mxu0 %v12389_v29  ;;  %8871 = vmatpush1.bf16.msra.mxu1 %v12390_v30  ;;  %v12426_v61 = vld [vmem:[%s14419_s21 + $0x170] ss:$20 sps:$4 sm:$0xff]   ;;  %v12427_v62 = vld [vmem:[%s14419_s21 + $0x194] ss:$20 sps:$4 sm:$0xff]   ;;  %v12432_v1 = vld [vmem:[%s14419_s21 + $0x198] ss:$20 sps:$4 sm:$0xff]  }
 0x1f6   : > { %8339 = vmatprep.subr.bf16.mxu0 %v12391_v31  ;;  %8872 = vmatprep.subr.bf16.mxu1 %v12393_v32  ;;  %v2922_v54 = vunpack.c.0.s8 %v2921_v50  ;;  %v12429_v63 = vld [vmem:[%s14419_s21 + $0x19c] ss:$20 sps:$4 sm:$0xff]   ;;  %v12435_v4 = vld [vmem:[%s14419_s21 + $0x1c4] ss:$20 sps:$4 sm:$0xff]   ;;  %v12438_v9 = vld [vmem:[%s14419_s21 + $0x1c0] ss:$20 sps:$4 sm:$0xff]  }
 0x1f7   : > { %v12431_v0 = vld [vmem:[%s14419_s21 + $0x190] ss:$20 sps:$4 sm:$0xff]   ;;  %v14701_v5 = vld [vmem:[#allocation2] sm:$0xff]  ;;  %v12447_v55 = vld [vmem:[%s14419_s21 + $0x214] ss:$20 sps:$4 sm:$0xff]  }
 0x1f8   : > { %v14697_v2 = vsub.s32 %v2922_v54, %v14689_v58  ;;  %v12433_v3 = vld [vmem:[%s14419_s21 + $0x1bc] ss:$20 sps:$4 sm:$0xff]   ;;  %v12437_v6 = vld [vmem:[%s14419_s21 + $0x1b8] ss:$20 sps:$4 sm:$0xff]   ;;  %v12443_v15 = vld [vmem:[%s14419_s21 + $0x1e0] ss:$20 sps:$4 sm:$0xff]  }
 0x1f9   : > { %8340 = vmatpush1.bf16.msra.mxu0 %v12395_v34  ;;  %8873 = vmatpush1.bf16.msra.mxu1 %v12396_v35  ;;  %v12439_v10 = vld [vmem:[%s14419_s21 + $0x1e4] ss:$20 sps:$4 sm:$0xff]   ;;  %v12441_v11 = vld [vmem:[%s14419_s21 + $0x1ec] ss:$20 sps:$4 sm:$0xff]   ;;  %v12444_v17 = vld [vmem:[%s14419_s21 + $0x1e8] ss:$20 sps:$4 sm:$0xff]  }
 0x1fa   : > { %8341 = vmatprep.subr.bf16.mxu0 %v12397_v36  ;;  %8874 = vmatprep.subr.bf16.mxu1 %v12399_v37  ;;  %v2926_v8 = vrot.slane %v14701_v5, %v14697_v2  ;;  %v12445_v18 = vld [vmem:[%s14419_s21 + $0x20c] ss:$20 sps:$4 sm:$0xff]   ;;  %v12449_v26 = vld [vmem:[%s14419_s21 + $0x208] ss:$20 sps:$4 sm:$0xff]   ;;  %v12450_v33 = vld [vmem:[%s14419_s21 + $0x210] ss:$20 sps:$4 sm:$0xff]  }
 0x1fb   : > { %v12451_v57 = vld [vmem:[%s14419_s21 + $0x234] ss:$20 sps:$4 sm:$0xff]   ;;  %v12453_v20 = vld [vmem:[%s14419_s21 + $0x23c] ss:$20 sps:$4 sm:$0xff]   ;;  %v12456_v21 = vld [vmem:[%s14419_s21 + $0x238] ss:$20 sps:$4 sm:$0xff]  }
 0x1fc   : > { %v2934_v14 = vcombine.high %v2926_v8, %v2926_v8  ;;  %v12455_v56 = vld [vmem:[%s14419_s21 + $0x230] ss:$20 sps:$4 sm:$0xff]   ;;  %v12461_v59 = vld [vmem:[%s14419_s21 + $0x258] ss:$20 sps:$4 sm:$0xff]   ;;  %v12462_v24 = vld [vmem:[%s14419_s21 + $0x260] ss:$20 sps:$4 sm:$0xff]   ;;  %v14732_v28 = vrot.slane %v2926_v8, %v14697_v2 }
 0x1fd   : > { %8342 = vmatpush1.bf16.msra.mxu0 %v12401_v38  ;;  %8875 = vmatpush1.bf16.msra.mxu1 %v12402_v39  ;;  %v12457_v22 = vld [vmem:[%s14419_s21 + $0x25c] ss:$20 sps:$4 sm:$0xff]   ;;  %v12459_v23 = vld [vmem:[%s14419_s21 + $0x264] ss:$20 sps:$4 sm:$0xff]   ;;  %v12468_v25 = vld [vmem:[%s14419_s21 + $0x28c] ss:$20 sps:$4 sm:$0xff]  }
 0x1fe   : > { %8343 = vmatprep.subr.bf16.mxu0 %v12403_v40  ;;  %8876 = vmatprep.subr.bf16.mxu1 %v12405_v41  ;;  %v14711_v16 = vrot.slane %v2934_v14, %v14697_v2  ;;  %v12465_v60 = vld [vmem:[%s14419_s21 + $0x284] ss:$20 sps:$4 sm:$0xff]   ;;  %v12463_v27 = vld [vmem:[%s14419_s21 + $0x280] ss:$20 sps:$4 sm:$0xff]   ;;  %v12466_v29 = vld [vmem:[%s14419_s21 + $0x288] ss:$20 sps:$4 sm:$0xff]  }
 0x1ff   : > { %v12471_v30 = vld [vmem:[%s14419_s21 + $0x2ac] ss:$20 sps:$4 sm:$0xff]   ;;  %v12474_v31 = vld [vmem:[%s14419_s21 + $0x2b4] ss:$20 sps:$4 sm:$0xff]   ;;  %v12472_v35 = vld [vmem:[%s14419_s21 + $0x2b0] ss:$20 sps:$4 sm:$0xff]  }
 0x200   : > { %8363 = vmatprep.mubr.bf16.mxu0 %v14711_v16  ;;  %8896 = vmatprep.mubr.bf16.mxu1 %v14711_v16  ;;  %v14739_v32 = vcombine.high %v14711_v16, %v14711_v16  ;;  %v12469_v34 = vld [vmem:[%s14419_s21 + $0x2a8] ss:$20 sps:$4 sm:$0xff]   ;;  %v12475_v38 = vld [vmem:[%s14419_s21 + $0x2d0] ss:$20 sps:$4 sm:$0xff]   ;;  %v12478_v39 = vld [vmem:[%s14419_s21 + $0x2d8] ss:$20 sps:$4 sm:$0xff]  }
 0x201   : > { %8344 = vmatpush1.bf16.msra.mxu0 %v12407_v42  ;;  %8877 = vmatpush1.bf16.msra.mxu1 %v12408_v7  ;;  %v12477_v36 = vld [vmem:[%s14419_s21 + $0x2d4] ss:$20 sps:$4 sm:$0xff]   ;;  %v12480_v37 = vld [vmem:[%s14419_s21 + $0x2dc] ss:$20 sps:$4 sm:$0xff]   ;;  %v12486_v41 = vld [vmem:[%s14419_s21 + $0x304] ss:$20 sps:$4 sm:$0xff]  }
 0x202   : > { %8345 = vmatprep.subr.bf16.mxu0 %v12409_v43  ;;  %8878 = vmatprep.subr.bf16.mxu1 %v12411_v12  ;;  %v12483_v40 = vld [vmem:[%s14419_s21 + $0x2fc] ss:$20 sps:$4 sm:$0xff]   ;;  %v12481_v42 = vld [vmem:[%s14419_s21 + $0x2f8] ss:$20 sps:$4 sm:$0xff]   ;;  %v12484_v7 = vld [vmem:[%s14419_s21 + $0x300] ss:$20 sps:$4 sm:$0xff]  }
 0x203   : > { %v12489_v43 = vld [vmem:[%s14419_s21 + $0x324] ss:$20 sps:$4 sm:$0xff]   ;;  %v12492_v12 = vld [vmem:[%s14419_s21 + $0x32c] ss:$20 sps:$4 sm:$0xff]   ;;  %v12501_v19 = vld [vmem:[%s14419_s21 + $0x374] ss:$20 sps:$4 sm:$0xff]  }
 0x204   : > { %v12504_v50 = vld [vmem:[%s14419_s21 + $0x37c] ss:$20 sps:$4 sm:$0xff]   ;;  %v12505_v54 = vld [vmem:[%s14419_s21 + $0x398] ss:$20 sps:$4 sm:$0xff]  }
 0x205   : > { %8346 = vmatpush1.bf16.msra.mxu0 %v12413_v44  ;;  %8879 = vmatpush1.bf16.msra.mxu1 %v12414_v13  ;;  %v12487_v44 = vld [vmem:[%s14419_s21 + $0x320] ss:$20 sps:$4 sm:$0xff]   ;;  %v12490_v13 = vld [vmem:[%s14419_s21 + $0x328] ss:$20 sps:$4 sm:$0xff]   ;;  %v12499_v51 = vld [vmem:[%s14419_s21 + $0x370] ss:$20 sps:$4 sm:$0xff]  }
 0x206   : > { %8347 = vmatprep.subr.bf16.mxu0 %v12415_v45  ;;  %8880 = vmatprep.subr.bf16.mxu1 %v12417_v46  ;;  %v12495_v45 = vld [vmem:[%s14419_s21 + $0x34c] ss:$20 sps:$4 sm:$0xff]   ;;  %v12498_v46 = vld [vmem:[%s14419_s21 + $0x354] ss:$20 sps:$4 sm:$0xff]   ;;  %v12520_v8 = vld [vmem:[%s14419_s21 + $0x3f0] ss:$20 sps:$4 sm:$0xff]  }
 0x207   : > { %v12526_v14 = vld [vmem:[%s14419_s21 + $0x418] ss:$20 sps:$4 sm:$0xff]  }
 0x209   : > { %8348 = vmatpush1.bf16.msra.mxu0 %v12419_v47  ;;  %8881 = vmatpush1.bf16.msra.mxu1 %v12420_v49  ;;  %v12493_v47 = vld [vmem:[%s14419_s21 + $0x348] ss:$20 sps:$4 sm:$0xff]   ;;  %v12496_v49 = vld [vmem:[%s14419_s21 + $0x350] ss:$20 sps:$4 sm:$0xff]  }
 0x20a   : > { %8349 = vmatprep.subr.bf16.mxu0 %v12421_v52  ;;  %8882 = vmatprep.subr.bf16.mxu1 %v12423_v53  ;;  %v12502_v52 = vld [vmem:[%s14419_s21 + $0x378] ss:$20 sps:$4 sm:$0xff]   ;;  %v12507_v53 = vld [vmem:[%s14419_s21 + $0x39c] ss:$20 sps:$4 sm:$0xff]  }
 0x20d   : > { %8350 = vmatpush1.bf16.msra.mxu0 %v12425_v48  ;;  %8883 = vmatpush1.bf16.msra.mxu1 %v12426_v61  ;;  %v12510_v48 = vld [vmem:[%s14419_s21 + $0x3a4] ss:$20 sps:$4 sm:$0xff]   ;;  %v12508_v61 = vld [vmem:[%s14419_s21 + $0x3a0] ss:$20 sps:$4 sm:$0xff]  }
 0x20e   : > { %8351 = vmatprep.subr.bf16.mxu0 %v12427_v62  ;;  %8884 = vmatprep.subr.bf16.mxu1 %v12429_v63  ;;  %v12513_v62 = vld [vmem:[%s14419_s21 + $0x3c4] ss:$20 sps:$4 sm:$0xff]   ;;  %v12516_v63 = vld [vmem:[%s14419_s21 + $0x3cc] ss:$20 sps:$4 sm:$0xff]  }
 0x211   : > { %8352 = vmatpush1.bf16.msra.mxu0 %v12431_v0  ;;  %8885 = vmatpush1.bf16.msra.mxu1 %v12432_v1  ;;  %v12511_v0 = vld [vmem:[%s14419_s21 + $0x3c0] ss:$20 sps:$4 sm:$0xff]   ;;  %v12514_v1 = vld [vmem:[%s14419_s21 + $0x3c8] ss:$20 sps:$4 sm:$0xff]  }
 0x212   : > { %8353 = vmatprep.subr.bf16.mxu0 %v12433_v3  ;;  %8886 = vmatprep.subr.bf16.mxu1 %v12435_v4  ;;  %v12519_v3 = vld [vmem:[%s14419_s21 + $0x3ec] ss:$20 sps:$4 sm:$0xff]   ;;  %v12522_v4 = vld [vmem:[%s14419_s21 + $0x3f4] ss:$20 sps:$4 sm:$0xff]  }
 0x215   : > { %8354 = vmatpush1.bf16.msra.mxu0 %v12437_v6  ;;  %8887 = vmatpush1.bf16.msra.mxu1 %v12438_v9  ;;  %v12517_v6 = vld [vmem:[%s14419_s21 + $0x3e8] ss:$20 sps:$4 sm:$0xff]  }
 0x216   : > { %8355 = vmatprep.subr.bf16.mxu0 %v12439_v10  ;;  %8888 = vmatprep.subr.bf16.mxu1 %v12441_v11  ;;  %v12525_v9 = vld [vmem:[%s14419_s21 + $0x414] ss:$20 sps:$4 sm:$0xff]   ;;  %v12528_v10 = vld [vmem:[%s14419_s21 + $0x41c] ss:$20 sps:$4 sm:$0xff]  }
 0x217   : > { %v12523_v11 = vld [vmem:[%s14419_s21 + $0x410] ss:$20 sps:$4 sm:$0xff]  }
 0x219   : > { %8356 = vmatpush1.bf16.msra.mxu0 %v12443_v15  ;;  %8889 = vmatpush1.bf16.msra.mxu1 %v12444_v17  ;;  %v12531_v15 = vld [vmem:[%s14419_s21 + $0x43c] ss:$20 sps:$4 sm:$0xff]   ;;  %v12534_v17 = vld [vmem:[%s14419_s21 + $0x444] ss:$20 sps:$4 sm:$0xff]  }
 0x21a   : > { %8357 = vmatprep.subr.bf16.mxu0 %v12445_v18  ;;  %8890 = vmatprep.subr.bf16.mxu1 %v12447_v55  ;;  %v12529_v18 = vld [vmem:[%s14419_s21 + $0x438] ss:$20 sps:$4 sm:$0xff]   ;;  %v12532_v55 = vld [vmem:[%s14419_s21 + $0x440] ss:$20 sps:$4 sm:$0xff]  }
 0x21d   : > { %8358 = vmatpush1.bf16.msra.mxu0 %v12449_v26  ;;  %8891 = vmatpush1.bf16.msra.mxu1 %v12450_v33  ;;  %v12537_v26 = vld [vmem:[%s14419_s21 + $0x464] ss:$20 sps:$4 sm:$0xff]   ;;  %v12540_v33 = vld [vmem:[%s14419_s21 + $0x46c] ss:$20 sps:$4 sm:$0xff]  }
 0x21e   : > { %8359 = vmatprep.subr.bf16.mxu0 %v12451_v57  ;;  %8892 = vmatprep.subr.bf16.mxu1 %v12453_v20  ;;  %v12535_v57 = vld [vmem:[%s14419_s21 + $0x460] ss:$20 sps:$4 sm:$0xff]   ;;  %v12538_v20 = vld [vmem:[%s14419_s21 + $0x468] ss:$20 sps:$4 sm:$0xff]  }
 0x221   : > { %8360 = vmatpush1.bf16.msra.mxu0 %v12455_v56  ;;  %8893 = vmatpush1.bf16.msra.mxu1 %v12456_v21  ;;  %v12543_v56 = vld [vmem:[%s14419_s21 + $0x48c] ss:$20 sps:$4 sm:$0xff]   ;;  %v12546_v21 = vld [vmem:[%s14419_s21 + $0x494] ss:$20 sps:$4 sm:$0xff]  }
 0x222   : > { %8361 = vmatprep.subr.bf16.mxu0 %v12457_v22  ;;  %8894 = vmatprep.subr.bf16.mxu1 %v12459_v23  ;;  %v12541_v22 = vld [vmem:[%s14419_s21 + $0x488] ss:$20 sps:$4 sm:$0xff]   ;;  %v12544_v23 = vld [vmem:[%s14419_s21 + $0x490] ss:$20 sps:$4 sm:$0xff]  }
 0x225   : > { %8362 = vmatpush1.bf16.msra.mxu0 %v12461_v59  ;;  %8895 = vmatpush1.bf16.msra.mxu1 %v12462_v24  ;;  %v12549_v59 = vld [vmem:[%s14419_s21 + $0x4b4] ss:$20 sps:$4 sm:$0xff]   ;;  %v12552_v24 = vld [vmem:[%s14419_s21 + $0x4bc] ss:$20 sps:$4 sm:$0xff]  }
 0x226   : > { %8372 = vmatprep.subr.bf16.mxu0 %v12465_v60  ;;  %8905 = vmatprep.subr.bf16.mxu1 %v12468_v25  ;;  %v2919_v60 = vcombine.high %v14701_v5, %v14701_v5  ;;  %v12547_v25 = vld [vmem:[%s14419_s21 + $0x4b0] ss:$20 sps:$4 sm:$0xff]   ;;  %v12556_v5 = vld [vmem:[%s14419_s21 + $0x4e0] ss:$20 sps:$4 sm:$0xff]  }
 0x228   : > { %8364 = vmatmul.mubr.bf16.vlgmr.msra.gmra.mrb[0].mxu0 %v14732_v28  ;;  %8897 = vmatmul.mubr.bf16.vlgmr.msra.gmra.mrb[0].mxu1 %v14732_v28 }
 0x229   : > { %8373 = vmatpush1.bf16.msra.mxu0 %v12463_v27  ;;  %8906 = vmatpush1.bf16.msra.mxu1 %v12466_v29  ;;  %v12550_v27 = vld [vmem:[%s14419_s21 + $0x4b8] ss:$20 sps:$4 sm:$0xff]   ;;  %v12555_v29 = vld [vmem:[%s14419_s21 + $0x4dc] ss:$20 sps:$4 sm:$0xff]  }
 0x22a   : > { %8374 = vmatprep.subr.bf16.mxu0 %v12471_v30  ;;  %8907 = vmatprep.subr.bf16.mxu1 %v12474_v31  ;;  %v12558_v30 = vld [vmem:[%s14419_s21 + $0x4e4] ss:$20 sps:$4 sm:$0xff]   ;;  %v14804_v31 = vrot.slane %v2919_v60, %v14697_v2 }
 0x22b   : > { %8404 = vmatprep.mubr.bf16.mxu0 %v14739_v32  ;;  %8937 = vmatprep.mubr.bf16.mxu1 %v14739_v32  ;;  %v12633_v60 = vld [vmem:[%s14419_s21 + $0x6e4] ss:$20 sps:$4 sm:$0xff]  }
 0x22d   : > { %8375 = vmatpush1.bf16.msra.mxu0 %v12469_v34  ;;  %8908 = vmatpush1.bf16.msra.mxu1 %v12472_v35  ;;  %v12553_v34 = vld [vmem:[%s14419_s21 + $0x4d8] ss:$20 sps:$4 sm:$0xff]  }
 0x22e   : > { %8376 = vmatprep.subr.bf16.mxu0 %v12477_v36  ;;  %8909 = vmatprep.subr.bf16.mxu1 %v12480_v37  ;;  %v12561_v35 = vld [vmem:[%s14419_s21 + $0x504] ss:$20 sps:$4 sm:$0xff]   ;;  %v12564_v36 = vld [vmem:[%s14419_s21 + $0x50c] ss:$20 sps:$4 sm:$0xff]   ;;  %v2935_v37 = vcombine.high %v14804_v31, %v14804_v31 }
 0x231   : > { %8377 = vmatpush1.bf16.msra.mxu0 %v12475_v38  ;;  %8910 = vmatpush1.bf16.msra.mxu1 %v12478_v39  ;;  %v12559_v38 = vld [vmem:[%s14419_s21 + $0x500] ss:$20 sps:$4 sm:$0xff]   ;;  %v14815_v39 = vcombine.high %v14732_v28, %v14732_v28 }
 0x232   : > { %8378 = vmatprep.subr.bf16.mxu0 %v12483_v40  ;;  %8911 = vmatprep.subr.bf16.mxu1 %v12486_v41  ;;  %v12562_v40 = vld [vmem:[%s14419_s21 + $0x508] ss:$20 sps:$4 sm:$0xff]   ;;  %v12567_v41 = vld [vmem:[%s14419_s21 + $0x52c] ss:$20 sps:$4 sm:$0xff]  }
 0x235   : > { %8379 = vmatpush1.bf16.msra.mxu0 %v12481_v42  ;;  %8912 = vmatpush1.bf16.msra.mxu1 %v12484_v7  ;;  %v12570_v42 = vld [vmem:[%s14419_s21 + $0x534] ss:$20 sps:$4 sm:$0xff]   ;;  %v14821_v7 = vrot.slane %v2935_v37, %v14697_v2  ;;  %v12648_v37 = vld [vmem:[%s14419_s21 + $0x73c] ss:$20 sps:$4 sm:$0xff]  }
 0x236   : > { %8380 = vmatprep.subr.bf16.mxu0 %v12489_v43  ;;  %8913 = vmatprep.subr.bf16.mxu1 %v12492_v12  ;;  %v12565_v43 = vld [vmem:[%s14419_s21 + $0x528] ss:$20 sps:$4 sm:$0xff]   ;;  %v12568_v12 = vld [vmem:[%s14419_s21 + $0x530] ss:$20 sps:$4 sm:$0xff]  }
 0x239   : > { %8381 = vmatpush1.bf16.msra.mxu0 %v12487_v44  ;;  %8914 = vmatpush1.bf16.msra.mxu1 %v12490_v13  ;;  %v12573_v44 = vld [vmem:[%s14419_s21 + $0x554] ss:$20 sps:$4 sm:$0xff]   ;;  %v12576_v13 = vld [vmem:[%s14419_s21 + $0x55c] ss:$20 sps:$4 sm:$0xff]  }
 0x23a   : > { %8382 = vmatprep.subr.bf16.mxu0 %v12495_v45  ;;  %8915 = vmatprep.subr.bf16.mxu1 %v12498_v46  ;;  %v12571_v45 = vld [vmem:[%s14419_s21 + $0x550] ss:$20 sps:$4 sm:$0xff]   ;;  %v12574_v46 = vld [vmem:[%s14419_s21 + $0x558] ss:$20 sps:$4 sm:$0xff]  }
 0x23d   : > { %8383 = vmatpush1.bf16.msra.mxu0 %v12493_v47  ;;  %8916 = vmatpush1.bf16.msra.mxu1 %v12496_v49  ;;  %v12579_v47 = vld [vmem:[%s14419_s21 + $0x57c] ss:$20 sps:$4 sm:$0xff]   ;;  %v12582_v49 = vld [vmem:[%s14419_s21 + $0x584] ss:$20 sps:$4 sm:$0xff]  }
 0x23e   : > { %8384 = vmatprep.subr.bf16.mxu0 %v12501_v19  ;;  %8917 = vmatprep.subr.bf16.mxu1 %v12504_v50  ;;  %v12577_v19 = vld [vmem:[%s14419_s21 + $0x578] ss:$20 sps:$4 sm:$0xff]   ;;  %v12580_v50 = vld [vmem:[%s14419_s21 + $0x580] ss:$20 sps:$4 sm:$0xff]  }
 0x241   : > { %8385 = vmatpush1.bf16.msra.mxu0 %v12499_v51  ;;  %8918 = vmatpush1.bf16.msra.mxu1 %v12502_v52  ;;  %v12585_v51 = vld [vmem:[%s14419_s21 + $0x5a4] ss:$20 sps:$4 sm:$0xff]   ;;  %v12588_v52 = vld [vmem:[%s14419_s21 + $0x5ac] ss:$20 sps:$4 sm:$0xff]  }
 0x242   : > { %8386 = vmatprep.subr.bf16.mxu0 %v12507_v53  ;;  %8919 = vmatprep.subr.bf16.mxu1 %v12510_v48  ;;  %v12583_v53 = vld [vmem:[%s14419_s21 + $0x5a0] ss:$20 sps:$4 sm:$0xff]   ;;  %v12586_v48 = vld [vmem:[%s14419_s21 + $0x5a8] ss:$20 sps:$4 sm:$0xff]  }
 0x245   : > { %8387 = vmatpush1.bf16.msra.mxu0 %v12505_v54  ;;  %8920 = vmatpush1.bf16.msra.mxu1 %v12508_v61  ;;  %v12591_v54 = vld [vmem:[%s14419_s21 + $0x5cc] ss:$20 sps:$4 sm:$0xff]   ;;  %v12594_v61 = vld [vmem:[%s14419_s21 + $0x5d4] ss:$20 sps:$4 sm:$0xff]  }
 0x246   : > { %8388 = vmatprep.subr.bf16.mxu0 %v12513_v62  ;;  %8921 = vmatprep.subr.bf16.mxu1 %v12516_v63  ;;  %v12589_v62 = vld [vmem:[%s14419_s21 + $0x5c8] ss:$20 sps:$4 sm:$0xff]   ;;  %v12592_v63 = vld [vmem:[%s14419_s21 + $0x5d0] ss:$20 sps:$4 sm:$0xff]  }
 0x249   : > { %8389 = vmatpush1.bf16.msra.mxu0 %v12511_v0  ;;  %8922 = vmatpush1.bf16.msra.mxu1 %v12514_v1  ;;  %v12597_v0 = vld [vmem:[%s14419_s21 + $0x5f4] ss:$20 sps:$4 sm:$0xff]   ;;  %v12600_v1 = vld [vmem:[%s14419_s21 + $0x5fc] ss:$20 sps:$4 sm:$0xff]  }
 0x24a   : > { %8390 = vmatprep.subr.bf16.mxu0 %v12519_v3  ;;  %8923 = vmatprep.subr.bf16.mxu1 %v12522_v4  ;;  %v12595_v3 = vld [vmem:[%s14419_s21 + $0x5f0] ss:$20 sps:$4 sm:$0xff]   ;;  %v12598_v4 = vld [vmem:[%s14419_s21 + $0x5f8] ss:$20 sps:$4 sm:$0xff]  }
 0x24d   : > { %8391 = vmatpush1.bf16.msra.mxu0 %v12517_v6  ;;  %8924 = vmatpush1.bf16.msra.mxu1 %v12520_v8  ;;  %v12603_v6 = vld [vmem:[%s14419_s21 + $0x61c] ss:$20 sps:$4 sm:$0xff]   ;;  %v12606_v8 = vld [vmem:[%s14419_s21 + $0x624] ss:$20 sps:$4 sm:$0xff]  }
 0x24e   : > { %8392 = vmatprep.subr.bf16.mxu0 %v12525_v9  ;;  %8925 = vmatprep.subr.bf16.mxu1 %v12528_v10  ;;  %v12601_v9 = vld [vmem:[%s14419_s21 + $0x618] ss:$20 sps:$4 sm:$0xff]   ;;  %v12604_v10 = vld [vmem:[%s14419_s21 + $0x620] ss:$20 sps:$4 sm:$0xff]  }
 0x251   : > { %8393 = vmatpush1.bf16.msra.mxu0 %v12523_v11  ;;  %8926 = vmatpush1.bf16.msra.mxu1 %v12526_v14  ;;  %v12609_v11 = vld [vmem:[%s14419_s21 + $0x644] ss:$20 sps:$4 sm:$0xff]   ;;  %v12612_v14 = vld [vmem:[%s14419_s21 + $0x64c] ss:$20 sps:$4 sm:$0xff]  }
 0x252   : > { %8394 = vmatprep.subr.bf16.mxu0 %v12531_v15  ;;  %8927 = vmatprep.subr.bf16.mxu1 %v12534_v17  ;;  %v12607_v15 = vld [vmem:[%s14419_s21 + $0x640] ss:$20 sps:$4 sm:$0xff]   ;;  %v12610_v17 = vld [vmem:[%s14419_s21 + $0x648] ss:$20 sps:$4 sm:$0xff]  }
 0x255   : > { %8395 = vmatpush1.bf16.msra.mxu0 %v12529_v18  ;;  %8928 = vmatpush1.bf16.msra.mxu1 %v12532_v55  ;;  %v12615_v18 = vld [vmem:[%s14419_s21 + $0x66c] ss:$20 sps:$4 sm:$0xff]   ;;  %v12618_v55 = vld [vmem:[%s14419_s21 + $0x674] ss:$20 sps:$4 sm:$0xff]  }
 0x256   : > { %8396 = vmatprep.subr.bf16.mxu0 %v12537_v26  ;;  %8929 = vmatprep.subr.bf16.mxu1 %v12540_v33  ;;  %v12613_v26 = vld [vmem:[%s14419_s21 + $0x668] ss:$20 sps:$4 sm:$0xff]   ;;  %v12616_v33 = vld [vmem:[%s14419_s21 + $0x670] ss:$20 sps:$4 sm:$0xff]  }
 0x259   : > { %8397 = vmatpush1.bf16.msra.mxu0 %v12535_v57  ;;  %8930 = vmatpush1.bf16.msra.mxu1 %v12538_v20  ;;  %v12621_v57 = vld [vmem:[%s14419_s21 + $0x694] ss:$20 sps:$4 sm:$0xff]   ;;  %v12624_v20 = vld [vmem:[%s14419_s21 + $0x69c] ss:$20 sps:$4 sm:$0xff]  }
 0x25a   : > { %8398 = vmatprep.subr.bf16.mxu0 %v12543_v56  ;;  %8931 = vmatprep.subr.bf16.mxu1 %v12546_v21  ;;  %v12619_v56 = vld [vmem:[%s14419_s21 + $0x690] ss:$20 sps:$4 sm:$0xff]   ;;  %v12622_v21 = vld [vmem:[%s14419_s21 + $0x698] ss:$20 sps:$4 sm:$0xff]  }
 0x25d   : > { %8399 = vmatpush1.bf16.msra.mxu0 %v12541_v22  ;;  %8932 = vmatpush1.bf16.msra.mxu1 %v12544_v23  ;;  %v12627_v22 = vld [vmem:[%s14419_s21 + $0x6bc] ss:$20 sps:$4 sm:$0xff]   ;;  %v12630_v23 = vld [vmem:[%s14419_s21 + $0x6c4] ss:$20 sps:$4 sm:$0xff]  }
 0x25e   : > { %8400 = vmatprep.subr.bf16.mxu0 %v12549_v59  ;;  %8933 = vmatprep.subr.bf16.mxu1 %v12552_v24  ;;  %v12625_v59 = vld [vmem:[%s14419_s21 + $0x6b8] ss:$20 sps:$4 sm:$0xff]   ;;  %v12628_v24 = vld [vmem:[%s14419_s21 + $0x6c0] ss:$20 sps:$4 sm:$0xff]  }
 0x261   : > { %8401 = vmatpush1.bf16.msra.mxu0 %v12547_v25  ;;  %8934 = vmatpush1.bf16.msra.mxu1 %v12550_v27  ;;  %v12636_v25 = vld [vmem:[%s14419_s21 + $0x6ec] ss:$20 sps:$4 sm:$0xff]  }
 0x262   : > { %8402 = vmatprep.subr.bf16.mxu0 %v12555_v29  ;;  %8935 = vmatprep.subr.bf16.mxu1 %v12558_v30  ;;  %v12631_v27 = vld [vmem:[%s14419_s21 + $0x6e0] ss:$20 sps:$4 sm:$0xff]   ;;  %v12634_v29 = vld [vmem:[%s14419_s21 + $0x6e8] ss:$20 sps:$4 sm:$0xff]  }
 0x263   : > { %v12639_v30 = vld [vmem:[%s14419_s21 + $0x70c] ss:$20 sps:$4 sm:$0xff]  }
 0x265   : > { %8403 = vmatpush1.bf16.msra.mxu0 %v12553_v34  ;;  %8936 = vmatpush1.bf16.msra.mxu1 %v12556_v5  ;;  %v12642_v34 = vld [vmem:[%s14419_s21 + $0x714] ss:$20 sps:$4 sm:$0xff]  }
 0x266   : > { %8413 = vmatprep.subr.bf16.mxu0 %v12561_v35  ;;  %8946 = vmatprep.subr.bf16.mxu1 %v12564_v36  ;;  %v12637_v5 = vld [vmem:[%s14419_s21 + $0x708] ss:$20 sps:$4 sm:$0xff]   ;;  %v12640_v35 = vld [vmem:[%s14419_s21 + $0x710] ss:$20 sps:$4 sm:$0xff]  }
 0x267   : > { %v12645_v36 = vld [vmem:[%s14419_s21 + $0x734] ss:$20 sps:$4 sm:$0xff]  }
 0x268   : > { %8405 = vmatmul.mubr.bf16.vlgmr.msra.gmra.mrb[0].mxu0 %v14815_v39  ;;  %8938 = vmatmul.mubr.bf16.vlgmr.msra.gmra.mrb[0].mxu1 %v14815_v39 }
 0x269   : > { %8414 = vmatpush1.bf16.msra.mxu0 %v12559_v38  ;;  %8947 = vmatpush1.bf16.msra.mxu1 %v12562_v40  ;;  %v12643_v38 = vld [vmem:[%s14419_s21 + $0x730] ss:$20 sps:$4 sm:$0xff]   ;;  %v12646_v40 = vld [vmem:[%s14419_s21 + $0x738] ss:$20 sps:$4 sm:$0xff]  }
 0x26a   : > { %8415 = vmatprep.subr.bf16.mxu0 %v12567_v41  ;;  %8948 = vmatprep.subr.bf16.mxu1 %v12570_v42  ;;  %v12651_v41 = vld [vmem:[%s14419_s21 + $0x75c] ss:$20 sps:$4 sm:$0xff]   ;;  %v12654_v42 = vld [vmem:[%s14419_s21 + $0x764] ss:$20 sps:$4 sm:$0xff]  }
 0x26b   : > { %8445 = vmatprep.mubr.bf16.mxu0 %v14821_v7  ;;  %8978 = vmatprep.mubr.bf16.mxu1 %v14821_v7 }
 0x26d   : > { %8416 = vmatpush1.bf16.msra.mxu0 %v12565_v43  ;;  %8949 = vmatpush1.bf16.msra.mxu1 %v12568_v12  ;;  %v12649_v43 = vld [vmem:[%s14419_s21 + $0x758] ss:$20 sps:$4 sm:$0xff]   ;;  %v12652_v12 = vld [vmem:[%s14419_s21 + $0x760] ss:$20 sps:$4 sm:$0xff]  }
 0x26e   : > { %8417 = vmatprep.subr.bf16.mxu0 %v12573_v44  ;;  %8950 = vmatprep.subr.bf16.mxu1 %v12576_v13  ;;  %v12658_v44 = vld [vmem:[%s14419_s21 + $0x784] ss:$20 sps:$4 sm:$0xff]   ;;  %v12661_v13 = vld [vmem:[%s14419_s21 + $0x78c] ss:$20 sps:$4 sm:$0xff]  }
 0x271   : > { %8418 = vmatpush1.bf16.msra.mxu0 %v12571_v45  ;;  %8951 = vmatpush1.bf16.msra.mxu1 %v12574_v46  ;;  %v12656_v45 = vld [vmem:[%s14419_s21 + $0x780] ss:$20 sps:$4 sm:$0xff]   ;;  %v14890_v46 = vrot.slane %v14804_v31, %v14697_v2  ;;  %v12662_v31 = vld [vmem:[%s14419_s21 + $0x7a8] ss:$20 sps:$4 sm:$0xff]  }
 0x272   : > { %8419 = vmatprep.subr.bf16.mxu0 %v12579_v47  ;;  %8952 = vmatprep.subr.bf16.mxu1 %v12582_v49  ;;  %v12659_v47 = vld [vmem:[%s14419_s21 + $0x788] ss:$20 sps:$4 sm:$0xff]   ;;  %v12664_v49 = vld [vmem:[%s14419_s21 + $0x7ac] ss:$20 sps:$4 sm:$0xff]  }
 0x275   : > { %8420 = vmatpush1.bf16.msra.mxu0 %v12577_v19  ;;  %8953 = vmatpush1.bf16.msra.mxu1 %v12580_v50  ;;  %v12667_v19 = vld [vmem:[%s14419_s21 + $0x7b4] ss:$20 sps:$4 sm:$0xff]   ;;  %v14897_v50 = vcombine.high %v14821_v7, %v14821_v7 }
 0x276   : > { %8421 = vmatprep.subr.bf16.mxu0 %v12585_v51  ;;  %8954 = vmatprep.subr.bf16.mxu1 %v12588_v52  ;;  %v12665_v51 = vld [vmem:[%s14419_s21 + $0x7b0] ss:$20 sps:$4 sm:$0xff]   ;;  %v12670_v52 = vld [vmem:[%s14419_s21 + $0x7d4] ss:$20 sps:$4 sm:$0xff]  }
 0x279   : > { %8422 = vmatpush1.bf16.msra.mxu0 %v12583_v53  ;;  %8955 = vmatpush1.bf16.msra.mxu1 %v12586_v48  ;;  %v12673_v53 = vld [vmem:[%s14419_s21 + $0x7dc] ss:$20 sps:$4 sm:$0xff]  }
 0x27a   : > { %8423 = vmatprep.subr.bf16.mxu0 %v12591_v54  ;;  %8956 = vmatprep.subr.bf16.mxu1 %v12594_v61  ;;  %v12668_v48 = vld [vmem:[%s14419_s21 + $0x7d0] ss:$20 sps:$4 sm:$0xff]   ;;  %v12671_v54 = vld [vmem:[%s14419_s21 + $0x7d8] ss:$20 sps:$4 sm:$0xff]  }
 0x27b   : > { %v12676_v61 = vld [vmem:[%s14419_s21 + $0x7fc] ss:$20 sps:$4 sm:$0xff]  }
 0x27d   : > { %8424 = vmatpush1.bf16.msra.mxu0 %v12589_v62  ;;  %8957 = vmatpush1.bf16.msra.mxu1 %v12592_v63  ;;  %v12679_v62 = vld [vmem:[%s14419_s21 + $0x804] ss:$20 sps:$4 sm:$0xff]  }
 0x27e   : > { %8425 = vmatprep.subr.bf16.mxu0 %v12597_v0  ;;  %8958 = vmatprep.subr.bf16.mxu1 %v12600_v1  ;;  %v12674_v63 = vld [vmem:[%s14419_s21 + $0x7f8] ss:$20 sps:$4 sm:$0xff]   ;;  %v12677_v0 = vld [vmem:[%s14419_s21 + $0x800] ss:$20 sps:$4 sm:$0xff]  }
 0x27f   : > { %v12682_v1 = vld [vmem:[%s14419_s21 + $0x824] ss:$20 sps:$4 sm:$0xff]  }
 0x281   : > { %8426 = vmatpush1.bf16.msra.mxu0 %v12595_v3  ;;  %8959 = vmatpush1.bf16.msra.mxu1 %v12598_v4  ;;  %v12685_v3 = vld [vmem:[%s14419_s21 + $0x82c] ss:$20 sps:$4 sm:$0xff]  }
 0x282   : > { %8427 = vmatprep.subr.bf16.mxu0 %v12603_v6  ;;  %8960 = vmatprep.subr.bf16.mxu1 %v12606_v8  ;;  %v12680_v4 = vld [vmem:[%s14419_s21 + $0x820] ss:$20 sps:$4 sm:$0xff]   ;;  %v12683_v6 = vld [vmem:[%s14419_s21 + $0x828] ss:$20 sps:$4 sm:$0xff]  }
 0x283   : > { %v12688_v8 = vld [vmem:[%s14419_s21 + $0x84c] ss:$20 sps:$4 sm:$0xff]  }
 0x285   : > { %8428 = vmatpush1.bf16.msra.mxu0 %v12601_v9  ;;  %8961 = vmatpush1.bf16.msra.mxu1 %v12604_v10  ;;  %v12691_v9 = vld [vmem:[%s14419_s21 + $0x854] ss:$20 sps:$4 sm:$0xff]  }
 0x286   : > { %8429 = vmatprep.subr.bf16.mxu0 %v12609_v11  ;;  %8962 = vmatprep.subr.bf16.mxu1 %v12612_v14  ;;  %v12686_v10 = vld [vmem:[%s14419_s21 + $0x848] ss:$20 sps:$4 sm:$0xff]   ;;  %v12689_v11 = vld [vmem:[%s14419_s21 + $0x850] ss:$20 sps:$4 sm:$0xff]  }
 0x287   : > { %v12694_v14 = vld [vmem:[%s14419_s21 + $0x874] ss:$20 sps:$4 sm:$0xff]  }
 0x289   : > { %8430 = vmatpush1.bf16.msra.mxu0 %v12607_v15  ;;  %8963 = vmatpush1.bf16.msra.mxu1 %v12610_v17  ;;  %v12697_v15 = vld [vmem:[%s14419_s21 + $0x87c] ss:$20 sps:$4 sm:$0xff]  }
 0x28a   : > { %8431 = vmatprep.subr.bf16.mxu0 %v12615_v18  ;;  %8964 = vmatprep.subr.bf16.mxu1 %v12618_v55  ;;  %v12692_v17 = vld [vmem:[%s14419_s21 + $0x870] ss:$20 sps:$4 sm:$0xff]   ;;  %v12695_v18 = vld [vmem:[%s14419_s21 + $0x878] ss:$20 sps:$4 sm:$0xff]  }
 0x28b   : > { %v12700_v55 = vld [vmem:[%s14419_s21 + $0x89c] ss:$20 sps:$4 sm:$0xff]  }
 0x28d   : > { %8432 = vmatpush1.bf16.msra.mxu0 %v12613_v26  ;;  %8965 = vmatpush1.bf16.msra.mxu1 %v12616_v33  ;;  %v12703_v26 = vld [vmem:[%s14419_s21 + $0x8a4] ss:$20 sps:$4 sm:$0xff]  }
 0x28e   : > { %8433 = vmatprep.subr.bf16.mxu0 %v12621_v57  ;;  %8966 = vmatprep.subr.bf16.mxu1 %v12624_v20  ;;  %v12698_v33 = vld [vmem:[%s14419_s21 + $0x898] ss:$20 sps:$4 sm:$0xff]   ;;  %v12701_v57 = vld [vmem:[%s14419_s21 + $0x8a0] ss:$20 sps:$4 sm:$0xff]  }
 0x28f   : > { %v12706_v20 = vld [vmem:[%s14419_s21 + $0x8c4] ss:$20 sps:$4 sm:$0xff]  }
 0x291   : > { %8434 = vmatpush1.bf16.msra.mxu0 %v12619_v56  ;;  %8967 = vmatpush1.bf16.msra.mxu1 %v12622_v21  ;;  %v12709_v56 = vld [vmem:[%s14419_s21 + $0x8cc] ss:$20 sps:$4 sm:$0xff]  }
 0x292   : > { %8435 = vmatprep.subr.bf16.mxu0 %v12627_v22  ;;  %8968 = vmatprep.subr.bf16.mxu1 %v12630_v23  ;;  %v12704_v21 = vld [vmem:[%s14419_s21 + $0x8c0] ss:$20 sps:$4 sm:$0xff]   ;;  %v12707_v22 = vld [vmem:[%s14419_s21 + $0x8c8] ss:$20 sps:$4 sm:$0xff]  }
 0x293   : > { %v12712_v23 = vld [vmem:[%s14419_s21 + $0x8ec] ss:$20 sps:$4 sm:$0xff]  }
 0x295   : > { %8436 = vmatpush1.bf16.msra.mxu0 %v12625_v59  ;;  %8969 = vmatpush1.bf16.msra.mxu1 %v12628_v24  ;;  %v12715_v59 = vld [vmem:[%s14419_s21 + $0x8f4] ss:$20 sps:$4 sm:$0xff]  }
 0x296   : > { %8437 = vmatprep.subr.bf16.mxu0 %v12633_v60  ;;  %8970 = vmatprep.subr.bf16.mxu1 %v12636_v25  ;;  %v12710_v24 = vld [vmem:[%s14419_s21 + $0x8e8] ss:$20 sps:$4 sm:$0xff]   ;;  %v12713_v60 = vld [vmem:[%s14419_s21 + $0x8f0] ss:$20 sps:$4 sm:$0xff]  }
 0x297   : > { %v12718_v25 = vld [vmem:[%s14419_s21 + $0x914] ss:$20 sps:$4 sm:$0xff]  }
 0x299   : > { %8438 = vmatpush1.bf16.msra.mxu0 %v12631_v27  ;;  %8971 = vmatpush1.bf16.msra.mxu1 %v12634_v29  ;;  %v12721_v27 = vld [vmem:[%s14419_s21 + $0x91c] ss:$20 sps:$4 sm:$0xff]  }
 0x29a   : > { %8439 = vmatprep.subr.bf16.mxu0 %v12639_v30  ;;  %8972 = vmatprep.subr.bf16.mxu1 %v12642_v34  ;;  %v12716_v29 = vld [vmem:[%s14419_s21 + $0x910] ss:$20 sps:$4 sm:$0xff]   ;;  %v12719_v30 = vld [vmem:[%s14419_s21 + $0x918] ss:$20 sps:$4 sm:$0xff]  }
 0x29b   : > { %v12724_v34 = vld [vmem:[%s14419_s21 + $0x93c] ss:$20 sps:$4 sm:$0xff]  }
 0x29d   : > { %8440 = vmatpush1.bf16.msra.mxu0 %v12637_v5  ;;  %8973 = vmatpush1.bf16.msra.mxu1 %v12640_v35  ;;  %v12727_v5 = vld [vmem:[%s14419_s21 + $0x944] ss:$20 sps:$4 sm:$0xff]  }
 0x29e   : > { %8441 = vmatprep.subr.bf16.mxu0 %v12645_v36  ;;  %8974 = vmatprep.subr.bf16.mxu1 %v12648_v37  ;;  %v12722_v35 = vld [vmem:[%s14419_s21 + $0x938] ss:$20 sps:$4 sm:$0xff]   ;;  %v12725_v36 = vld [vmem:[%s14419_s21 + $0x940] ss:$20 sps:$4 sm:$0xff]  }
 0x29f   : > { %v12730_v37 = vld [vmem:[%s14419_s21 + $0x964] ss:$20 sps:$4 sm:$0xff]  }
 0x2a1   : > { %8442 = vmatpush1.bf16.msra.mxu0 %v12643_v38  ;;  %8975 = vmatpush1.bf16.msra.mxu1 %v12646_v40  ;;  %v12733_v38 = vld [vmem:[%s14419_s21 + $0x96c] ss:$20 sps:$4 sm:$0xff]  }
 0x2a2   : > { %8443 = vmatprep.subr.bf16.mxu0 %v12651_v41  ;;  %8976 = vmatprep.subr.bf16.mxu1 %v12654_v42  ;;  %v12728_v40 = vld [vmem:[%s14419_s21 + $0x960] ss:$20 sps:$4 sm:$0xff]   ;;  %v12731_v41 = vld [vmem:[%s14419_s21 + $0x968] ss:$20 sps:$4 sm:$0xff]  }
 0x2a3   : > { %v12736_v42 = vld [vmem:[%s14419_s21 + $0x98c] ss:$20 sps:$4 sm:$0xff]  }
 0x2a5   : > { %8444 = vmatpush1.bf16.msra.mxu0 %v12649_v43  ;;  %8977 = vmatpush1.bf16.msra.mxu1 %v12652_v12  ;;  %v12739_v43 = vld [vmem:[%s14419_s21 + $0x994] ss:$20 sps:$4 sm:$0xff]  }
 0x2a6   : > { %8454 = vmatprep.subr.bf16.mxu0 %v12658_v44  ;;  %8987 = vmatprep.subr.bf16.mxu1 %v12661_v13  ;;  %v12734_v12 = vld [vmem:[%s14419_s21 + $0x988] ss:$20 sps:$4 sm:$0xff]   ;;  %v12737_v44 = vld [vmem:[%s14419_s21 + $0x990] ss:$20 sps:$4 sm:$0xff]  }
 0x2a7   : > { %v12742_v13 = vld [vmem:[%s14419_s21 + $0x9b4] ss:$20 sps:$4 sm:$0xff]  }
 0x2a8   : > { %8446 = vmatmul.mubr.bf16.vlgmr.msra.gmra.mrb[0].mxu0 %v14890_v46  ;;  %8979 = vmatmul.mubr.bf16.vlgmr.msra.gmra.mrb[0].mxu1 %v14890_v46 }
 0x2a9   : > { %8455 = vmatpush1.bf16.msra.mxu0 %v12656_v45  ;;  %8988 = vmatpush1.bf16.msra.mxu1 %v12659_v47  ;;  %v12745_v45 = vld [vmem:[%s14419_s21 + $0x9bc] ss:$20 sps:$4 sm:$0xff]   ;;  %v14955_v47 = vld.sshfl [vmem:[#allocation2 + $0x8] sm:$0xff pattern:$0x75316420] }
 0x2aa   : > { %8456 = vmatprep.subr.bf16.mxu0 %v12664_v49  ;;  %8989 = vmatprep.subr.bf16.mxu1 %v12667_v19  ;;  %v12740_v49 = vld [vmem:[%s14419_s21 + $0x9b0] ss:$20 sps:$4 sm:$0xff]   ;;  %v12743_v19 = vld [vmem:[%s14419_s21 + $0x9b8] ss:$20 sps:$4 sm:$0xff]  }
 0x2ab   : > { %8486 = vmatprep.mubr.bf16.mxu0 %v14897_v50  ;;  %9019 = vmatprep.mubr.bf16.mxu1 %v14897_v50 }
 0x2ad   : > { %8457 = vmatpush1.bf16.msra.mxu0 %v12662_v31  ;;  %8990 = vmatpush1.bf16.msra.mxu1 %v12665_v51  ;;  %v12748_v31 = vld [vmem:[%s14419_s21 + $0x9dc] ss:$20 sps:$4 sm:$0xff]   ;;  %v12751_v51 = vld [vmem:[%s14419_s21 + $0x9e4] ss:$20 sps:$4 sm:$0xff]  }
 0x2ae   : > { %8458 = vmatprep.subr.bf16.mxu0 %v12670_v52  ;;  %8991 = vmatprep.subr.bf16.mxu1 %v12673_v53  ;;  %v12746_v52 = vld [vmem:[%s14419_s21 + $0x9d8] ss:$20 sps:$4 sm:$0xff]   ;;  %v12749_v53 = vld [vmem:[%s14419_s21 + $0x9e0] ss:$20 sps:$4 sm:$0xff]  }
 0x2b1   : > { %8459 = vmatpush1.bf16.msra.mxu0 %v12668_v48  ;;  %8992 = vmatpush1.bf16.msra.mxu1 %v12671_v54  ;;  %v12754_v48 = vld [vmem:[%s14419_s21 + $0xa04] ss:$20 sps:$4 sm:$0xff]   ;;  %v12757_v54 = vld [vmem:[%s14419_s21 + $0xa0c] ss:$20 sps:$4 sm:$0xff]  }
 0x2b2   : > { %8460 = vmatprep.subr.bf16.mxu0 %v12676_v61  ;;  %8993 = vmatprep.subr.bf16.mxu1 %v12679_v62  ;;  %v2983_v61 = vcombine.high %v14955_v47, %v14955_v47  ;;  %v14969_v62 = vcombine.high %v14890_v46, %v14890_v46 }
 0x2b5   : > { %8461 = vmatpush1.bf16.msra.mxu0 %v12674_v63  ;;  %8994 = vmatpush1.bf16.msra.mxu1 %v12677_v0  ;;  %v12752_v63 = vld [vmem:[%s14419_s21 + $0xa00] ss:$20 sps:$4 sm:$0xff]   ;;  %v12755_v0 = vld [vmem:[%s14419_s21 + $0xa08] ss:$20 sps:$4 sm:$0xff]  }
 0x2b6   : > { %8462 = vmatprep.subr.bf16.mxu0 %v12682_v1  ;;  %8995 = vmatprep.subr.bf16.mxu1 %v12685_v3  ;;  %v12760_v1 = vld [vmem:[%s14419_s21 + $0xa2c] ss:$20 sps:$4 sm:$0xff]   ;;  %v12763_v3 = vld [vmem:[%s14419_s21 + $0xa34] ss:$20 sps:$4 sm:$0xff]  }
 0x2b9   : > { %8463 = vmatpush1.bf16.msra.mxu0 %v12680_v4  ;;  %8996 = vmatpush1.bf16.msra.mxu1 %v12683_v6  ;;  %v14976_v4 = vrot.slane %v2983_v61, %v14697_v2  ;;  %v12758_v6 = vld [vmem:[%s14419_s21 + $0xa28] ss:$20 sps:$4 sm:$0xff]  }
 0x2ba   : > { %8464 = vmatprep.subr.bf16.mxu0 %v12688_v8  ;;  %8997 = vmatprep.subr.bf16.mxu1 %v12691_v9  ;;  %v12761_v8 = vld [vmem:[%s14419_s21 + $0xa30] ss:$20 sps:$4 sm:$0xff]   ;;  %v12766_v9 = vld [vmem:[%s14419_s21 + $0xa54] ss:$20 sps:$4 sm:$0xff]  }
 0x2bb   : > { %v12835_v61 = vld [vmem:[%s14419_s21 + $0xc14] ss:$20 sps:$4 sm:$0xff]  }
 0x2bd   : > { %8465 = vmatpush1.bf16.msra.mxu0 %v12686_v10  ;;  %8998 = vmatpush1.bf16.msra.mxu1 %v12689_v11  ;;  %v12769_v10 = vld [vmem:[%s14419_s21 + $0xa5c] ss:$20 sps:$4 sm:$0xff]  }
 0x2be   : > { %8466 = vmatprep.subr.bf16.mxu0 %v12694_v14  ;;  %8999 = vmatprep.subr.bf16.mxu1 %v12697_v15  ;;  %v12764_v11 = vld [vmem:[%s14419_s21 + $0xa50] ss:$20 sps:$4 sm:$0xff]   ;;  %v12767_v14 = vld [vmem:[%s14419_s21 + $0xa58] ss:$20 sps:$4 sm:$0xff]  }
 0x2bf   : > { %v12772_v15 = vld [vmem:[%s14419_s21 + $0xa7c] ss:$20 sps:$4 sm:$0xff]  }
 0x2c1   : > { %8467 = vmatpush1.bf16.msra.mxu0 %v12692_v17  ;;  %9000 = vmatpush1.bf16.msra.mxu1 %v12695_v18  ;;  %v12775_v17 = vld [vmem:[%s14419_s21 + $0xa84] ss:$20 sps:$4 sm:$0xff]  }
 0x2c2   : > { %8468 = vmatprep.subr.bf16.mxu0 %v12700_v55  ;;  %9001 = vmatprep.subr.bf16.mxu1 %v12703_v26  ;;  %v12770_v18 = vld [vmem:[%s14419_s21 + $0xa78] ss:$20 sps:$4 sm:$0xff]   ;;  %v12773_v55 = vld [vmem:[%s14419_s21 + $0xa80] ss:$20 sps:$4 sm:$0xff]  }
 0x2c3   : > { %v12778_v26 = vld [vmem:[%s14419_s21 + $0xaa4] ss:$20 sps:$4 sm:$0xff]  }
 0x2c5   : > { %8469 = vmatpush1.bf16.msra.mxu0 %v12698_v33  ;;  %9002 = vmatpush1.bf16.msra.mxu1 %v12701_v57  ;;  %v12781_v33 = vld [vmem:[%s14419_s21 + $0xaac] ss:$20 sps:$4 sm:$0xff]  }
 0x2c6   : > { %8470 = vmatprep.subr.bf16.mxu0 %v12706_v20  ;;  %9003 = vmatprep.subr.bf16.mxu1 %v12709_v56  ;;  %v12776_v57 = vld [vmem:[%s14419_s21 + $0xaa0] ss:$20 sps:$4 sm:$0xff]   ;;  %v12779_v20 = vld [vmem:[%s14419_s21 + $0xaa8] ss:$20 sps:$4 sm:$0xff]  }
 0x2c7   : > { %v12784_v56 = vld [vmem:[%s14419_s21 + $0xacc] ss:$20 sps:$4 sm:$0xff]  }
 0x2c9   : > { %8471 = vmatpush1.bf16.msra.mxu0 %v12704_v21  ;;  %9004 = vmatpush1.bf16.msra.mxu1 %v12707_v22  ;;  %v12787_v21 = vld [vmem:[%s14419_s21 + $0xad4] ss:$20 sps:$4 sm:$0xff]  }
 0x2ca   : > { %8472 = vmatprep.subr.bf16.mxu0 %v12712_v23  ;;  %9005 = vmatprep.subr.bf16.mxu1 %v12715_v59  ;;  %v12782_v22 = vld [vmem:[%s14419_s21 + $0xac8] ss:$20 sps:$4 sm:$0xff]   ;;  %v12785_v23 = vld [vmem:[%s14419_s21 + $0xad0] ss:$20 sps:$4 sm:$0xff]  }
 0x2cb   : > { %v12790_v59 = vld [vmem:[%s14419_s21 + $0xaf4] ss:$20 sps:$4 sm:$0xff]  }
 0x2cd   : > { %8473 = vmatpush1.bf16.msra.mxu0 %v12710_v24  ;;  %9006 = vmatpush1.bf16.msra.mxu1 %v12713_v60  ;;  %v12793_v24 = vld [vmem:[%s14419_s21 + $0xafc] ss:$20 sps:$4 sm:$0xff]  }
 0x2ce   : > { %8474 = vmatprep.subr.bf16.mxu0 %v12718_v25  ;;  %9007 = vmatprep.subr.bf16.mxu1 %v12721_v27  ;;  %v12788_v60 = vld [vmem:[%s14419_s21 + $0xaf0] ss:$20 sps:$4 sm:$0xff]   ;;  %v12791_v25 = vld [vmem:[%s14419_s21 + $0xaf8] ss:$20 sps:$4 sm:$0xff]  }
 0x2cf   : > { %v12796_v27 = vld [vmem:[%s14419_s21 + $0xb1c] ss:$20 sps:$4 sm:$0xff]  }
 0x2d1   : > { %8475 = vmatpush1.bf16.msra.mxu0 %v12716_v29  ;;  %9008 = vmatpush1.bf16.msra.mxu1 %v12719_v30  ;;  %v12799_v29 = vld [vmem:[%s14419_s21 + $0xb24] ss:$20 sps:$4 sm:$0xff]  }
 0x2d2   : > { %8476 = vmatprep.subr.bf16.mxu0 %v12724_v34  ;;  %9009 = vmatprep.subr.bf16.mxu1 %v12727_v5  ;;  %v12794_v30 = vld [vmem:[%s14419_s21 + $0xb18] ss:$20 sps:$4 sm:$0xff]   ;;  %v12797_v34 = vld [vmem:[%s14419_s21 + $0xb20] ss:$20 sps:$4 sm:$0xff]  }
 0x2d3   : > { %v12802_v5 = vld [vmem:[%s14419_s21 + $0xb44] ss:$20 sps:$4 sm:$0xff]  }
 0x2d5   : > { %8477 = vmatpush1.bf16.msra.mxu0 %v12722_v35  ;;  %9010 = vmatpush1.bf16.msra.mxu1 %v12725_v36  ;;  %v12805_v35 = vld [vmem:[%s14419_s21 + $0xb4c] ss:$20 sps:$4 sm:$0xff]  }
 0x2d6   : > { %8478 = vmatprep.subr.bf16.mxu0 %v12730_v37  ;;  %9011 = vmatprep.subr.bf16.mxu1 %v12733_v38  ;;  %v12800_v36 = vld [vmem:[%s14419_s21 + $0xb40] ss:$20 sps:$4 sm:$0xff]   ;;  %v12803_v37 = vld [vmem:[%s14419_s21 + $0xb48] ss:$20 sps:$4 sm:$0xff]  }
 0x2d7   : > { %v12808_v38 = vld [vmem:[%s14419_s21 + $0xb6c] ss:$20 sps:$4 sm:$0xff]  }
 0x2d9   : > { %8479 = vmatpush1.bf16.msra.mxu0 %v12728_v40  ;;  %9012 = vmatpush1.bf16.msra.mxu1 %v12731_v41  ;;  %v12811_v40 = vld [vmem:[%s14419_s21 + $0xb74] ss:$20 sps:$4 sm:$0xff]  }
 0x2da   : > { %8480 = vmatprep.subr.bf16.mxu0 %v12736_v42  ;;  %9013 = vmatprep.subr.bf16.mxu1 %v12739_v43  ;;  %v12806_v41 = vld [vmem:[%s14419_s21 + $0xb68] ss:$20 sps:$4 sm:$0xff]   ;;  %v12809_v42 = vld [vmem:[%s14419_s21 + $0xb70] ss:$20 sps:$4 sm:$0xff]  }
 0x2db   : > { %v12814_v43 = vld [vmem:[%s14419_s21 + $0xb94] ss:$20 sps:$4 sm:$0xff]  }
 0x2dd   : > { %8481 = vmatpush1.bf16.msra.mxu0 %v12734_v12  ;;  %9014 = vmatpush1.bf16.msra.mxu1 %v12737_v44  ;;  %v12817_v12 = vld [vmem:[%s14419_s21 + $0xb9c] ss:$20 sps:$4 sm:$0xff]  }
 0x2de   : > { %8482 = vmatprep.subr.bf16.mxu0 %v12742_v13  ;;  %9015 = vmatprep.subr.bf16.mxu1 %v12745_v45  ;;  %v12812_v44 = vld [vmem:[%s14419_s21 + $0xb90] ss:$20 sps:$4 sm:$0xff]   ;;  %v12815_v13 = vld [vmem:[%s14419_s21 + $0xb98] ss:$20 sps:$4 sm:$0xff]  }
 0x2df   : > { %v12820_v45 = vld [vmem:[%s14419_s21 + $0xbbc] ss:$20 sps:$4 sm:$0xff]  }
 0x2e1   : > { %8483 = vmatpush1.bf16.msra.mxu0 %v12740_v49  ;;  %9016 = vmatpush1.bf16.msra.mxu1 %v12743_v19  ;;  %v12823_v49 = vld [vmem:[%s14419_s21 + $0xbc4] ss:$20 sps:$4 sm:$0xff]  }
 0x2e2   : > { %8484 = vmatprep.subr.bf16.mxu0 %v12748_v31  ;;  %9017 = vmatprep.subr.bf16.mxu1 %v12751_v51  ;;  %v12818_v19 = vld [vmem:[%s14419_s21 + $0xbb8] ss:$20 sps:$4 sm:$0xff]   ;;  %v12821_v31 = vld [vmem:[%s14419_s21 + $0xbc0] ss:$20 sps:$4 sm:$0xff]  }
 0x2e3   : > { %v12826_v51 = vld [vmem:[%s14419_s21 + $0xbe4] ss:$20 sps:$4 sm:$0xff]  }
 0x2e5   : > { %8485 = vmatpush1.bf16.msra.mxu0 %v12746_v52  ;;  %9018 = vmatpush1.bf16.msra.mxu1 %v12749_v53  ;;  %v12829_v52 = vld [vmem:[%s14419_s21 + $0xbec] ss:$20 sps:$4 sm:$0xff]  }
 0x2e6   : > { %8495 = vmatprep.subr.bf16.mxu0 %v12754_v48  ;;  %9028 = vmatprep.subr.bf16.mxu1 %v12757_v54  ;;  %v12824_v53 = vld [vmem:[%s14419_s21 + $0xbe0] ss:$20 sps:$4 sm:$0xff]   ;;  %v12827_v48 = vld [vmem:[%s14419_s21 + $0xbe8] ss:$20 sps:$4 sm:$0xff]  }
 0x2e7   : > { %v12832_v54 = vld [vmem:[%s14419_s21 + $0xc0c] ss:$20 sps:$4 sm:$0xff]  }
 0x2e8   : > { %8487 = vmatmul.mubr.bf16.vlgmr.msra.gmra.mrb[0].mxu0 %v14969_v62  ;;  %9020 = vmatmul.mubr.bf16.vlgmr.msra.gmra.mrb[0].mxu1 %v14969_v62 }
 0x2e9   : > { %8496 = vmatpush1.bf16.msra.mxu0 %v12752_v63  ;;  %9029 = vmatpush1.bf16.msra.mxu1 %v12755_v0  ;;  %v12830_v63 = vld [vmem:[%s14419_s21 + $0xc08] ss:$20 sps:$4 sm:$0xff]   ;;  %v12833_v0 = vld [vmem:[%s14419_s21 + $0xc10] ss:$20 sps:$4 sm:$0xff]  }
 0x2ea   : > { %8497 = vmatprep.subr.bf16.mxu0 %v12760_v1  ;;  %9030 = vmatprep.subr.bf16.mxu1 %v12763_v3  ;;  %v12838_v1 = vld [vmem:[%s14419_s21 + $0xc34] ss:$20 sps:$4 sm:$0xff]   ;;  %v12841_v3 = vld [vmem:[%s14419_s21 + $0xc3c] ss:$20 sps:$4 sm:$0xff]  }
 0x2eb   : > { %8527 = vmatprep.mubr.bf16.mxu0 %v14976_v4  ;;  %9060 = vmatprep.mubr.bf16.mxu1 %v14976_v4 }
 0x2ed   : > { %8498 = vmatpush1.bf16.msra.mxu0 %v12758_v6  ;;  %9031 = vmatpush1.bf16.msra.mxu1 %v12761_v8  ;;  %v12836_v6 = vld [vmem:[%s14419_s21 + $0xc30] ss:$20 sps:$4 sm:$0xff]   ;;  %v12839_v8 = vld [vmem:[%s14419_s21 + $0xc38] ss:$20 sps:$4 sm:$0xff]  }
 0x2ee   : > { %8499 = vmatprep.subr.bf16.mxu0 %v12766_v9  ;;  %9032 = vmatprep.subr.bf16.mxu1 %v12769_v10  ;;  %v12844_v9 = vld [vmem:[%s14419_s21 + $0xc5c] ss:$20 sps:$4 sm:$0xff]   ;;  %v12847_v10 = vld [vmem:[%s14419_s21 + $0xc64] ss:$20 sps:$4 sm:$0xff]  }
 0x2f1   : > { %8500 = vmatpush1.bf16.msra.mxu0 %v12764_v11  ;;  %9033 = vmatpush1.bf16.msra.mxu1 %v12767_v14  ;;  %v12842_v11 = vld [vmem:[%s14419_s21 + $0xc58] ss:$20 sps:$4 sm:$0xff]   ;;  %v12845_v14 = vld [vmem:[%s14419_s21 + $0xc60] ss:$20 sps:$4 sm:$0xff]  }
 0x2f2   : > { %8501 = vmatprep.subr.bf16.mxu0 %v12772_v15  ;;  %9034 = vmatprep.subr.bf16.mxu1 %v12775_v17  ;;  %v12850_v15 = vld [vmem:[%s14419_s21 + $0xc84] ss:$20 sps:$4 sm:$0xff]   ;;  %v12853_v17 = vld [vmem:[%s14419_s21 + $0xc8c] ss:$20 sps:$4 sm:$0xff]  }
 0x2f5   : > { %8502 = vmatpush1.bf16.msra.mxu0 %v12770_v18  ;;  %9035 = vmatpush1.bf16.msra.mxu1 %v12773_v55  ;;  %v15044_v18 = vrot.slane %v14955_v47, %v14697_v2  ;;  %v12848_v55 = vld [vmem:[%s14419_s21 + $0xc80] ss:$20 sps:$4 sm:$0xff]   ;;  %v12854_v47 = vld [vmem:[%s14419_s21 + $0xca8] ss:$20 sps:$4 sm:$0xff]  }
 0x2f6   : > { %8503 = vmatprep.subr.bf16.mxu0 %v12778_v26  ;;  %9036 = vmatprep.subr.bf16.mxu1 %v12781_v33  ;;  %v12851_v26 = vld [vmem:[%s14419_s21 + $0xc88] ss:$20 sps:$4 sm:$0xff]   ;;  %v12856_v33 = vld [vmem:[%s14419_s21 + $0xcac] ss:$20 sps:$4 sm:$0xff]  }
 0x2f9   : > { %8504 = vmatpush1.bf16.msra.mxu0 %v12776_v57  ;;  %9037 = vmatpush1.bf16.msra.mxu1 %v12779_v20  ;;  %v12859_v57 = vld [vmem:[%s14419_s21 + $0xcb4] ss:$20 sps:$4 sm:$0xff]   ;;  %v15052_v20 = vcombine.high %v14976_v4, %v14976_v4 }
 0x2fa   : > { %8505 = vmatprep.subr.bf16.mxu0 %v12784_v56  ;;  %9038 = vmatprep.subr.bf16.mxu1 %v12787_v21  ;;  %v12857_v56 = vld [vmem:[%s14419_s21 + $0xcb0] ss:$20 sps:$4 sm:$0xff]   ;;  %v12862_v21 = vld [vmem:[%s14419_s21 + $0xcd4] ss:$20 sps:$4 sm:$0xff]  }
 0x2fd   : > { %8506 = vmatpush1.bf16.msra.mxu0 %v12782_v22  ;;  %9039 = vmatpush1.bf16.msra.mxu1 %v12785_v23  ;;  %v12865_v22 = vld [vmem:[%s14419_s21 + $0xcdc] ss:$20 sps:$4 sm:$0xff]  }
 0x2fe   : > { %8507 = vmatprep.subr.bf16.mxu0 %v12790_v59  ;;  %9040 = vmatprep.subr.bf16.mxu1 %v12793_v24  ;;  %v12860_v23 = vld [vmem:[%s14419_s21 + $0xcd0] ss:$20 sps:$4 sm:$0xff]   ;;  %v12863_v59 = vld [vmem:[%s14419_s21 + $0xcd8] ss:$20 sps:$4 sm:$0xff]  }
 0x2ff   : > { %v12868_v24 = vld [vmem:[%s14419_s21 + $0xcfc] ss:$20 sps:$4 sm:$0xff]  }
 0x301   : > { %8508 = vmatpush1.bf16.msra.mxu0 %v12788_v60  ;;  %9041 = vmatpush1.bf16.msra.mxu1 %v12791_v25  ;;  %v12871_v60 = vld [vmem:[%s14419_s21 + $0xd04] ss:$20 sps:$4 sm:$0xff]  }
 0x302   : > { %8509 = vmatprep.subr.bf16.mxu0 %v12796_v27  ;;  %9042 = vmatprep.subr.bf16.mxu1 %v12799_v29  ;;  %v12866_v25 = vld [vmem:[%s14419_s21 + $0xcf8] ss:$20 sps:$4 sm:$0xff]   ;;  %v12869_v27 = vld [vmem:[%s14419_s21 + $0xd00] ss:$20 sps:$4 sm:$0xff]  }
 0x303   : > { %v12874_v29 = vld [vmem:[%s14419_s21 + $0xd24] ss:$20 sps:$4 sm:$0xff]  }
 0x305   : > { %8510 = vmatpush1.bf16.msra.mxu0 %v12794_v30  ;;  %9043 = vmatpush1.bf16.msra.mxu1 %v12797_v34  ;;  %v12877_v30 = vld [vmem:[%s14419_s21 + $0xd2c] ss:$20 sps:$4 sm:$0xff]  }
 0x306   : > { %8511 = vmatprep.subr.bf16.mxu0 %v12802_v5  ;;  %9044 = vmatprep.subr.bf16.mxu1 %v12805_v35  ;;  %v12872_v34 = vld [vmem:[%s14419_s21 + $0xd20] ss:$20 sps:$4 sm:$0xff]   ;;  %v12875_v5 = vld [vmem:[%s14419_s21 + $0xd28] ss:$20 sps:$4 sm:$0xff]  }
 0x307   : > { %v12880_v35 = vld [vmem:[%s14419_s21 + $0xd4c] ss:$20 sps:$4 sm:$0xff]  }
 0x309   : > { %8512 = vmatpush1.bf16.msra.mxu0 %v12800_v36  ;;  %9045 = vmatpush1.bf16.msra.mxu1 %v12803_v37  ;;  %v12883_v36 = vld [vmem:[%s14419_s21 + $0xd54] ss:$20 sps:$4 sm:$0xff]  }
 0x30a   : > { %8513 = vmatprep.subr.bf16.mxu0 %v12808_v38  ;;  %9046 = vmatprep.subr.bf16.mxu1 %v12811_v40  ;;  %v12878_v37 = vld [vmem:[%s14419_s21 + $0xd48] ss:$20 sps:$4 sm:$0xff]   ;;  %v12881_v38 = vld [vmem:[%s14419_s21 + $0xd50] ss:$20 sps:$4 sm:$0xff]  }
 0x30b   : > { %v12886_v40 = vld [vmem:[%s14419_s21 + $0xd74] ss:$20 sps:$4 sm:$0xff]  }
 0x30d   : > { %8514 = vmatpush1.bf16.msra.mxu0 %v12806_v41  ;;  %9047 = vmatpush1.bf16.msra.mxu1 %v12809_v42  ;;  %v12889_v41 = vld [vmem:[%s14419_s21 + $0xd7c] ss:$20 sps:$4 sm:$0xff]  }
 0x30e   : > { %8515 = vmatprep.subr.bf16.mxu0 %v12814_v43  ;;  %9048 = vmatprep.subr.bf16.mxu1 %v12817_v12  ;;  %v12884_v42 = vld [vmem:[%s14419_s21 + $0xd70] ss:$20 sps:$4 sm:$0xff]   ;;  %v12887_v43 = vld [vmem:[%s14419_s21 + $0xd78] ss:$20 sps:$4 sm:$0xff]  }
 0x30f   : > { %v12892_v12 = vld [vmem:[%s14419_s21 + $0xd9c] ss:$20 sps:$4 sm:$0xff]  }
 0x311   : > { %8516 = vmatpush1.bf16.msra.mxu0 %v12812_v44  ;;  %9049 = vmatpush1.bf16.msra.mxu1 %v12815_v13  ;;  %v12895_v44 = vld [vmem:[%s14419_s21 + $0xda4] ss:$20 sps:$4 sm:$0xff]  }
 0x312   : > { %8517 = vmatprep.subr.bf16.mxu0 %v12820_v45  ;;  %9050 = vmatprep.subr.bf16.mxu1 %v12823_v49  ;;  %v12890_v13 = vld [vmem:[%s14419_s21 + $0xd98] ss:$20 sps:$4 sm:$0xff]   ;;  %v12893_v45 = vld [vmem:[%s14419_s21 + $0xda0] ss:$20 sps:$4 sm:$0xff]  }
 0x313   : > { %v12898_v49 = vld [vmem:[%s14419_s21 + $0xdc4] ss:$20 sps:$4 sm:$0xff]  }
 0x315   : > { %8518 = vmatpush1.bf16.msra.mxu0 %v12818_v19  ;;  %9051 = vmatpush1.bf16.msra.mxu1 %v12821_v31  ;;  %v12901_v19 = vld [vmem:[%s14419_s21 + $0xdcc] ss:$20 sps:$4 sm:$0xff]  }
 0x316   : > { %8519 = vmatprep.subr.bf16.mxu0 %v12826_v51  ;;  %9052 = vmatprep.subr.bf16.mxu1 %v12829_v52  ;;  %v12896_v31 = vld [vmem:[%s14419_s21 + $0xdc0] ss:$20 sps:$4 sm:$0xff]   ;;  %v12899_v51 = vld [vmem:[%s14419_s21 + $0xdc8] ss:$20 sps:$4 sm:$0xff]  }
 0x317   : > { %v12904_v52 = vld [vmem:[%s14419_s21 + $0xdec] ss:$20 sps:$4 sm:$0xff]  }
 0x319   : > { %8520 = vmatpush1.bf16.msra.mxu0 %v12824_v53  ;;  %9053 = vmatpush1.bf16.msra.mxu1 %v12827_v48  ;;  %v12907_v53 = vld [vmem:[%s14419_s21 + $0xdf4] ss:$20 sps:$4 sm:$0xff]  }
 0x31a   : > { %8521 = vmatprep.subr.bf16.mxu0 %v12832_v54  ;;  %9054 = vmatprep.subr.bf16.mxu1 %v12835_v61  ;;  %v12902_v48 = vld [vmem:[%s14419_s21 + $0xde8] ss:$20 sps:$4 sm:$0xff]   ;;  %v12905_v54 = vld [vmem:[%s14419_s21 + $0xdf0] ss:$20 sps:$4 sm:$0xff]  }
 0x31b   : > { %v12910_v61 = vld [vmem:[%s14419_s21 + $0xe14] ss:$20 sps:$4 sm:$0xff]  }
 0x31d   : > { %8522 = vmatpush1.bf16.msra.mxu0 %v12830_v63  ;;  %9055 = vmatpush1.bf16.msra.mxu1 %v12833_v0  ;;  %v12913_v63 = vld [vmem:[%s14419_s21 + $0xe1c] ss:$20 sps:$4 sm:$0xff]  }
 0x31e   : > { %8523 = vmatprep.subr.bf16.mxu0 %v12838_v1  ;;  %9056 = vmatprep.subr.bf16.mxu1 %v12841_v3  ;;  %v12908_v0 = vld [vmem:[%s14419_s21 + $0xe10] ss:$20 sps:$4 sm:$0xff]   ;;  %v12911_v1 = vld [vmem:[%s14419_s21 + $0xe18] ss:$20 sps:$4 sm:$0xff]  }
 0x31f   : > { %v12916_v3 = vld [vmem:[%s14419_s21 + $0xe3c] ss:$20 sps:$4 sm:$0xff]  }
 0x321   : > { %8524 = vmatpush1.bf16.msra.mxu0 %v12836_v6  ;;  %9057 = vmatpush1.bf16.msra.mxu1 %v12839_v8  ;;  %v12919_v6 = vld [vmem:[%s14419_s21 + $0xe44] ss:$20 sps:$4 sm:$0xff]  }
 0x322   : > { %8525 = vmatprep.subr.bf16.mxu0 %v12844_v9  ;;  %9058 = vmatprep.subr.bf16.mxu1 %v12847_v10  ;;  %v12914_v8 = vld [vmem:[%s14419_s21 + $0xe38] ss:$20 sps:$4 sm:$0xff]   ;;  %v12917_v9 = vld [vmem:[%s14419_s21 + $0xe40] ss:$20 sps:$4 sm:$0xff]  }
 0x323   : > { %v12922_v10 = vld [vmem:[%s14419_s21 + $0xe64] ss:$20 sps:$4 sm:$0xff]  }
 0x325   : > { %8526 = vmatpush1.bf16.msra.mxu0 %v12842_v11  ;;  %9059 = vmatpush1.bf16.msra.mxu1 %v12845_v14  ;;  %v12925_v11 = vld [vmem:[%s14419_s21 + $0xe6c] ss:$20 sps:$4 sm:$0xff]  }
 0x326   : > { %8536 = vmatprep.subr.bf16.mxu0 %v12850_v15  ;;  %9069 = vmatprep.subr.bf16.mxu1 %v12853_v17  ;;  %v12920_v14 = vld [vmem:[%s14419_s21 + $0xe60] ss:$20 sps:$4 sm:$0xff]   ;;  %v12923_v15 = vld [vmem:[%s14419_s21 + $0xe68] ss:$20 sps:$4 sm:$0xff]  }
 0x327   : > { %v12928_v17 = vld [vmem:[%s14419_s21 + $0xe8c] ss:$20 sps:$4 sm:$0xff]  }
 0x328   : > { %8528 = vmatmul.mubr.bf16.vlgmr.msra.gmra.mrb[0].mxu0 %v15044_v18  ;;  %9061 = vmatmul.mubr.bf16.vlgmr.msra.gmra.mrb[0].mxu1 %v15044_v18 }
 0x329   : > { %8537 = vmatpush1.bf16.msra.mxu0 %v12848_v55  ;;  %9070 = vmatpush1.bf16.msra.mxu1 %v12851_v26  ;;  %v12931_v55 = vld [vmem:[%s14419_s21 + $0xe94] ss:$20 sps:$4 sm:$0xff]  }
 0x32a   : > { %8538 = vmatprep.subr.bf16.mxu0 %v12856_v33  ;;  %9071 = vmatprep.subr.bf16.mxu1 %v12859_v57  ;;  %v12926_v26 = vld [vmem:[%s14419_s21 + $0xe88] ss:$20 sps:$4 sm:$0xff]   ;;  %v12929_v33 = vld [vmem:[%s14419_s21 + $0xe90] ss:$20 sps:$4 sm:$0xff]  }
 0x32b   : > { %8568 = vmatprep.mubr.bf16.mxu0 %v15052_v20  ;;  %9101 = vmatprep.mubr.bf16.mxu1 %v15052_v20  ;;  %v12934_v57 = vld [vmem:[%s14419_s21 + $0xeb4] ss:$20 sps:$4 sm:$0xff]  }
 0x32d   : > { %8539 = vmatpush1.bf16.msra.mxu0 %v12854_v47  ;;  %9072 = vmatpush1.bf16.msra.mxu1 %v12857_v56  ;;  %v12937_v47 = vld [vmem:[%s14419_s21 + $0xebc] ss:$20 sps:$4 sm:$0xff]   ;;  %v13810_v56 = vld [vmem:[#allocation2 + $0x8] sm:$0xff] }
 0x32e   : > { %8540 = vmatprep.subr.bf16.mxu0 %v12862_v21  ;;  %9073 = vmatprep.subr.bf16.mxu1 %v12865_v22  ;;  %v2968_v21 = vcombine.high %v13810_v56, %v13810_v56  ;;  %v12932_v22 = vld [vmem:[%s14419_s21 + $0xeb0] ss:$20 sps:$4 sm:$0xff]  }
 0x32f   : > { %v13001_v56 = vld [vmem:[%s14419_s21 + $0x1070] ss:$20 sps:$4 sm:$0xff]  }
 0x331   : > { %8541 = vmatpush1.bf16.msra.mxu0 %v12860_v23  ;;  %9074 = vmatpush1.bf16.msra.mxu1 %v12863_v59  ;;  %v12935_v23 = vld [vmem:[%s14419_s21 + $0xeb8] ss:$20 sps:$4 sm:$0xff]   ;;  %v12940_v59 = vld [vmem:[%s14419_s21 + $0xedc] ss:$20 sps:$4 sm:$0xff]  }
 0x332   : > { %8542 = vmatprep.subr.bf16.mxu0 %v12868_v24  ;;  %9075 = vmatprep.subr.bf16.mxu1 %v12871_v60  ;;  %v12943_v24 = vld [vmem:[%s14419_s21 + $0xee4] ss:$20 sps:$4 sm:$0xff]   ;;  %v15115_v60 = vrot.slane %v2968_v21, %v14697_v2  ;;  %v13006_v21 = vld [vmem:[%s14419_s21 + $0x1094] ss:$20 sps:$4 sm:$0xff]  }
 0x335   : > { %8543 = vmatpush1.bf16.msra.mxu0 %v12866_v25  ;;  %9076 = vmatpush1.bf16.msra.mxu1 %v12869_v27  ;;  %v12938_v25 = vld [vmem:[%s14419_s21 + $0xed8] ss:$20 sps:$4 sm:$0xff]   ;;  %v12941_v27 = vld [vmem:[%s14419_s21 + $0xee0] ss:$20 sps:$4 sm:$0xff]  }
 0x336   : > { %8544 = vmatprep.subr.bf16.mxu0 %v12874_v29  ;;  %9077 = vmatprep.subr.bf16.mxu1 %v12877_v30  ;;  %v12946_v29 = vld [vmem:[%s14419_s21 + $0xf04] ss:$20 sps:$4 sm:$0xff]   ;;  %v12949_v30 = vld [vmem:[%s14419_s21 + $0xf0c] ss:$20 sps:$4 sm:$0xff]  }
 0x339   : > { %8545 = vmatpush1.bf16.msra.mxu0 %v12872_v34  ;;  %9078 = vmatpush1.bf16.msra.mxu1 %v12875_v5  ;;  %v2984_v34 = vcombine.high %v15115_v60, %v15115_v60  ;;  %v15125_v5 = vcombine.high %v15044_v18, %v15044_v18 }
 0x33a   : > { %8546 = vmatprep.subr.bf16.mxu0 %v12880_v35  ;;  %9079 = vmatprep.subr.bf16.mxu1 %v12883_v36  ;;  %v12944_v35 = vld [vmem:[%s14419_s21 + $0xf00] ss:$20 sps:$4 sm:$0xff]   ;;  %v12947_v36 = vld [vmem:[%s14419_s21 + $0xf08] ss:$20 sps:$4 sm:$0xff]  }
 0x33d   : > { %8547 = vmatpush1.bf16.msra.mxu0 %v12878_v37  ;;  %9080 = vmatpush1.bf16.msra.mxu1 %v12881_v38  ;;  %v12952_v37 = vld [vmem:[%s14419_s21 + $0xf2c] ss:$20 sps:$4 sm:$0xff]   ;;  %v12955_v38 = vld [vmem:[%s14419_s21 + $0xf34] ss:$20 sps:$4 sm:$0xff]  }
 0x33e   : > { %8548 = vmatprep.subr.bf16.mxu0 %v12886_v40  ;;  %9081 = vmatprep.subr.bf16.mxu1 %v12889_v41  ;;  %v15132_v40 = vrot.slane %v2984_v34, %v14697_v2  ;;  %v12950_v41 = vld [vmem:[%s14419_s21 + $0xf28] ss:$20 sps:$4 sm:$0xff]   ;;  %v13021_v34 = vld [vmem:[%s14419_s21 + $0x10ec] ss:$20 sps:$4 sm:$0xff]  }
 0x341   : > { %8549 = vmatpush1.bf16.msra.mxu0 %v12884_v42  ;;  %9082 = vmatpush1.bf16.msra.mxu1 %v12887_v43  ;;  %v12953_v42 = vld [vmem:[%s14419_s21 + $0xf30] ss:$20 sps:$4 sm:$0xff]   ;;  %v12958_v43 = vld [vmem:[%s14419_s21 + $0xf54] ss:$20 sps:$4 sm:$0xff]  }
 0x342   : > { %8550 = vmatprep.subr.bf16.mxu0 %v12892_v12  ;;  %9083 = vmatprep.subr.bf16.mxu1 %v12895_v44  ;;  %v12961_v12 = vld [vmem:[%s14419_s21 + $0xf5c] ss:$20 sps:$4 sm:$0xff]  }
 0x343   : > { %v12956_v44 = vld [vmem:[%s14419_s21 + $0xf50] ss:$20 sps:$4 sm:$0xff]  }
 0x345   : > { %8551 = vmatpush1.bf16.msra.mxu0 %v12890_v13  ;;  %9084 = vmatpush1.bf16.msra.mxu1 %v12893_v45  ;;  %v12959_v13 = vld [vmem:[%s14419_s21 + $0xf58] ss:$20 sps:$4 sm:$0xff]   ;;  %v12964_v45 = vld [vmem:[%s14419_s21 + $0xf7c] ss:$20 sps:$4 sm:$0xff]  }
 0x346   : > { %8552 = vmatprep.subr.bf16.mxu0 %v12898_v49  ;;  %9085 = vmatprep.subr.bf16.mxu1 %v12901_v19  ;;  %v12967_v49 = vld [vmem:[%s14419_s21 + $0xf84] ss:$20 sps:$4 sm:$0xff]  }
 0x347   : > { %v12962_v19 = vld [vmem:[%s14419_s21 + $0xf78] ss:$20 sps:$4 sm:$0xff]  }
 0x349   : > { %8553 = vmatpush1.bf16.msra.mxu0 %v12896_v31  ;;  %9086 = vmatpush1.bf16.msra.mxu1 %v12899_v51  ;;  %v12965_v31 = vld [vmem:[%s14419_s21 + $0xf80] ss:$20 sps:$4 sm:$0xff]   ;;  %v12970_v51 = vld [vmem:[%s14419_s21 + $0xfa4] ss:$20 sps:$4 sm:$0xff]  }
 0x34a   : > { %8554 = vmatprep.subr.bf16.mxu0 %v12904_v52  ;;  %9087 = vmatprep.subr.bf16.mxu1 %v12907_v53  ;;  %v12973_v52 = vld [vmem:[%s14419_s21 + $0xfac] ss:$20 sps:$4 sm:$0xff]  }
 0x34b   : > { %v12968_v53 = vld [vmem:[%s14419_s21 + $0xfa0] ss:$20 sps:$4 sm:$0xff]  }
 0x34d   : > { %8555 = vmatpush1.bf16.msra.mxu0 %v12902_v48  ;;  %9088 = vmatpush1.bf16.msra.mxu1 %v12905_v54  ;;  %v12971_v48 = vld [vmem:[%s14419_s21 + $0xfa8] ss:$20 sps:$4 sm:$0xff]   ;;  %v12976_v54 = vld [vmem:[%s14419_s21 + $0xfcc] ss:$20 sps:$4 sm:$0xff]  }
 0x34e   : > { %8556 = vmatprep.subr.bf16.mxu0 %v12910_v61  ;;  %9089 = vmatprep.subr.bf16.mxu1 %v12913_v63  ;;  %v12979_v61 = vld [vmem:[%s14419_s21 + $0xfd4] ss:$20 sps:$4 sm:$0xff]  }
 0x34f   : > { %v12974_v63 = vld [vmem:[%s14419_s21 + $0xfc8] ss:$20 sps:$4 sm:$0xff]  }
 0x351   : > { %8557 = vmatpush1.bf16.msra.mxu0 %v12908_v0  ;;  %9090 = vmatpush1.bf16.msra.mxu1 %v12911_v1  ;;  %v12977_v0 = vld [vmem:[%s14419_s21 + $0xfd0] ss:$20 sps:$4 sm:$0xff]   ;;  %v12982_v1 = vld [vmem:[%s14419_s21 + $0xff4] ss:$20 sps:$4 sm:$0xff]  }
 0x352   : > { %8558 = vmatprep.subr.bf16.mxu0 %v12916_v3  ;;  %9091 = vmatprep.subr.bf16.mxu1 %v12919_v6  ;;  %v12985_v3 = vld [vmem:[%s14419_s21 + $0xffc] ss:$20 sps:$4 sm:$0xff]  }
 0x353   : > { %v12980_v6 = vld [vmem:[%s14419_s21 + $0xff0] ss:$20 sps:$4 sm:$0xff]  }
 0x355   : > { %8559 = vmatpush1.bf16.msra.mxu0 %v12914_v8  ;;  %9092 = vmatpush1.bf16.msra.mxu1 %v12917_v9  ;;  %v12983_v8 = vld [vmem:[%s14419_s21 + $0xff8] ss:$20 sps:$4 sm:$0xff]   ;;  %v12988_v9 = vld [vmem:[%s14419_s21 + $0x101c] ss:$20 sps:$4 sm:$0xff]  }
 0x356   : > { %8560 = vmatprep.subr.bf16.mxu0 %v12922_v10  ;;  %9093 = vmatprep.subr.bf16.mxu1 %v12925_v11  ;;  %v12991_v10 = vld [vmem:[%s14419_s21 + $0x1024] ss:$20 sps:$4 sm:$0xff]  }
 0x357   : > { %v12986_v11 = vld [vmem:[%s14419_s21 + $0x1018] ss:$20 sps:$4 sm:$0xff]  }
 0x359   : > { %8561 = vmatpush1.bf16.msra.mxu0 %v12920_v14  ;;  %9094 = vmatpush1.bf16.msra.mxu1 %v12923_v15  ;;  %v12989_v14 = vld [vmem:[%s14419_s21 + $0x1020] ss:$20 sps:$4 sm:$0xff]   ;;  %v12994_v15 = vld [vmem:[%s14419_s21 + $0x1044] ss:$20 sps:$4 sm:$0xff]  }
 0x35a   : > { %8562 = vmatprep.subr.bf16.mxu0 %v12928_v17  ;;  %9095 = vmatprep.subr.bf16.mxu1 %v12931_v55  ;;  %v12997_v17 = vld [vmem:[%s14419_s21 + $0x104c] ss:$20 sps:$4 sm:$0xff]  }
 0x35b   : > { %v12992_v55 = vld [vmem:[%s14419_s21 + $0x1040] ss:$20 sps:$4 sm:$0xff]  }
 0x35d   : > { %8563 = vmatpush1.bf16.msra.mxu0 %v12926_v26  ;;  %9096 = vmatpush1.bf16.msra.mxu1 %v12929_v33  ;;  %v12995_v26 = vld [vmem:[%s14419_s21 + $0x1048] ss:$20 sps:$4 sm:$0xff]   ;;  %v13000_v33 = vld [vmem:[%s14419_s21 + $0x106c] ss:$20 sps:$4 sm:$0xff]  }
 0x35e   : > { %8564 = vmatprep.subr.bf16.mxu0 %v12934_v57  ;;  %9097 = vmatprep.subr.bf16.mxu1 %v12937_v47  ;;  %v13003_v57 = vld [vmem:[%s14419_s21 + $0x1074] ss:$20 sps:$4 sm:$0xff]  }
 0x35f   : > { %v12998_v47 = vld [vmem:[%s14419_s21 + $0x1068] ss:$20 sps:$4 sm:$0xff]  }
 0x361   : > { %8565 = vmatpush1.bf16.msra.mxu0 %v12932_v22  ;;  %9098 = vmatpush1.bf16.msra.mxu1 %v12935_v23  ;;  %v13009_v22 = vld [vmem:[%s14419_s21 + $0x109c] ss:$20 sps:$4 sm:$0xff]  }
 0x362   : > { %8566 = vmatprep.subr.bf16.mxu0 %v12940_v59  ;;  %9099 = vmatprep.subr.bf16.mxu1 %v12943_v24  ;;  %v13004_v23 = vld [vmem:[%s14419_s21 + $0x1090] ss:$20 sps:$4 sm:$0xff]   ;;  %v13007_v59 = vld [vmem:[%s14419_s21 + $0x1098] ss:$20 sps:$4 sm:$0xff]  }
 0x363   : > { %v13012_v24 = vld [vmem:[%s14419_s21 + $0x10bc] ss:$20 sps:$4 sm:$0xff]  }
 0x365   : > { %8567 = vmatpush1.bf16.msra.mxu0 %v12938_v25  ;;  %9100 = vmatpush1.bf16.msra.mxu1 %v12941_v27  ;;  %v13015_v25 = vld [vmem:[%s14419_s21 + $0x10c4] ss:$20 sps:$4 sm:$0xff]  }
 0x366   : > { %8577 = vmatprep.subr.bf16.mxu0 %v12946_v29  ;;  %9110 = vmatprep.subr.bf16.mxu1 %v12949_v30  ;;  %v13010_v27 = vld [vmem:[%s14419_s21 + $0x10b8] ss:$20 sps:$4 sm:$0xff]   ;;  %v13013_v29 = vld [vmem:[%s14419_s21 + $0x10c0] ss:$20 sps:$4 sm:$0xff]  }
 0x367   : > { %v13018_v30 = vld [vmem:[%s14419_s21 + $0x10e4] ss:$20 sps:$4 sm:$0xff]  }
 0x368   : > { %8569 = vmatmul.mubr.bf16.vlgmr.msra.gmra.mrb[0].mxu0 %v15125_v5  ;;  %9102 = vmatmul.mubr.bf16.vlgmr.msra.gmra.mrb[0].mxu1 %v15125_v5 }
 0x369   : > { %8578 = vmatpush1.bf16.msra.mxu0 %v12944_v35  ;;  %9111 = vmatpush1.bf16.msra.mxu1 %v12947_v36  ;;  %v13016_v35 = vld [vmem:[%s14419_s21 + $0x10e0] ss:$20 sps:$4 sm:$0xff]   ;;  %v13019_v36 = vld [vmem:[%s14419_s21 + $0x10e8] ss:$20 sps:$4 sm:$0xff]  }
 0x36a   : > { %8579 = vmatprep.subr.bf16.mxu0 %v12952_v37  ;;  %9112 = vmatprep.subr.bf16.mxu1 %v12955_v38  ;;  %v13024_v37 = vld [vmem:[%s14419_s21 + $0x110c] ss:$20 sps:$4 sm:$0xff]   ;;  %v13027_v38 = vld [vmem:[%s14419_s21 + $0x1114] ss:$20 sps:$4 sm:$0xff]  }
 0x36b   : > { %8609 = vmatprep.mubr.bf16.mxu0 %v15132_v40  ;;  %9142 = vmatprep.mubr.bf16.mxu1 %v15132_v40 }
 0x36d   : > { %8580 = vmatpush1.bf16.msra.mxu0 %v12950_v41  ;;  %9113 = vmatpush1.bf16.msra.mxu1 %v12953_v42  ;;  %v13022_v41 = vld [vmem:[%s14419_s21 + $0x1108] ss:$20 sps:$4 sm:$0xff]   ;;  %v13025_v42 = vld [vmem:[%s14419_s21 + $0x1110] ss:$20 sps:$4 sm:$0xff]  }
 0x36e   : > { %8581 = vmatprep.subr.bf16.mxu0 %v12958_v43  ;;  %9114 = vmatprep.subr.bf16.mxu1 %v12961_v12  ;;  %v13030_v43 = vld [vmem:[%s14419_s21 + $0x1134] ss:$20 sps:$4 sm:$0xff]   ;;  %v13033_v12 = vld [vmem:[%s14419_s21 + $0x113c] ss:$20 sps:$4 sm:$0xff]  }
 0x371   : > { %8582 = vmatpush1.bf16.msra.mxu0 %v12956_v44  ;;  %9115 = vmatpush1.bf16.msra.mxu1 %v12959_v13  ;;  %v13028_v44 = vld [vmem:[%s14419_s21 + $0x1130] ss:$20 sps:$4 sm:$0xff]   ;;  %v13031_v13 = vld [vmem:[%s14419_s21 + $0x1138] ss:$20 sps:$4 sm:$0xff]  }
 0x372   : > { %8583 = vmatprep.subr.bf16.mxu0 %v12964_v45  ;;  %9116 = vmatprep.subr.bf16.mxu1 %v12967_v49  ;;  %v13036_v45 = vld [vmem:[%s14419_s21 + $0x115c] ss:$20 sps:$4 sm:$0xff]   ;;  %v13039_v49 = vld [vmem:[%s14419_s21 + $0x1164] ss:$20 sps:$4 sm:$0xff]  }
 0x375   : > { %8584 = vmatpush1.bf16.msra.mxu0 %v12962_v19  ;;  %9117 = vmatpush1.bf16.msra.mxu1 %v12965_v31  ;;  %v13034_v19 = vld [vmem:[%s14419_s21 + $0x1158] ss:$20 sps:$4 sm:$0xff]   ;;  %v13037_v31 = vld [vmem:[%s14419_s21 + $0x1160] ss:$20 sps:$4 sm:$0xff]  }
 0x376   : > { %8585 = vmatprep.subr.bf16.mxu0 %v12970_v51  ;;  %9118 = vmatprep.subr.bf16.mxu1 %v12973_v52  ;;  %v13043_v51 = vld [vmem:[%s14419_s21 + $0x1184] ss:$20 sps:$4 sm:$0xff]   ;;  %v13046_v52 = vld [vmem:[%s14419_s21 + $0x118c] ss:$20 sps:$4 sm:$0xff]  }
 0x379   : > { %8586 = vmatpush1.bf16.msra.mxu0 %v12968_v53  ;;  %9119 = vmatpush1.bf16.msra.mxu1 %v12971_v48  ;;  %v15200_v53 = vrot.slane %v15115_v60, %v14697_v2  ;;  %v13041_v48 = vld [vmem:[%s14419_s21 + $0x1180] ss:$20 sps:$4 sm:$0xff]   ;;  %v13047_v60 = vld [vmem:[%s14419_s21 + $0x11a8] ss:$20 sps:$4 sm:$0xff]  }
 0x37a   : > { %8587 = vmatprep.subr.bf16.mxu0 %v12976_v54  ;;  %9120 = vmatprep.subr.bf16.mxu1 %v12979_v61  ;;  %v13044_v54 = vld [vmem:[%s14419_s21 + $0x1188] ss:$20 sps:$4 sm:$0xff]   ;;  %v13049_v61 = vld [vmem:[%s14419_s21 + $0x11ac] ss:$20 sps:$4 sm:$0xff]  }
 0x37d   : > { %8588 = vmatpush1.bf16.msra.mxu0 %v12974_v63  ;;  %9121 = vmatpush1.bf16.msra.mxu1 %v12977_v0  ;;  %v13052_v63 = vld [vmem:[%s14419_s21 + $0x11b4] ss:$20 sps:$4 sm:$0xff]   ;;  %v15208_v0 = vcombine.high %v15132_v40, %v15132_v40 }
 0x37e   : > { %8589 = vmatprep.subr.bf16.mxu0 %v12982_v1  ;;  %9122 = vmatprep.subr.bf16.mxu1 %v12985_v3  ;;  %v13050_v1 = vld [vmem:[%s14419_s21 + $0x11b0] ss:$20 sps:$4 sm:$0xff]   ;;  %v13055_v3 = vld [vmem:[%s14419_s21 + $0x11d4] ss:$20 sps:$4 sm:$0xff]  }
 0x381   : > { %8590 = vmatpush1.bf16.msra.mxu0 %v12980_v6  ;;  %9123 = vmatpush1.bf16.msra.mxu1 %v12983_v8  ;;  %v13058_v6 = vld [vmem:[%s14419_s21 + $0x11dc] ss:$20 sps:$4 sm:$0xff]  }
 0x382   : > { %8591 = vmatprep.subr.bf16.mxu0 %v12988_v9  ;;  %9124 = vmatprep.subr.bf16.mxu1 %v12991_v10  ;;  %v13053_v8 = vld [vmem:[%s14419_s21 + $0x11d0] ss:$20 sps:$4 sm:$0xff]   ;;  %v13056_v9 = vld [vmem:[%s14419_s21 + $0x11d8] ss:$20 sps:$4 sm:$0xff]  }
 0x383   : > { %v13061_v10 = vld [vmem:[%s14419_s21 + $0x11fc] ss:$20 sps:$4 sm:$0xff]  }
 0x385   : > { %8592 = vmatpush1.bf16.msra.mxu0 %v12986_v11  ;;  %9125 = vmatpush1.bf16.msra.mxu1 %v12989_v14  ;;  %v13064_v11 = vld [vmem:[%s14419_s21 + $0x1204] ss:$20 sps:$4 sm:$0xff]  }
 0x386   : > { %8593 = vmatprep.subr.bf16.mxu0 %v12994_v15  ;;  %9126 = vmatprep.subr.bf16.mxu1 %v12997_v17  ;;  %v13059_v14 = vld [vmem:[%s14419_s21 + $0x11f8] ss:$20 sps:$4 sm:$0xff]   ;;  %v13062_v15 = vld [vmem:[%s14419_s21 + $0x1200] ss:$20 sps:$4 sm:$0xff]  }
 0x387   : > { %v13067_v17 = vld [vmem:[%s14419_s21 + $0x1224] ss:$20 sps:$4 sm:$0xff]  }
 0x389   : > { %8594 = vmatpush1.bf16.msra.mxu0 %v12992_v55  ;;  %9127 = vmatpush1.bf16.msra.mxu1 %v12995_v26  ;;  %v13070_v55 = vld [vmem:[%s14419_s21 + $0x122c] ss:$20 sps:$4 sm:$0xff]  }
 0x38a   : > { %8595 = vmatprep.subr.bf16.mxu0 %v13000_v33  ;;  %9128 = vmatprep.subr.bf16.mxu1 %v13003_v57  ;;  %v13065_v26 = vld [vmem:[%s14419_s21 + $0x1220] ss:$20 sps:$4 sm:$0xff]   ;;  %v13068_v33 = vld [vmem:[%s14419_s21 + $0x1228] ss:$20 sps:$4 sm:$0xff]  }
 0x38b   : > { %v13073_v57 = vld [vmem:[%s14419_s21 + $0x124c] ss:$20 sps:$4 sm:$0xff]  }
 0x38d   : > { %8596 = vmatpush1.bf16.msra.mxu0 %v12998_v47  ;;  %9129 = vmatpush1.bf16.msra.mxu1 %v13001_v56  ;;  %v13076_v47 = vld [vmem:[%s14419_s21 + $0x1254] ss:$20 sps:$4 sm:$0xff]  }
 0x38e   : > { %8597 = vmatprep.subr.bf16.mxu0 %v13006_v21  ;;  %9130 = vmatprep.subr.bf16.mxu1 %v13009_v22  ;;  %v13071_v56 = vld [vmem:[%s14419_s21 + $0x1248] ss:$20 sps:$4 sm:$0xff]   ;;  %v13074_v21 = vld [vmem:[%s14419_s21 + $0x1250] ss:$20 sps:$4 sm:$0xff]  }
 0x38f   : > { %v13079_v22 = vld [vmem:[%s14419_s21 + $0x1274] ss:$20 sps:$4 sm:$0xff]  }
 0x391   : > { %8598 = vmatpush1.bf16.msra.mxu0 %v13004_v23  ;;  %9131 = vmatpush1.bf16.msra.mxu1 %v13007_v59  ;;  %v13082_v23 = vld [vmem:[%s14419_s21 + $0x127c] ss:$20 sps:$4 sm:$0xff]  }
 0x392   : > { %8599 = vmatprep.subr.bf16.mxu0 %v13012_v24  ;;  %9132 = vmatprep.subr.bf16.mxu1 %v13015_v25  ;;  %v13077_v59 = vld [vmem:[%s14419_s21 + $0x1270] ss:$20 sps:$4 sm:$0xff]   ;;  %v13080_v24 = vld [vmem:[%s14419_s21 + $0x1278] ss:$20 sps:$4 sm:$0xff]  }
 0x393   : > { %v13085_v25 = vld [vmem:[%s14419_s21 + $0x129c] ss:$20 sps:$4 sm:$0xff]  }
 0x395   : > { %8600 = vmatpush1.bf16.msra.mxu0 %v13010_v27  ;;  %9133 = vmatpush1.bf16.msra.mxu1 %v13013_v29  ;;  %v13088_v27 = vld [vmem:[%s14419_s21 + $0x12a4] ss:$20 sps:$4 sm:$0xff]  }
 0x396   : > { %8601 = vmatprep.subr.bf16.mxu0 %v13018_v30  ;;  %9134 = vmatprep.subr.bf16.mxu1 %v13021_v34  ;;  %v13083_v29 = vld [vmem:[%s14419_s21 + $0x1298] ss:$20 sps:$4 sm:$0xff]   ;;  %v13086_v30 = vld [vmem:[%s14419_s21 + $0x12a0] ss:$20 sps:$4 sm:$0xff]  }
 0x397   : > { %v13091_v34 = vld [vmem:[%s14419_s21 + $0x12c4] ss:$20 sps:$4 sm:$0xff]  }
 0x399   : > { %8602 = vmatpush1.bf16.msra.mxu0 %v13016_v35  ;;  %9135 = vmatpush1.bf16.msra.mxu1 %v13019_v36  ;;  %v13094_v35 = vld [vmem:[%s14419_s21 + $0x12cc] ss:$20 sps:$4 sm:$0xff]  }
 0x39a   : > { %8603 = vmatprep.subr.bf16.mxu0 %v13024_v37  ;;  %9136 = vmatprep.subr.bf16.mxu1 %v13027_v38  ;;  %v13089_v36 = vld [vmem:[%s14419_s21 + $0x12c0] ss:$20 sps:$4 sm:$0xff]   ;;  %v13092_v37 = vld [vmem:[%s14419_s21 + $0x12c8] ss:$20 sps:$4 sm:$0xff]  }
 0x39b   : > { %v13097_v38 = vld [vmem:[%s14419_s21 + $0x12ec] ss:$20 sps:$4 sm:$0xff]  }
 0x39d   : > { %8604 = vmatpush1.bf16.msra.mxu0 %v13022_v41  ;;  %9137 = vmatpush1.bf16.msra.mxu1 %v13025_v42  ;;  %v13100_v41 = vld [vmem:[%s14419_s21 + $0x12f4] ss:$20 sps:$4 sm:$0xff]  }
 0x39e   : > { %8605 = vmatprep.subr.bf16.mxu0 %v13030_v43  ;;  %9138 = vmatprep.subr.bf16.mxu1 %v13033_v12  ;;  %v13095_v42 = vld [vmem:[%s14419_s21 + $0x12e8] ss:$20 sps:$4 sm:$0xff]   ;;  %v13098_v43 = vld [vmem:[%s14419_s21 + $0x12f0] ss:$20 sps:$4 sm:$0xff]  }
 0x39f   : > { %v13103_v12 = vld [vmem:[%s14419_s21 + $0x1314] ss:$20 sps:$4 sm:$0xff]  }
 0x3a1   : > { %8606 = vmatpush1.bf16.msra.mxu0 %v13028_v44  ;;  %9139 = vmatpush1.bf16.msra.mxu1 %v13031_v13  ;;  %v13106_v44 = vld [vmem:[%s14419_s21 + $0x131c] ss:$20 sps:$4 sm:$0xff]  }
 0x3a2   : > { %8607 = vmatprep.subr.bf16.mxu0 %v13036_v45  ;;  %9140 = vmatprep.subr.bf16.mxu1 %v13039_v49  ;;  %v13101_v13 = vld [vmem:[%s14419_s21 + $0x1310] ss:$20 sps:$4 sm:$0xff]   ;;  %v13104_v45 = vld [vmem:[%s14419_s21 + $0x1318] ss:$20 sps:$4 sm:$0xff]  }
 0x3a3   : > { %v13109_v49 = vld [vmem:[%s14419_s21 + $0x133c] ss:$20 sps:$4 sm:$0xff]  }
 0x3a5   : > { %8608 = vmatpush1.bf16.msra.mxu0 %v13034_v19  ;;  %9141 = vmatpush1.bf16.msra.mxu1 %v13037_v31  ;;  %v13112_v19 = vld [vmem:[%s14419_s21 + $0x1344] ss:$20 sps:$4 sm:$0xff]  }
 0x3a6   : > { %8618 = vmatprep.subr.bf16.mxu0 %v13043_v51  ;;  %9151 = vmatprep.subr.bf16.mxu1 %v13046_v52  ;;  %v13107_v31 = vld [vmem:[%s14419_s21 + $0x1338] ss:$20 sps:$4 sm:$0xff]   ;;  %v13110_v51 = vld [vmem:[%s14419_s21 + $0x1340] ss:$20 sps:$4 sm:$0xff]  }
 0x3a7   : > { %v13115_v52 = vld [vmem:[%s14419_s21 + $0x1364] ss:$20 sps:$4 sm:$0xff]  }
 0x3a8   : > { %8610 = vmatmul.mubr.bf16.vlgmr.msra.gmra.mrb[0].mxu0 %v15200_v53  ;;  %9143 = vmatmul.mubr.bf16.vlgmr.msra.gmra.mrb[0].mxu1 %v15200_v53 }
 0x3a9   : > { %8619 = vmatpush1.bf16.msra.mxu0 %v13041_v48  ;;  %9152 = vmatpush1.bf16.msra.mxu1 %v13044_v54  ;;  %v13118_v48 = vld [vmem:[%s14419_s21 + $0x136c] ss:$20 sps:$4 sm:$0xff]  }
 0x3aa   : > { %8620 = vmatprep.subr.bf16.mxu0 %v13049_v61  ;;  %9153 = vmatprep.subr.bf16.mxu1 %v13052_v63  ;;  %v13113_v54 = vld [vmem:[%s14419_s21 + $0x1360] ss:$20 sps:$4 sm:$0xff]   ;;  %v13116_v61 = vld [vmem:[%s14419_s21 + $0x1368] ss:$20 sps:$4 sm:$0xff]  }
 0x3ab   : > { %8650 = vmatprep.mubr.bf16.mxu0 %v15208_v0  ;;  %9183 = vmatprep.mubr.bf16.mxu1 %v15208_v0  ;;  %v13121_v63 = vld [vmem:[%s14419_s21 + $0x138c] ss:$20 sps:$4 sm:$0xff]  }
 0x3ad   : > { %8621 = vmatpush1.bf16.msra.mxu0 %v13047_v60  ;;  %9154 = vmatpush1.bf16.msra.mxu1 %v13050_v1  ;;  %v13124_v60 = vld [vmem:[%s14419_s21 + $0x1394] ss:$20 sps:$4 sm:$0xff]  }
 0x3ae   : > { %8622 = vmatprep.subr.bf16.mxu0 %v13055_v3  ;;  %9155 = vmatprep.subr.bf16.mxu1 %v13058_v6  ;;  %v13119_v1 = vld [vmem:[%s14419_s21 + $0x1388] ss:$20 sps:$4 sm:$0xff]   ;;  %v13122_v3 = vld [vmem:[%s14419_s21 + $0x1390] ss:$20 sps:$4 sm:$0xff]  }
 0x3af   : > { %v13127_v6 = vld [vmem:[%s14419_s21 + $0x13b4] ss:$20 sps:$4 sm:$0xff]  }
 0x3b1   : > { %8623 = vmatpush1.bf16.msra.mxu0 %v13053_v8  ;;  %9156 = vmatpush1.bf16.msra.mxu1 %v13056_v9  ;;  %v13130_v8 = vld [vmem:[%s14419_s21 + $0x13bc] ss:$20 sps:$4 sm:$0xff]  }
 0x3b2   : > { %8624 = vmatprep.subr.bf16.mxu0 %v13061_v10  ;;  %9157 = vmatprep.subr.bf16.mxu1 %v13064_v11  ;;  %v15266_v9 = vld.sshfl [vmem:[#allocation2 + $0x10] sm:$0xff pattern:$0x75316420] }
 0x3b3   : > { %v13125_v10 = vld [vmem:[%s14419_s21 + $0x13b0] ss:$20 sps:$4 sm:$0xff]   ;;  %v13128_v11 = vld [vmem:[%s14419_s21 + $0x13b8] ss:$20 sps:$4 sm:$0xff]  }
 0x3b5   : > { %8625 = vmatpush1.bf16.msra.mxu0 %v13059_v14  ;;  %9158 = vmatpush1.bf16.msra.mxu1 %v13062_v15  ;;  %v13133_v14 = vld [vmem:[%s14419_s21 + $0x13dc] ss:$20 sps:$4 sm:$0xff]   ;;  %v13136_v15 = vld [vmem:[%s14419_s21 + $0x13e4] ss:$20 sps:$4 sm:$0xff]  }
 0x3b6   : > { %8626 = vmatprep.subr.bf16.mxu0 %v13067_v17  ;;  %9159 = vmatprep.subr.bf16.mxu1 %v13070_v55  ;;  %v13131_v17 = vld [vmem:[%s14419_s21 + $0x13d8] ss:$20 sps:$4 sm:$0xff]   ;;  %v13134_v55 = vld [vmem:[%s14419_s21 + $0x13e0] ss:$20 sps:$4 sm:$0xff]  }
 0x3b9   : > { %8627 = vmatpush1.bf16.msra.mxu0 %v13065_v26  ;;  %9160 = vmatpush1.bf16.msra.mxu1 %v13068_v33  ;;  %v13139_v26 = vld [vmem:[%s14419_s21 + $0x1404] ss:$20 sps:$4 sm:$0xff]   ;;  %v13142_v33 = vld [vmem:[%s14419_s21 + $0x140c] ss:$20 sps:$4 sm:$0xff]  }
 0x3ba   : > { %8628 = vmatprep.subr.bf16.mxu0 %v13073_v57  ;;  %9161 = vmatprep.subr.bf16.mxu1 %v13076_v47  ;;  %v3032_v57 = vcombine.high %v15266_v9, %v15266_v9  ;;  %v15280_v47 = vcombine.high %v15200_v53, %v15200_v53 }
 0x3bd   : > { %8629 = vmatpush1.bf16.msra.mxu0 %v13071_v56  ;;  %9162 = vmatpush1.bf16.msra.mxu1 %v13074_v21  ;;  %v13137_v56 = vld [vmem:[%s14419_s21 + $0x1400] ss:$20 sps:$4 sm:$0xff]   ;;  %v13140_v21 = vld [vmem:[%s14419_s21 + $0x1408] ss:$20 sps:$4 sm:$0xff]  }
 0x3be   : > { %8630 = vmatprep.subr.bf16.mxu0 %v13079_v22  ;;  %9163 = vmatprep.subr.bf16.mxu1 %v13082_v23  ;;  %v13145_v22 = vld [vmem:[%s14419_s21 + $0x142c] ss:$20 sps:$4 sm:$0xff]   ;;  %v13148_v23 = vld [vmem:[%s14419_s21 + $0x1434] ss:$20 sps:$4 sm:$0xff]  }
 0x3c1   : > { %8631 = vmatpush1.bf16.msra.mxu0 %v13077_v59  ;;  %9164 = vmatpush1.bf16.msra.mxu1 %v13080_v24  ;;  %v15287_v59 = vrot.slane %v3032_v57, %v14697_v2  ;;  %v13143_v24 = vld [vmem:[%s14419_s21 + $0x1428] ss:$20 sps:$4 sm:$0xff]   ;;  %v13208_v57 = vld [vmem:[%s14419_s21 + $0x15c4] ss:$20 sps:$4 sm:$0xff]  }
 0x3c2   : > { %8632 = vmatprep.subr.bf16.mxu0 %v13085_v25  ;;  %9165 = vmatprep.subr.bf16.mxu1 %v13088_v27  ;;  %v13146_v25 = vld [vmem:[%s14419_s21 + $0x1430] ss:$20 sps:$4 sm:$0xff]   ;;  %v13151_v27 = vld [vmem:[%s14419_s21 + $0x1454] ss:$20 sps:$4 sm:$0xff]  }
 0x3c5   : > { %8633 = vmatpush1.bf16.msra.mxu0 %v13083_v29  ;;  %9166 = vmatpush1.bf16.msra.mxu1 %v13086_v30  ;;  %v13154_v29 = vld [vmem:[%s14419_s21 + $0x145c] ss:$20 sps:$4 sm:$0xff]  }
 0x3c6   : > { %8634 = vmatprep.subr.bf16.mxu0 %v13091_v34  ;;  %9167 = vmatprep.subr.bf16.mxu1 %v13094_v35  ;;  %v13149_v30 = vld [vmem:[%s14419_s21 + $0x1450] ss:$20 sps:$4 sm:$0xff]   ;;  %v13152_v34 = vld [vmem:[%s14419_s21 + $0x1458] ss:$20 sps:$4 sm:$0xff]  }
 0x3c7   : > { %v13157_v35 = vld [vmem:[%s14419_s21 + $0x147c] ss:$20 sps:$4 sm:$0xff]  }
 0x3c9   : > { %8635 = vmatpush1.bf16.msra.mxu0 %v13089_v36  ;;  %9168 = vmatpush1.bf16.msra.mxu1 %v13092_v37  ;;  %v13160_v36 = vld [vmem:[%s14419_s21 + $0x1484] ss:$20 sps:$4 sm:$0xff]  }
 0x3ca   : > { %8636 = vmatprep.subr.bf16.mxu0 %v13097_v38  ;;  %9169 = vmatprep.subr.bf16.mxu1 %v13100_v41  ;;  %v13155_v37 = vld [vmem:[%s14419_s21 + $0x1478] ss:$20 sps:$4 sm:$0xff]   ;;  %v13158_v38 = vld [vmem:[%s14419_s21 + $0x1480] ss:$20 sps:$4 sm:$0xff]  }
 0x3cb   : > { %v13163_v41 = vld [vmem:[%s14419_s21 + $0x14a4] ss:$20 sps:$4 sm:$0xff]  }
 0x3cd   : > { %8637 = vmatpush1.bf16.msra.mxu0 %v13095_v42  ;;  %9170 = vmatpush1.bf16.msra.mxu1 %v13098_v43  ;;  %v13166_v42 = vld [vmem:[%s14419_s21 + $0x14ac] ss:$20 sps:$4 sm:$0xff]  }
 0x3ce   : > { %8638 = vmatprep.subr.bf16.mxu0 %v13103_v12  ;;  %9171 = vmatprep.subr.bf16.mxu1 %v13106_v44  ;;  %v13161_v43 = vld [vmem:[%s14419_s21 + $0x14a0] ss:$20 sps:$4 sm:$0xff]   ;;  %v13164_v12 = vld [vmem:[%s14419_s21 + $0x14a8] ss:$20 sps:$4 sm:$0xff]  }
 0x3cf   : > { %v13169_v44 = vld [vmem:[%s14419_s21 + $0x14cc] ss:$20 sps:$4 sm:$0xff]  }
 0x3d1   : > { %8639 = vmatpush1.bf16.msra.mxu0 %v13101_v13  ;;  %9172 = vmatpush1.bf16.msra.mxu1 %v13104_v45  ;;  %v13172_v13 = vld [vmem:[%s14419_s21 + $0x14d4] ss:$20 sps:$4 sm:$0xff]  }
 0x3d2   : > { %8640 = vmatprep.subr.bf16.mxu0 %v13109_v49  ;;  %9173 = vmatprep.subr.bf16.mxu1 %v13112_v19  ;;  %v13167_v45 = vld [vmem:[%s14419_s21 + $0x14c8] ss:$20 sps:$4 sm:$0xff]   ;;  %v13170_v49 = vld [vmem:[%s14419_s21 + $0x14d0] ss:$20 sps:$4 sm:$0xff]  }
 0x3d3   : > { %v13175_v19 = vld [vmem:[%s14419_s21 + $0x14f4] ss:$20 sps:$4 sm:$0xff]  }
 0x3d5   : > { %8641 = vmatpush1.bf16.msra.mxu0 %v13107_v31  ;;  %9174 = vmatpush1.bf16.msra.mxu1 %v13110_v51  ;;  %v13178_v31 = vld [vmem:[%s14419_s21 + $0x14fc] ss:$20 sps:$4 sm:$0xff]  }
 0x3d6   : > { %8642 = vmatprep.subr.bf16.mxu0 %v13115_v52  ;;  %9175 = vmatprep.subr.bf16.mxu1 %v13118_v48  ;;  %v13173_v51 = vld [vmem:[%s14419_s21 + $0x14f0] ss:$20 sps:$4 sm:$0xff]   ;;  %v13176_v52 = vld [vmem:[%s14419_s21 + $0x14f8] ss:$20 sps:$4 sm:$0xff]  }
 0x3d7   : > { %v13181_v48 = vld [vmem:[%s14419_s21 + $0x151c] ss:$20 sps:$4 sm:$0xff]  }
 0x3d9   : > { %8643 = vmatpush1.bf16.msra.mxu0 %v13113_v54  ;;  %9176 = vmatpush1.bf16.msra.mxu1 %v13116_v61  ;;  %v13184_v54 = vld [vmem:[%s14419_s21 + $0x1524] ss:$20 sps:$4 sm:$0xff]  }
 0x3da   : > { %8644 = vmatprep.subr.bf16.mxu0 %v13121_v63  ;;  %9177 = vmatprep.subr.bf16.mxu1 %v13124_v60  ;;  %v13179_v61 = vld [vmem:[%s14419_s21 + $0x1518] ss:$20 sps:$4 sm:$0xff]   ;;  %v13182_v63 = vld [vmem:[%s14419_s21 + $0x1520] ss:$20 sps:$4 sm:$0xff]  }
 0x3db   : > { %v13187_v60 = vld [vmem:[%s14419_s21 + $0x1544] ss:$20 sps:$4 sm:$0xff]  }
 0x3dd   : > { %8645 = vmatpush1.bf16.msra.mxu0 %v13119_v1  ;;  %9178 = vmatpush1.bf16.msra.mxu1 %v13122_v3  ;;  %v13190_v1 = vld [vmem:[%s14419_s21 + $0x154c] ss:$20 sps:$4 sm:$0xff]  }
 0x3de   : > { %8646 = vmatprep.subr.bf16.mxu0 %v13127_v6  ;;  %9179 = vmatprep.subr.bf16.mxu1 %v13130_v8  ;;  %v13185_v3 = vld [vmem:[%s14419_s21 + $0x1540] ss:$20 sps:$4 sm:$0xff]   ;;  %v13188_v6 = vld [vmem:[%s14419_s21 + $0x1548] ss:$20 sps:$4 sm:$0xff]  }
 0x3df   : > { %v13193_v8 = vld [vmem:[%s14419_s21 + $0x156c] ss:$20 sps:$4 sm:$0xff]  }
 0x3e1   : > { %8647 = vmatpush1.bf16.msra.mxu0 %v13125_v10  ;;  %9180 = vmatpush1.bf16.msra.mxu1 %v13128_v11  ;;  %v13196_v10 = vld [vmem:[%s14419_s21 + $0x1574] ss:$20 sps:$4 sm:$0xff]  }
 0x3e2   : > { %8648 = vmatprep.subr.bf16.mxu0 %v13133_v14  ;;  %9181 = vmatprep.subr.bf16.mxu1 %v13136_v15  ;;  %v13191_v11 = vld [vmem:[%s14419_s21 + $0x1568] ss:$20 sps:$4 sm:$0xff]   ;;  %v13194_v14 = vld [vmem:[%s14419_s21 + $0x1570] ss:$20 sps:$4 sm:$0xff]  }
 0x3e3   : > { %v13199_v15 = vld [vmem:[%s14419_s21 + $0x1594] ss:$20 sps:$4 sm:$0xff]  }
 0x3e5   : > { %8649 = vmatpush1.bf16.msra.mxu0 %v13131_v17  ;;  %9182 = vmatpush1.bf16.msra.mxu1 %v13134_v55  ;;  %v13202_v17 = vld [vmem:[%s14419_s21 + $0x159c] ss:$20 sps:$4 sm:$0xff]  }
 0x3e6   : > { %8659 = vmatprep.subr.bf16.mxu0 %v13139_v26  ;;  %9192 = vmatprep.subr.bf16.mxu1 %v13142_v33  ;;  %v13197_v55 = vld [vmem:[%s14419_s21 + $0x1590] ss:$20 sps:$4 sm:$0xff]   ;;  %v13200_v26 = vld [vmem:[%s14419_s21 + $0x1598] ss:$20 sps:$4 sm:$0xff]  }
 0x3e7   : > { %v13205_v33 = vld [vmem:[%s14419_s21 + $0x15bc] ss:$20 sps:$4 sm:$0xff]  }
 0x3e8   : > { %8651 = vmatmul.mubr.bf16.vlgmr.msra.gmra.mrb[0].mxu0 %v15280_v47  ;;  %9184 = vmatmul.mubr.bf16.vlgmr.msra.gmra.mrb[0].mxu1 %v15280_v47 }
 0x3e9   : > { %8660 = vmatpush1.bf16.msra.mxu0 %v13137_v56  ;;  %9193 = vmatpush1.bf16.msra.mxu1 %v13140_v21  ;;  %v13203_v56 = vld [vmem:[%s14419_s21 + $0x15b8] ss:$20 sps:$4 sm:$0xff]   ;;  %v13206_v21 = vld [vmem:[%s14419_s21 + $0x15c0] ss:$20 sps:$4 sm:$0xff]  }
 0x3ea   : > { %8661 = vmatprep.subr.bf16.mxu0 %v13145_v22  ;;  %9194 = vmatprep.subr.bf16.mxu1 %v13148_v23  ;;  %v13211_v22 = vld [vmem:[%s14419_s21 + $0x15e4] ss:$20 sps:$4 sm:$0xff]   ;;  %v13214_v23 = vld [vmem:[%s14419_s21 + $0x15ec] ss:$20 sps:$4 sm:$0xff]  }
 0x3eb   : > { %8691 = vmatprep.mubr.bf16.mxu0 %v15287_v59  ;;  %9224 = vmatprep.mubr.bf16.mxu1 %v15287_v59 }
 0x3ed   : > { %8662 = vmatpush1.bf16.msra.mxu0 %v13143_v24  ;;  %9195 = vmatpush1.bf16.msra.mxu1 %v13146_v25  ;;  %v13209_v24 = vld [vmem:[%s14419_s21 + $0x15e0] ss:$20 sps:$4 sm:$0xff]   ;;  %v13212_v25 = vld [vmem:[%s14419_s21 + $0x15e8] ss:$20 sps:$4 sm:$0xff]  }
 0x3ee   : > { %8663 = vmatprep.subr.bf16.mxu0 %v13151_v27  ;;  %9196 = vmatprep.subr.bf16.mxu1 %v13154_v29  ;;  %v13217_v27 = vld [vmem:[%s14419_s21 + $0x160c] ss:$20 sps:$4 sm:$0xff]   ;;  %v13220_v29 = vld [vmem:[%s14419_s21 + $0x1614] ss:$20 sps:$4 sm:$0xff]  }
 0x3f1   : > { %8664 = vmatpush1.bf16.msra.mxu0 %v13149_v30  ;;  %9197 = vmatpush1.bf16.msra.mxu1 %v13152_v34  ;;  %v13215_v30 = vld [vmem:[%s14419_s21 + $0x1608] ss:$20 sps:$4 sm:$0xff]   ;;  %v13218_v34 = vld [vmem:[%s14419_s21 + $0x1610] ss:$20 sps:$4 sm:$0xff]  }
 0x3f2   : > { %8665 = vmatprep.subr.bf16.mxu0 %v13157_v35  ;;  %9198 = vmatprep.subr.bf16.mxu1 %v13160_v36  ;;  %v13223_v35 = vld [vmem:[%s14419_s21 + $0x1634] ss:$20 sps:$4 sm:$0xff]   ;;  %v13226_v36 = vld [vmem:[%s14419_s21 + $0x163c] ss:$20 sps:$4 sm:$0xff]  }
 0x3f5   : > { %8666 = vmatpush1.bf16.msra.mxu0 %v13155_v37  ;;  %9199 = vmatpush1.bf16.msra.mxu1 %v13158_v38  ;;  %v13221_v37 = vld [vmem:[%s14419_s21 + $0x1630] ss:$20 sps:$4 sm:$0xff]   ;;  %v13224_v38 = vld [vmem:[%s14419_s21 + $0x1638] ss:$20 sps:$4 sm:$0xff]  }
 0x3f6   : > { %8667 = vmatprep.subr.bf16.mxu0 %v13163_v41  ;;  %9200 = vmatprep.subr.bf16.mxu1 %v13166_v42  ;;  %v13229_v41 = vld [vmem:[%s14419_s21 + $0x165c] ss:$20 sps:$4 sm:$0xff]   ;;  %v13232_v42 = vld [vmem:[%s14419_s21 + $0x1664] ss:$20 sps:$4 sm:$0xff]  }
 0x3f9   : > { %8668 = vmatpush1.bf16.msra.mxu0 %v13161_v43  ;;  %9201 = vmatpush1.bf16.msra.mxu1 %v13164_v12  ;;  %v13227_v43 = vld [vmem:[%s14419_s21 + $0x1658] ss:$20 sps:$4 sm:$0xff]   ;;  %v13230_v12 = vld [vmem:[%s14419_s21 + $0x1660] ss:$20 sps:$4 sm:$0xff]  }
 0x3fa   : > { %8669 = vmatprep.subr.bf16.mxu0 %v13169_v44  ;;  %9202 = vmatprep.subr.bf16.mxu1 %v13172_v13  ;;  %v13235_v44 = vld [vmem:[%s14419_s21 + $0x1684] ss:$20 sps:$4 sm:$0xff]   ;;  %v13238_v13 = vld [vmem:[%s14419_s21 + $0x168c] ss:$20 sps:$4 sm:$0xff]  }
 0x3fd   : > { %8670 = vmatpush1.bf16.msra.mxu0 %v13167_v45  ;;  %9203 = vmatpush1.bf16.msra.mxu1 %v13170_v49  ;;  %v15355_v45 = vrot.slane %v15266_v9, %v14697_v2  ;;  %v13233_v49 = vld [vmem:[%s14419_s21 + $0x1680] ss:$20 sps:$4 sm:$0xff]   ;;  %v13239_v9 = vld [vmem:[%s14419_s21 + $0x16a8] ss:$20 sps:$4 sm:$0xff]  }
 0x3fe   : > { %8671 = vmatprep.subr.bf16.mxu0 %v13175_v19  ;;  %9204 = vmatprep.subr.bf16.mxu1 %v13178_v31  ;;  %v13236_v19 = vld [vmem:[%s14419_s21 + $0x1688] ss:$20 sps:$4 sm:$0xff]   ;;  %v13241_v31 = vld [vmem:[%s14419_s21 + $0x16ac] ss:$20 sps:$4 sm:$0xff]  }
 0x401   : > { %8672 = vmatpush1.bf16.msra.mxu0 %v13173_v51  ;;  %9205 = vmatpush1.bf16.msra.mxu1 %v13176_v52  ;;  %v13244_v51 = vld [vmem:[%s14419_s21 + $0x16b4] ss:$20 sps:$4 sm:$0xff]   ;;  %v15363_v52 = vcombine.high %v15287_v59, %v15287_v59 }
 0x402   : > { %8673 = vmatprep.subr.bf16.mxu0 %v13181_v48  ;;  %9206 = vmatprep.subr.bf16.mxu1 %v13184_v54  ;;  %v13242_v48 = vld [vmem:[%s14419_s21 + $0x16b0] ss:$20 sps:$4 sm:$0xff]   ;;  %v13247_v54 = vld [vmem:[%s14419_s21 + $0x16d4] ss:$20 sps:$4 sm:$0xff]  }
 0x405   : > { %8674 = vmatpush1.bf16.msra.mxu0 %v13179_v61  ;;  %9207 = vmatpush1.bf16.msra.mxu1 %v13182_v63  ;;  %v13250_v61 = vld [vmem:[%s14419_s21 + $0x16dc] ss:$20 sps:$4 sm:$0xff]  }
 0x406   : > { %8675 = vmatprep.subr.bf16.mxu0 %v13187_v60  ;;  %9208 = vmatprep.subr.bf16.mxu1 %v13190_v1  ;;  %v13245_v63 = vld [vmem:[%s14419_s21 + $0x16d0] ss:$20 sps:$4 sm:$0xff]   ;;  %v13248_v60 = vld [vmem:[%s14419_s21 + $0x16d8] ss:$20 sps:$4 sm:$0xff]  }
 0x407   : > { %v13253_v1 = vld [vmem:[%s14419_s21 + $0x16fc] ss:$20 sps:$4 sm:$0xff]  }
 0x409   : > { %8676 = vmatpush1.bf16.msra.mxu0 %v13185_v3  ;;  %9209 = vmatpush1.bf16.msra.mxu1 %v13188_v6  ;;  %v13256_v3 = vld [vmem:[%s14419_s21 + $0x1704] ss:$20 sps:$4 sm:$0xff]  }
 0x40a   : > { %8677 = vmatprep.subr.bf16.mxu0 %v13193_v8  ;;  %9210 = vmatprep.subr.bf16.mxu1 %v13196_v10  ;;  %v13251_v6 = vld [vmem:[%s14419_s21 + $0x16f8] ss:$20 sps:$4 sm:$0xff]   ;;  %v13254_v8 = vld [vmem:[%s14419_s21 + $0x1700] ss:$20 sps:$4 sm:$0xff]  }
 0x40b   : > { %v13259_v10 = vld [vmem:[%s14419_s21 + $0x1724] ss:$20 sps:$4 sm:$0xff]  }
 0x40d   : > { %8678 = vmatpush1.bf16.msra.mxu0 %v13191_v11  ;;  %9211 = vmatpush1.bf16.msra.mxu1 %v13194_v14  ;;  %v13262_v11 = vld [vmem:[%s14419_s21 + $0x172c] ss:$20 sps:$4 sm:$0xff]  }
 0x40e   : > { %8679 = vmatprep.subr.bf16.mxu0 %v13199_v15  ;;  %9212 = vmatprep.subr.bf16.mxu1 %v13202_v17  ;;  %v13257_v14 = vld [vmem:[%s14419_s21 + $0x1720] ss:$20 sps:$4 sm:$0xff]   ;;  %v13260_v15 = vld [vmem:[%s14419_s21 + $0x1728] ss:$20 sps:$4 sm:$0xff]  }
 0x40f   : > { %v13265_v17 = vld [vmem:[%s14419_s21 + $0x174c] ss:$20 sps:$4 sm:$0xff]  }
 0x411   : > { %8680 = vmatpush1.bf16.msra.mxu0 %v13197_v55  ;;  %9213 = vmatpush1.bf16.msra.mxu1 %v13200_v26  ;;  %v13268_v55 = vld [vmem:[%s14419_s21 + $0x1754] ss:$20 sps:$4 sm:$0xff]  }
 0x412   : > { %8681 = vmatprep.subr.bf16.mxu0 %v13205_v33  ;;  %9214 = vmatprep.subr.bf16.mxu1 %v13208_v57  ;;  %v13263_v26 = vld [vmem:[%s14419_s21 + $0x1748] ss:$20 sps:$4 sm:$0xff]   ;;  %v13266_v33 = vld [vmem:[%s14419_s21 + $0x1750] ss:$20 sps:$4 sm:$0xff]  }
 0x413   : > { %v13271_v57 = vld [vmem:[%s14419_s21 + $0x1774] ss:$20 sps:$4 sm:$0xff]  }
 0x415   : > { %8682 = vmatpush1.bf16.msra.mxu0 %v13203_v56  ;;  %9215 = vmatpush1.bf16.msra.mxu1 %v13206_v21  ;;  %v13274_v56 = vld [vmem:[%s14419_s21 + $0x177c] ss:$20 sps:$4 sm:$0xff]  }
 0x416   : > { %8683 = vmatprep.subr.bf16.mxu0 %v13211_v22  ;;  %9216 = vmatprep.subr.bf16.mxu1 %v13214_v23  ;;  %v13269_v21 = vld [vmem:[%s14419_s21 + $0x1770] ss:$20 sps:$4 sm:$0xff]   ;;  %v13272_v22 = vld [vmem:[%s14419_s21 + $0x1778] ss:$20 sps:$4 sm:$0xff]  }
 0x417   : > { %v13277_v23 = vld [vmem:[%s14419_s21 + $0x179c] ss:$20 sps:$4 sm:$0xff]  }
 0x419   : > { %8684 = vmatpush1.bf16.msra.mxu0 %v13209_v24  ;;  %9217 = vmatpush1.bf16.msra.mxu1 %v13212_v25  ;;  %v13280_v24 = vld [vmem:[%s14419_s21 + $0x17a4] ss:$20 sps:$4 sm:$0xff]  }
 0x41a   : > { %8685 = vmatprep.subr.bf16.mxu0 %v13217_v27  ;;  %9218 = vmatprep.subr.bf16.mxu1 %v13220_v29  ;;  %v13275_v25 = vld [vmem:[%s14419_s21 + $0x1798] ss:$20 sps:$4 sm:$0xff]   ;;  %v13278_v27 = vld [vmem:[%s14419_s21 + $0x17a0] ss:$20 sps:$4 sm:$0xff]  }
 0x41b   : > { %v13283_v29 = vld [vmem:[%s14419_s21 + $0x17c4] ss:$20 sps:$4 sm:$0xff]  }
 0x41d   : > { %8686 = vmatpush1.bf16.msra.mxu0 %v13215_v30  ;;  %9219 = vmatpush1.bf16.msra.mxu1 %v13218_v34  ;;  %v13286_v30 = vld [vmem:[%s14419_s21 + $0x17cc] ss:$20 sps:$4 sm:$0xff]  }
 0x41e   : > { %8687 = vmatprep.subr.bf16.mxu0 %v13223_v35  ;;  %9220 = vmatprep.subr.bf16.mxu1 %v13226_v36  ;;  %v13281_v34 = vld [vmem:[%s14419_s21 + $0x17c0] ss:$20 sps:$4 sm:$0xff]   ;;  %v13284_v35 = vld [vmem:[%s14419_s21 + $0x17c8] ss:$20 sps:$4 sm:$0xff]  }
 0x41f   : > { %v13289_v36 = vld [vmem:[%s14419_s21 + $0x17ec] ss:$20 sps:$4 sm:$0xff]  }
 0x421   : > { %8688 = vmatpush1.bf16.msra.mxu0 %v13221_v37  ;;  %9221 = vmatpush1.bf16.msra.mxu1 %v13224_v38  ;;  %v13292_v37 = vld [vmem:[%s14419_s21 + $0x17f4] ss:$20 sps:$4 sm:$0xff]  }
 0x422   : > { %8689 = vmatprep.subr.bf16.mxu0 %v13229_v41  ;;  %9222 = vmatprep.subr.bf16.mxu1 %v13232_v42  ;;  %v13287_v38 = vld [vmem:[%s14419_s21 + $0x17e8] ss:$20 sps:$4 sm:$0xff]   ;;  %v13290_v41 = vld [vmem:[%s14419_s21 + $0x17f0] ss:$20 sps:$4 sm:$0xff]  }
 0x423   : > { %v13295_v42 = vld [vmem:[%s14419_s21 + $0x1814] ss:$20 sps:$4 sm:$0xff]  }
 0x425   : > { %8690 = vmatpush1.bf16.msra.mxu0 %v13227_v43  ;;  %9223 = vmatpush1.bf16.msra.mxu1 %v13230_v12  ;;  %v13298_v43 = vld [vmem:[%s14419_s21 + $0x181c] ss:$20 sps:$4 sm:$0xff]  }
 0x426   : > { %8700 = vmatprep.subr.bf16.mxu0 %v13235_v44  ;;  %9233 = vmatprep.subr.bf16.mxu1 %v13238_v13  ;;  %v13293_v12 = vld [vmem:[%s14419_s21 + $0x1810] ss:$20 sps:$4 sm:$0xff]   ;;  %v13296_v44 = vld [vmem:[%s14419_s21 + $0x1818] ss:$20 sps:$4 sm:$0xff]  }
 0x427   : > { %v13301_v13 = vld [vmem:[%s14419_s21 + $0x183c] ss:$20 sps:$4 sm:$0xff]  }
 0x428   : > { %8692 = vmatmul.mubr.bf16.vlgmr.msra.gmra.mrb[0].mxu0 %v15355_v45  ;;  %9225 = vmatmul.mubr.bf16.vlgmr.msra.gmra.mrb[0].mxu1 %v15355_v45 }
 0x429   : > { %8701 = vmatpush1.bf16.msra.mxu0 %v13233_v49  ;;  %9234 = vmatpush1.bf16.msra.mxu1 %v13236_v19  ;;  %v13304_v49 = vld [vmem:[%s14419_s21 + $0x1844] ss:$20 sps:$4 sm:$0xff]  }
 0x42a   : > { %8702 = vmatprep.subr.bf16.mxu0 %v13241_v31  ;;  %9235 = vmatprep.subr.bf16.mxu1 %v13244_v51  ;;  %v13299_v19 = vld [vmem:[%s14419_s21 + $0x1838] ss:$20 sps:$4 sm:$0xff]   ;;  %v13302_v31 = vld [vmem:[%s14419_s21 + $0x1840] ss:$20 sps:$4 sm:$0xff]  }
 0x42b   : > { %8732 = vmatprep.mubr.bf16.mxu0 %v15363_v52  ;;  %9265 = vmatprep.mubr.bf16.mxu1 %v15363_v52  ;;  %v13307_v51 = vld [vmem:[%s14419_s21 + $0x1864] ss:$20 sps:$4 sm:$0xff]  }
 0x42d   : > { %8703 = vmatpush1.bf16.msra.mxu0 %v13239_v9  ;;  %9236 = vmatpush1.bf16.msra.mxu1 %v13242_v48  ;;  %v13310_v9 = vld [vmem:[%s14419_s21 + $0x186c] ss:$20 sps:$4 sm:$0xff]  }
 0x42e   : > { %8704 = vmatprep.subr.bf16.mxu0 %v13247_v54  ;;  %9237 = vmatprep.subr.bf16.mxu1 %v13250_v61  ;;  %v13305_v48 = vld [vmem:[%s14419_s21 + $0x1860] ss:$20 sps:$4 sm:$0xff]   ;;  %v13308_v54 = vld [vmem:[%s14419_s21 + $0x1868] ss:$20 sps:$4 sm:$0xff]  }
 0x42f   : > { %v13313_v61 = vld [vmem:[%s14419_s21 + $0x188c] ss:$20 sps:$4 sm:$0xff]  }
 0x431   : > { %8705 = vmatpush1.bf16.msra.mxu0 %v13245_v63  ;;  %9238 = vmatpush1.bf16.msra.mxu1 %v13248_v60  ;;  %v13316_v63 = vld [vmem:[%s14419_s21 + $0x1894] ss:$20 sps:$4 sm:$0xff]  }
 0x432   : > { %8706 = vmatprep.subr.bf16.mxu0 %v13253_v1  ;;  %9239 = vmatprep.subr.bf16.mxu1 %v13256_v3  ;;  %v13311_v60 = vld [vmem:[%s14419_s21 + $0x1888] ss:$20 sps:$4 sm:$0xff]   ;;  %v13314_v1 = vld [vmem:[%s14419_s21 + $0x1890] ss:$20 sps:$4 sm:$0xff]  }
 0x433   : > { %v13319_v3 = vld [vmem:[%s14419_s21 + $0x18b4] ss:$20 sps:$4 sm:$0xff]  }
 0x435   : > { %8707 = vmatpush1.bf16.msra.mxu0 %v13251_v6  ;;  %9240 = vmatpush1.bf16.msra.mxu1 %v13254_v8  ;;  %v13322_v6 = vld [vmem:[%s14419_s21 + $0x18bc] ss:$20 sps:$4 sm:$0xff]  }
 0x436   : > { %8708 = vmatprep.subr.bf16.mxu0 %v13259_v10  ;;  %9241 = vmatprep.subr.bf16.mxu1 %v13262_v11  ;;  %v13811_v8 = vld [vmem:[#allocation2 + $0x10] sm:$0xff] }
 0x437   : > { %v3017_v10 = vcombine.high %v13811_v8, %v13811_v8  ;;  %v13317_v11 = vld [vmem:[%s14419_s21 + $0x18b0] ss:$20 sps:$4 sm:$0xff]   ;;  %v13374_v8 = vld [vmem:[%s14419_s21 + $0x1a20] ss:$20 sps:$4 sm:$0xff]  }
 0x439   : > { %8709 = vmatpush1.bf16.msra.mxu0 %v13257_v14  ;;  %9242 = vmatpush1.bf16.msra.mxu1 %v13260_v15  ;;  %v13320_v14 = vld [vmem:[%s14419_s21 + $0x18b8] ss:$20 sps:$4 sm:$0xff]   ;;  %v13325_v15 = vld [vmem:[%s14419_s21 + $0x18dc] ss:$20 sps:$4 sm:$0xff]  }
 0x43a   : > { %8710 = vmatprep.subr.bf16.mxu0 %v13265_v17  ;;  %9243 = vmatprep.subr.bf16.mxu1 %v13268_v55  ;;  %v13328_v17 = vld [vmem:[%s14419_s21 + $0x18e4] ss:$20 sps:$4 sm:$0xff]   ;;  %v15426_v55 = vrot.slane %v3017_v10, %v14697_v2 }
 0x43b   : > { %v13379_v10 = vld [vmem:[%s14419_s21 + $0x1a44] ss:$20 sps:$4 sm:$0xff]  }
 0x43d   : > { %8711 = vmatpush1.bf16.msra.mxu0 %v13263_v26  ;;  %9244 = vmatpush1.bf16.msra.mxu1 %v13266_v33  ;;  %v13323_v26 = vld [vmem:[%s14419_s21 + $0x18d8] ss:$20 sps:$4 sm:$0xff]   ;;  %v13326_v33 = vld [vmem:[%s14419_s21 + $0x18e0] ss:$20 sps:$4 sm:$0xff]  }
 0x43e   : > { %8712 = vmatprep.subr.bf16.mxu0 %v13271_v57  ;;  %9245 = vmatprep.subr.bf16.mxu1 %v13274_v56  ;;  %v13331_v57 = vld [vmem:[%s14419_s21 + $0x1904] ss:$20 sps:$4 sm:$0xff]   ;;  %v13334_v56 = vld [vmem:[%s14419_s21 + $0x190c] ss:$20 sps:$4 sm:$0xff]  }
 0x441   : > { %8713 = vmatpush1.bf16.msra.mxu0 %v13269_v21  ;;  %9246 = vmatpush1.bf16.msra.mxu1 %v13272_v22  ;;  %v3033_v21 = vcombine.high %v15426_v55, %v15426_v55  ;;  %v15436_v22 = vcombine.high %v15355_v45, %v15355_v45 }
 0x442   : > { %8714 = vmatprep.subr.bf16.mxu0 %v13277_v23  ;;  %9247 = vmatprep.subr.bf16.mxu1 %v13280_v24  ;;  %v13329_v23 = vld [vmem:[%s14419_s21 + $0x1900] ss:$20 sps:$4 sm:$0xff]   ;;  %v13332_v24 = vld [vmem:[%s14419_s21 + $0x1908] ss:$20 sps:$4 sm:$0xff]  }
 0x445   : > { %8715 = vmatpush1.bf16.msra.mxu0 %v13275_v25  ;;  %9248 = vmatpush1.bf16.msra.mxu1 %v13278_v27  ;;  %v13337_v25 = vld [vmem:[%s14419_s21 + $0x192c] ss:$20 sps:$4 sm:$0xff]   ;;  %v13340_v27 = vld [vmem:[%s14419_s21 + $0x1934] ss:$20 sps:$4 sm:$0xff]  }
 0x446   : > { %8716 = vmatprep.subr.bf16.mxu0 %v13283_v29  ;;  %9249 = vmatprep.subr.bf16.mxu1 %v13286_v30  ;;  %v15443_v29 = vrot.slane %v3033_v21, %v14697_v2  ;;  %v13335_v30 = vld [vmem:[%s14419_s21 + $0x1928] ss:$20 sps:$4 sm:$0xff]  }
 0x447   : > { %v13394_v21 = vld [vmem:[%s14419_s21 + $0x1a9c] ss:$20 sps:$4 sm:$0xff]  }
 0x449   : > { %8717 = vmatpush1.bf16.msra.mxu0 %v13281_v34  ;;  %9250 = vmatpush1.bf16.msra.mxu1 %v13284_v35  ;;  %v13338_v34 = vld [vmem:[%s14419_s21 + $0x1930] ss:$20 sps:$4 sm:$0xff]   ;;  %v13343_v35 = vld [vmem:[%s14419_s21 + $0x1954] ss:$20 sps:$4 sm:$0xff]  }
 0x44a   : > { %8718 = vmatprep.subr.bf16.mxu0 %v13289_v36  ;;  %9251 = vmatprep.subr.bf16.mxu1 %v13292_v37  ;;  %v13346_v36 = vld [vmem:[%s14419_s21 + $0x195c] ss:$20 sps:$4 sm:$0xff]  }
 0x44b   : > { %v13341_v37 = vld [vmem:[%s14419_s21 + $0x1950] ss:$20 sps:$4 sm:$0xff]  }
 0x44d   : > { %8719 = vmatpush1.bf16.msra.mxu0 %v13287_v38  ;;  %9252 = vmatpush1.bf16.msra.mxu1 %v13290_v41  ;;  %v13344_v38 = vld [vmem:[%s14419_s21 + $0x1958] ss:$20 sps:$4 sm:$0xff]   ;;  %v13349_v41 = vld [vmem:[%s14419_s21 + $0x197c] ss:$20 sps:$4 sm:$0xff]  }
 0x44e   : > { %8720 = vmatprep.subr.bf16.mxu0 %v13295_v42  ;;  %9253 = vmatprep.subr.bf16.mxu1 %v13298_v43  ;;  %v13352_v42 = vld [vmem:[%s14419_s21 + $0x1984] ss:$20 sps:$4 sm:$0xff]  }
 0x44f   : > { %v13347_v43 = vld [vmem:[%s14419_s21 + $0x1978] ss:$20 sps:$4 sm:$0xff]  }
 0x451   : > { %8721 = vmatpush1.bf16.msra.mxu0 %v13293_v12  ;;  %9254 = vmatpush1.bf16.msra.mxu1 %v13296_v44  ;;  %v13350_v12 = vld [vmem:[%s14419_s21 + $0x1980] ss:$20 sps:$4 sm:$0xff]   ;;  %v13355_v44 = vld [vmem:[%s14419_s21 + $0x19a4] ss:$20 sps:$4 sm:$0xff]  }
 0x452   : > { %8722 = vmatprep.subr.bf16.mxu0 %v13301_v13  ;;  %9255 = vmatprep.subr.bf16.mxu1 %v13304_v49  ;;  %v13358_v13 = vld [vmem:[%s14419_s21 + $0x19ac] ss:$20 sps:$4 sm:$0xff]  }
 0x453   : > { %v13353_v49 = vld [vmem:[%s14419_s21 + $0x19a0] ss:$20 sps:$4 sm:$0xff]  }
 0x455   : > { %8723 = vmatpush1.bf16.msra.mxu0 %v13299_v19  ;;  %9256 = vmatpush1.bf16.msra.mxu1 %v13302_v31  ;;  %v13356_v19 = vld [vmem:[%s14419_s21 + $0x19a8] ss:$20 sps:$4 sm:$0xff]   ;;  %v13361_v31 = vld [vmem:[%s14419_s21 + $0x19cc] ss:$20 sps:$4 sm:$0xff]  }
 0x456   : > { %8724 = vmatprep.subr.bf16.mxu0 %v13307_v51  ;;  %9257 = vmatprep.subr.bf16.mxu1 %v13310_v9  ;;  %v13364_v51 = vld [vmem:[%s14419_s21 + $0x19d4] ss:$20 sps:$4 sm:$0xff]  }
 0x457   : > { %v13359_v9 = vld [vmem:[%s14419_s21 + $0x19c8] ss:$20 sps:$4 sm:$0xff]  }
 0x459   : > { %8725 = vmatpush1.bf16.msra.mxu0 %v13305_v48  ;;  %9258 = vmatpush1.bf16.msra.mxu1 %v13308_v54  ;;  %v13362_v48 = vld [vmem:[%s14419_s21 + $0x19d0] ss:$20 sps:$4 sm:$0xff]   ;;  %v13367_v54 = vld [vmem:[%s14419_s21 + $0x19f4] ss:$20 sps:$4 sm:$0xff]  }
 0x45a   : > { %8726 = vmatprep.subr.bf16.mxu0 %v13313_v61  ;;  %9259 = vmatprep.subr.bf16.mxu1 %v13316_v63  ;;  %v13370_v61 = vld [vmem:[%s14419_s21 + $0x19fc] ss:$20 sps:$4 sm:$0xff]  }
 0x45b   : > { %v13365_v63 = vld [vmem:[%s14419_s21 + $0x19f0] ss:$20 sps:$4 sm:$0xff]  }
 0x45d   : > { %8727 = vmatpush1.bf16.msra.mxu0 %v13311_v60  ;;  %9260 = vmatpush1.bf16.msra.mxu1 %v13314_v1  ;;  %v13368_v60 = vld [vmem:[%s14419_s21 + $0x19f8] ss:$20 sps:$4 sm:$0xff]   ;;  %v13373_v1 = vld [vmem:[%s14419_s21 + $0x1a1c] ss:$20 sps:$4 sm:$0xff]  }
 0x45e   : > { %8728 = vmatprep.subr.bf16.mxu0 %v13319_v3  ;;  %9261 = vmatprep.subr.bf16.mxu1 %v13322_v6  ;;  %v13376_v3 = vld [vmem:[%s14419_s21 + $0x1a24] ss:$20 sps:$4 sm:$0xff]  }
 0x45f   : > { %v13371_v6 = vld [vmem:[%s14419_s21 + $0x1a18] ss:$20 sps:$4 sm:$0xff]  }
 0x461   : > { %8729 = vmatpush1.bf16.msra.mxu0 %v13317_v11  ;;  %9262 = vmatpush1.bf16.msra.mxu1 %v13320_v14  ;;  %v13382_v11 = vld [vmem:[%s14419_s21 + $0x1a4c] ss:$20 sps:$4 sm:$0xff]  }
 0x462   : > { %8730 = vmatprep.subr.bf16.mxu0 %v13325_v15  ;;  %9263 = vmatprep.subr.bf16.mxu1 %v13328_v17  ;;  %v13377_v14 = vld [vmem:[%s14419_s21 + $0x1a40] ss:$20 sps:$4 sm:$0xff]   ;;  %v13380_v15 = vld [vmem:[%s14419_s21 + $0x1a48] ss:$20 sps:$4 sm:$0xff]  }
 0x463   : > { %v13385_v17 = vld [vmem:[%s14419_s21 + $0x1a6c] ss:$20 sps:$4 sm:$0xff]  }
 0x465   : > { %8731 = vmatpush1.bf16.msra.mxu0 %v13323_v26  ;;  %9264 = vmatpush1.bf16.msra.mxu1 %v13326_v33  ;;  %v13388_v26 = vld [vmem:[%s14419_s21 + $0x1a74] ss:$20 sps:$4 sm:$0xff]  }
 0x466   : > { %8741 = vmatprep.subr.bf16.mxu0 %v13331_v57  ;;  %9274 = vmatprep.subr.bf16.mxu1 %v13334_v56  ;;  %v13383_v33 = vld [vmem:[%s14419_s21 + $0x1a68] ss:$20 sps:$4 sm:$0xff]   ;;  %v13386_v57 = vld [vmem:[%s14419_s21 + $0x1a70] ss:$20 sps:$4 sm:$0xff]  }
 0x467   : > { %v13391_v56 = vld [vmem:[%s14419_s21 + $0x1a94] ss:$20 sps:$4 sm:$0xff]  }
 0x468   : > { %8733 = vmatmul.mubr.bf16.vlgmr.msra.gmra.mrb[0].mxu0 %v15436_v22  ;;  %9266 = vmatmul.mubr.bf16.vlgmr.msra.gmra.mrb[0].mxu1 %v15436_v22 }
 0x469   : > { %8742 = vmatpush1.bf16.msra.mxu0 %v13329_v23  ;;  %9275 = vmatpush1.bf16.msra.mxu1 %v13332_v24  ;;  %v13389_v23 = vld [vmem:[%s14419_s21 + $0x1a90] ss:$20 sps:$4 sm:$0xff]   ;;  %v13392_v24 = vld [vmem:[%s14419_s21 + $0x1a98] ss:$20 sps:$4 sm:$0xff]  }
 0x46a   : > { %8743 = vmatprep.subr.bf16.mxu0 %v13337_v25  ;;  %9276 = vmatprep.subr.bf16.mxu1 %v13340_v27  ;;  %v13397_v25 = vld [vmem:[%s14419_s21 + $0x1abc] ss:$20 sps:$4 sm:$0xff]   ;;  %v13400_v27 = vld [vmem:[%s14419_s21 + $0x1ac4] ss:$20 sps:$4 sm:$0xff]  }
 0x46b   : > { %8773 = vmatprep.mubr.bf16.mxu0 %v15443_v29  ;;  %9306 = vmatprep.mubr.bf16.mxu1 %v15443_v29 }
 0x46d   : > { %8744 = vmatpush1.bf16.msra.mxu0 %v13335_v30  ;;  %9277 = vmatpush1.bf16.msra.mxu1 %v13338_v34  ;;  %v13395_v30 = vld [vmem:[%s14419_s21 + $0x1ab8] ss:$20 sps:$4 sm:$0xff]   ;;  %v13398_v34 = vld [vmem:[%s14419_s21 + $0x1ac0] ss:$20 sps:$4 sm:$0xff]  }
 0x46e   : > { %8745 = vmatprep.subr.bf16.mxu0 %v13343_v35  ;;  %9278 = vmatprep.subr.bf16.mxu1 %v13346_v36  ;;  %v13403_v35 = vld [vmem:[%s14419_s21 + $0x1ae4] ss:$20 sps:$4 sm:$0xff]   ;;  %v13406_v36 = vld [vmem:[%s14419_s21 + $0x1aec] ss:$20 sps:$4 sm:$0xff]  }
 0x471   : > { %8746 = vmatpush1.bf16.msra.mxu0 %v13341_v37  ;;  %9279 = vmatpush1.bf16.msra.mxu1 %v13344_v38  ;;  %v13401_v37 = vld [vmem:[%s14419_s21 + $0x1ae0] ss:$20 sps:$4 sm:$0xff]   ;;  %v13404_v38 = vld [vmem:[%s14419_s21 + $0x1ae8] ss:$20 sps:$4 sm:$0xff]  }
 0x472   : > { %8747 = vmatprep.subr.bf16.mxu0 %v13349_v41  ;;  %9280 = vmatprep.subr.bf16.mxu1 %v13352_v42  ;;  %v13409_v41 = vld [vmem:[%s14419_s21 + $0x1b0c] ss:$20 sps:$4 sm:$0xff]   ;;  %v13412_v42 = vld [vmem:[%s14419_s21 + $0x1b14] ss:$20 sps:$4 sm:$0xff]  }
 0x475   : > { %8748 = vmatpush1.bf16.msra.mxu0 %v13347_v43  ;;  %9281 = vmatpush1.bf16.msra.mxu1 %v13350_v12  ;;  %v13407_v43 = vld [vmem:[%s14419_s21 + $0x1b08] ss:$20 sps:$4 sm:$0xff]   ;;  %v13410_v12 = vld [vmem:[%s14419_s21 + $0x1b10] ss:$20 sps:$4 sm:$0xff]  }
 0x476   : > { %8749 = vmatprep.subr.bf16.mxu0 %v13355_v44  ;;  %9282 = vmatprep.subr.bf16.mxu1 %v13358_v13  ;;  %v13415_v44 = vld [vmem:[%s14419_s21 + $0x1b34] ss:$20 sps:$4 sm:$0xff]   ;;  %v13418_v13 = vld [vmem:[%s14419_s21 + $0x1b3c] ss:$20 sps:$4 sm:$0xff]  }
 0x479   : > { %8750 = vmatpush1.bf16.msra.mxu0 %v13353_v49  ;;  %9283 = vmatpush1.bf16.msra.mxu1 %v13356_v19  ;;  %v13413_v49 = vld [vmem:[%s14419_s21 + $0x1b30] ss:$20 sps:$4 sm:$0xff]   ;;  %v13416_v19 = vld [vmem:[%s14419_s21 + $0x1b38] ss:$20 sps:$4 sm:$0xff]  }
 0x47a   : > { %8751 = vmatprep.subr.bf16.mxu0 %v13361_v31  ;;  %9284 = vmatprep.subr.bf16.mxu1 %v13364_v51  ;;  %v13421_v31 = vld [vmem:[%s14419_s21 + $0x1b5c] ss:$20 sps:$4 sm:$0xff]   ;;  %v13424_v51 = vld [vmem:[%s14419_s21 + $0x1b64] ss:$20 sps:$4 sm:$0xff]  }
 0x47d   : > { %8752 = vmatpush1.bf16.msra.mxu0 %v13359_v9  ;;  %9285 = vmatpush1.bf16.msra.mxu1 %v13362_v48  ;;  %v13419_v9 = vld [vmem:[%s14419_s21 + $0x1b58] ss:$20 sps:$4 sm:$0xff]   ;;  %v13422_v48 = vld [vmem:[%s14419_s21 + $0x1b60] ss:$20 sps:$4 sm:$0xff]  }
 0x47e   : > { %8753 = vmatprep.subr.bf16.mxu0 %v13367_v54  ;;  %9286 = vmatprep.subr.bf16.mxu1 %v13370_v61  ;;  %v13428_v54 = vld [vmem:[%s14419_s21 + $0x1b84] ss:$20 sps:$4 sm:$0xff]   ;;  %v13431_v61 = vld [vmem:[%s14419_s21 + $0x1b8c] ss:$20 sps:$4 sm:$0xff]  }
 0x481   : > { %8754 = vmatpush1.bf16.msra.mxu0 %v13365_v63  ;;  %9287 = vmatpush1.bf16.msra.mxu1 %v13368_v60  ;;  %v13426_v63 = vld [vmem:[%s14419_s21 + $0x1b80] ss:$20 sps:$4 sm:$0xff]   ;;  %v13429_v60 = vld [vmem:[%s14419_s21 + $0x1b88] ss:$20 sps:$4 sm:$0xff]  }
 0x482   : > { %8755 = vmatprep.subr.bf16.mxu0 %v13373_v1  ;;  %9288 = vmatprep.subr.bf16.mxu1 %v13376_v3  ;;  %v15513_v1 = vrot.slane %v15426_v55, %v14697_v2  ;;  %v13434_v3 = vld [vmem:[%s14419_s21 + $0x1bac] ss:$20 sps:$4 sm:$0xff]   ;;  %v13432_v55 = vld [vmem:[%s14419_s21 + $0x1ba8] ss:$20 sps:$4 sm:$0xff]  }
 0x485   : > { %8756 = vmatpush1.bf16.msra.mxu0 %v13371_v6  ;;  %9289 = vmatpush1.bf16.msra.mxu1 %v13374_v8  ;;  %v13437_v6 = vld [vmem:[%s14419_s21 + $0x1bb4] ss:$20 sps:$4 sm:$0xff]   ;;  %v15519_v8 = vcombine.high %v15443_v29, %v15443_v29 }
 0x486   : > { %8757 = vmatprep.subr.bf16.mxu0 %v13379_v10  ;;  %9290 = vmatprep.subr.bf16.mxu1 %v13382_v11  ;;  %v13435_v10 = vld [vmem:[%s14419_s21 + $0x1bb0] ss:$20 sps:$4 sm:$0xff]   ;;  %v13440_v11 = vld [vmem:[%s14419_s21 + $0x1bd4] ss:$20 sps:$4 sm:$0xff]  }
 0x489   : > { %8758 = vmatpush1.bf16.msra.mxu0 %v13377_v14  ;;  %9291 = vmatpush1.bf16.msra.mxu1 %v13380_v15  ;;  %v13443_v14 = vld [vmem:[%s14419_s21 + $0x1bdc] ss:$20 sps:$4 sm:$0xff]  }
 0x48a   : > { %8759 = vmatprep.subr.bf16.mxu0 %v13385_v17  ;;  %9292 = vmatprep.subr.bf16.mxu1 %v13388_v26  ;;  %v13438_v15 = vld [vmem:[%s14419_s21 + $0x1bd0] ss:$20 sps:$4 sm:$0xff]   ;;  %v13441_v17 = vld [vmem:[%s14419_s21 + $0x1bd8] ss:$20 sps:$4 sm:$0xff]  }
 0x48b   : > { %v13446_v26 = vld [vmem:[%s14419_s21 + $0x1bfc] ss:$20 sps:$4 sm:$0xff]  }
 0x48d   : > { %8760 = vmatpush1.bf16.msra.mxu0 %v13383_v33  ;;  %9293 = vmatpush1.bf16.msra.mxu1 %v13386_v57  ;;  %v13449_v33 = vld [vmem:[%s14419_s21 + $0x1c04] ss:$20 sps:$4 sm:$0xff]  }
 0x48e   : > { %8761 = vmatprep.subr.bf16.mxu0 %v13391_v56  ;;  %9294 = vmatprep.subr.bf16.mxu1 %v13394_v21  ;;  %v13444_v57 = vld [vmem:[%s14419_s21 + $0x1bf8] ss:$20 sps:$4 sm:$0xff]   ;;  %v13447_v56 = vld [vmem:[%s14419_s21 + $0x1c00] ss:$20 sps:$4 sm:$0xff]  }
 0x48f   : > { %v13452_v21 = vld [vmem:[%s14419_s21 + $0x1c24] ss:$20 sps:$4 sm:$0xff]  }
 0x491   : > { %8762 = vmatpush1.bf16.msra.mxu0 %v13389_v23  ;;  %9295 = vmatpush1.bf16.msra.mxu1 %v13392_v24  ;;  %v13455_v23 = vld [vmem:[%s14419_s21 + $0x1c2c] ss:$20 sps:$4 sm:$0xff]  }
 0x492   : > { %8763 = vmatprep.subr.bf16.mxu0 %v13397_v25  ;;  %9296 = vmatprep.subr.bf16.mxu1 %v13400_v27  ;;  %v13450_v24 = vld [vmem:[%s14419_s21 + $0x1c20] ss:$20 sps:$4 sm:$0xff]   ;;  %v13453_v25 = vld [vmem:[%s14419_s21 + $0x1c28] ss:$20 sps:$4 sm:$0xff]  }
 0x493   : > { %v13458_v27 = vld [vmem:[%s14419_s21 + $0x1c4c] ss:$20 sps:$4 sm:$0xff]  }
 0x495   : > { %8764 = vmatpush1.bf16.msra.mxu0 %v13395_v30  ;;  %9297 = vmatpush1.bf16.msra.mxu1 %v13398_v34  ;;  %v13461_v30 = vld [vmem:[%s14419_s21 + $0x1c54] ss:$20 sps:$4 sm:$0xff]  }
 0x496   : > { %8765 = vmatprep.subr.bf16.mxu0 %v13403_v35  ;;  %9298 = vmatprep.subr.bf16.mxu1 %v13406_v36  ;;  %v13456_v34 = vld [vmem:[%s14419_s21 + $0x1c48] ss:$20 sps:$4 sm:$0xff]   ;;  %v13459_v35 = vld [vmem:[%s14419_s21 + $0x1c50] ss:$20 sps:$4 sm:$0xff]  }
 0x497   : > { %v13464_v36 = vld [vmem:[%s14419_s21 + $0x1c74] ss:$20 sps:$4 sm:$0xff]  }
 0x499   : > { %8766 = vmatpush1.bf16.msra.mxu0 %v13401_v37  ;;  %9299 = vmatpush1.bf16.msra.mxu1 %v13404_v38  ;;  %v13467_v37 = vld [vmem:[%s14419_s21 + $0x1c7c] ss:$20 sps:$4 sm:$0xff]  }
 0x49a   : > { %8767 = vmatprep.subr.bf16.mxu0 %v13409_v41  ;;  %9300 = vmatprep.subr.bf16.mxu1 %v13412_v42  ;;  %v13462_v38 = vld [vmem:[%s14419_s21 + $0x1c70] ss:$20 sps:$4 sm:$0xff]   ;;  %v13465_v41 = vld [vmem:[%s14419_s21 + $0x1c78] ss:$20 sps:$4 sm:$0xff]  }
 0x49b   : > { %v13470_v42 = vld [vmem:[%s14419_s21 + $0x1c9c] ss:$20 sps:$4 sm:$0xff]  }
 0x49d   : > { %8768 = vmatpush1.bf16.msra.mxu0 %v13407_v43  ;;  %9301 = vmatpush1.bf16.msra.mxu1 %v13410_v12  ;;  %v13473_v43 = vld [vmem:[%s14419_s21 + $0x1ca4] ss:$20 sps:$4 sm:$0xff]  }
 0x49e   : > { %8769 = vmatprep.subr.bf16.mxu0 %v13415_v44  ;;  %9302 = vmatprep.subr.bf16.mxu1 %v13418_v13  ;;  %v13468_v12 = vld [vmem:[%s14419_s21 + $0x1c98] ss:$20 sps:$4 sm:$0xff]   ;;  %v13471_v44 = vld [vmem:[%s14419_s21 + $0x1ca0] ss:$20 sps:$4 sm:$0xff]  }
 0x49f   : > { %v13476_v13 = vld [vmem:[%s14419_s21 + $0x1cc4] ss:$20 sps:$4 sm:$0xff]  }
 0x4a1   : > { %8770 = vmatpush1.bf16.msra.mxu0 %v13413_v49  ;;  %9303 = vmatpush1.bf16.msra.mxu1 %v13416_v19  ;;  %v13479_v49 = vld [vmem:[%s14419_s21 + $0x1ccc] ss:$20 sps:$4 sm:$0xff]  }
 0x4a2   : > { %8771 = vmatprep.subr.bf16.mxu0 %v13421_v31  ;;  %9304 = vmatprep.subr.bf16.mxu1 %v13424_v51  ;;  %v13474_v19 = vld [vmem:[%s14419_s21 + $0x1cc0] ss:$20 sps:$4 sm:$0xff]   ;;  %v13477_v31 = vld [vmem:[%s14419_s21 + $0x1cc8] ss:$20 sps:$4 sm:$0xff]  }
 0x4a3   : > { %v13482_v51 = vld [vmem:[%s14419_s21 + $0x1cec] ss:$20 sps:$4 sm:$0xff]  }
 0x4a5   : > { %8772 = vmatpush1.bf16.msra.mxu0 %v13419_v9  ;;  %9305 = vmatpush1.bf16.msra.mxu1 %v13422_v48  ;;  %v13485_v9 = vld [vmem:[%s14419_s21 + $0x1cf4] ss:$20 sps:$4 sm:$0xff]  }
 0x4a6   : > { %8782 = vmatprep.subr.bf16.mxu0 %v13428_v54  ;;  %9315 = vmatprep.subr.bf16.mxu1 %v13431_v61  ;;  %v13480_v48 = vld [vmem:[%s14419_s21 + $0x1ce8] ss:$20 sps:$4 sm:$0xff]   ;;  %v13483_v54 = vld [vmem:[%s14419_s21 + $0x1cf0] ss:$20 sps:$4 sm:$0xff]  }
 0x4a7   : > { %v13488_v61 = vld [vmem:[%s14419_s21 + $0x1d14] ss:$20 sps:$4 sm:$0xff]  }
 0x4a8   : > { %8774 = vmatmul.mubr.bf16.vlgmr.msra.gmra.mrb[0].mxu0 %v15513_v1  ;;  %9307 = vmatmul.mubr.bf16.vlgmr.msra.gmra.mrb[0].mxu1 %v15513_v1 }
 0x4a9   : > { %8783 = vmatpush1.bf16.msra.mxu0 %v13426_v63  ;;  %9316 = vmatpush1.bf16.msra.mxu1 %v13429_v60  ;;  %v13491_v63 = vld [vmem:[%s14419_s21 + $0x1d1c] ss:$20 sps:$4 sm:$0xff]  }
 0x4aa   : > { %8784 = vmatprep.subr.bf16.mxu0 %v13434_v3  ;;  %9317 = vmatprep.subr.bf16.mxu1 %v13437_v6  ;;  %v13486_v60 = vld [vmem:[%s14419_s21 + $0x1d10] ss:$20 sps:$4 sm:$0xff]   ;;  %v13489_v3 = vld [vmem:[%s14419_s21 + $0x1d18] ss:$20 sps:$4 sm:$0xff]  }
 0x4ab   : > { %8814 = vmatprep.mubr.bf16.mxu0 %v15519_v8  ;;  %9347 = vmatprep.mubr.bf16.mxu1 %v15519_v8  ;;  %v13494_v6 = vld [vmem:[%s14419_s21 + $0x1d3c] ss:$20 sps:$4 sm:$0xff]  }
 0x4ad   : > { %8785 = vmatpush1.bf16.msra.mxu0 %v13432_v55  ;;  %9318 = vmatpush1.bf16.msra.mxu1 %v13435_v10  ;;  %v13497_v55 = vld [vmem:[%s14419_s21 + $0x1d44] ss:$20 sps:$4 sm:$0xff]  }
 0x4ae   : > { %8786 = vmatprep.subr.bf16.mxu0 %v13440_v11  ;;  %9319 = vmatprep.subr.bf16.mxu1 %v13443_v14  ;;  %v13492_v10 = vld [vmem:[%s14419_s21 + $0x1d38] ss:$20 sps:$4 sm:$0xff]   ;;  %v13495_v11 = vld [vmem:[%s14419_s21 + $0x1d40] ss:$20 sps:$4 sm:$0xff]  }
 0x4af   : > { %v13500_v14 = vld [vmem:[%s14419_s21 + $0x1d64] ss:$20 sps:$4 sm:$0xff]  }
 0x4b1   : > { %8787 = vmatpush1.bf16.msra.mxu0 %v13438_v15  ;;  %9320 = vmatpush1.bf16.msra.mxu1 %v13441_v17  ;;  %v13503_v15 = vld [vmem:[%s14419_s21 + $0x1d6c] ss:$20 sps:$4 sm:$0xff]  }
 0x4b2   : > { %8788 = vmatprep.subr.bf16.mxu0 %v13446_v26  ;;  %9321 = vmatprep.subr.bf16.mxu1 %v13449_v33  ;;  %v13498_v17 = vld [vmem:[%s14419_s21 + $0x1d60] ss:$20 sps:$4 sm:$0xff]   ;;  %v13501_v26 = vld [vmem:[%s14419_s21 + $0x1d68] ss:$20 sps:$4 sm:$0xff]  }
 0x4b3   : > { %v13506_v33 = vld [vmem:[%s14419_s21 + $0x1d8c] ss:$20 sps:$4 sm:$0xff]  }
 0x4b5   : > { %8789 = vmatpush1.bf16.msra.mxu0 %v13444_v57  ;;  %9322 = vmatpush1.bf16.msra.mxu1 %v13447_v56  ;;  %v13509_v57 = vld [vmem:[%s14419_s21 + $0x1d94] ss:$20 sps:$4 sm:$0xff]  }
 0x4b6   : > { %8790 = vmatprep.subr.bf16.mxu0 %v13452_v21  ;;  %9323 = vmatprep.subr.bf16.mxu1 %v13455_v23  ;;  %v13504_v56 = vld [vmem:[%s14419_s21 + $0x1d88] ss:$20 sps:$4 sm:$0xff]   ;;  %v13507_v21 = vld [vmem:[%s14419_s21 + $0x1d90] ss:$20 sps:$4 sm:$0xff]  }
 0x4b7   : > { %v13512_v23 = vld [vmem:[%s14419_s21 + $0x1db4] ss:$20 sps:$4 sm:$0xff]  }
 0x4b9   : > { %8791 = vmatpush1.bf16.msra.mxu0 %v13450_v24  ;;  %9324 = vmatpush1.bf16.msra.mxu1 %v13453_v25  ;;  %v13515_v24 = vld [vmem:[%s14419_s21 + $0x1dbc] ss:$20 sps:$4 sm:$0xff]  }
 0x4ba   : > { %8792 = vmatprep.subr.bf16.mxu0 %v13458_v27  ;;  %9325 = vmatprep.subr.bf16.mxu1 %v13461_v30  ;;  %v13510_v25 = vld [vmem:[%s14419_s21 + $0x1db0] ss:$20 sps:$4 sm:$0xff]   ;;  %v13513_v27 = vld [vmem:[%s14419_s21 + $0x1db8] ss:$20 sps:$4 sm:$0xff]  }
 0x4bb   : > { %v13518_v30 = vld [vmem:[%s14419_s21 + $0x1ddc] ss:$20 sps:$4 sm:$0xff]  }
 0x4bd   : > { %8793 = vmatpush1.bf16.msra.mxu0 %v13456_v34  ;;  %9326 = vmatpush1.bf16.msra.mxu1 %v13459_v35  ;;  %v13521_v34 = vld [vmem:[%s14419_s21 + $0x1de4] ss:$20 sps:$4 sm:$0xff]  }
 0x4be   : > { %8794 = vmatprep.subr.bf16.mxu0 %v13464_v36  ;;  %9327 = vmatprep.subr.bf16.mxu1 %v13467_v37  ;;  %v13516_v35 = vld [vmem:[%s14419_s21 + $0x1dd8] ss:$20 sps:$4 sm:$0xff]   ;;  %v13519_v36 = vld [vmem:[%s14419_s21 + $0x1de0] ss:$20 sps:$4 sm:$0xff]  }
 0x4bf   : > { %v13524_v37 = vld [vmem:[%s14419_s21 + $0x1e04] ss:$20 sps:$4 sm:$0xff]  }
 0x4c1   : > { %8795 = vmatpush1.bf16.msra.mxu0 %v13462_v38  ;;  %9328 = vmatpush1.bf16.msra.mxu1 %v13465_v41  ;;  %v13527_v38 = vld [vmem:[%s14419_s21 + $0x1e0c] ss:$20 sps:$4 sm:$0xff]   ;;  %v15587_v41 = vcombine.high %v15513_v1, %v15513_v1 }
 0x4c2   : > { %8796 = vmatprep.subr.bf16.mxu0 %v13470_v42  ;;  %9329 = vmatprep.subr.bf16.mxu1 %v13473_v43  ;;  %v13522_v42 = vld [vmem:[%s14419_s21 + $0x1e00] ss:$20 sps:$4 sm:$0xff]   ;;  %v13525_v43 = vld [vmem:[%s14419_s21 + $0x1e08] ss:$20 sps:$4 sm:$0xff]  }
 0x4c5   : > { %8797 = vmatpush1.bf16.msra.mxu0 %v13468_v12  ;;  %9330 = vmatpush1.bf16.msra.mxu1 %v13471_v44  ;;  %v13530_v12 = vld [vmem:[%s14419_s21 + $0x1e2c] ss:$20 sps:$4 sm:$0xff]   ;;  %v13533_v44 = vld [vmem:[%s14419_s21 + $0x1e34] ss:$20 sps:$4 sm:$0xff]  }
 0x4c6   : > { %8798 = vmatprep.subr.bf16.mxu0 %v13476_v13  ;;  %9331 = vmatprep.subr.bf16.mxu1 %v13479_v49  ;;  %v13528_v13 = vld [vmem:[%s14419_s21 + $0x1e28] ss:$20 sps:$4 sm:$0xff]   ;;  %v13531_v49 = vld [vmem:[%s14419_s21 + $0x1e30] ss:$20 sps:$4 sm:$0xff]  }
 0x4c9   : > { %8799 = vmatpush1.bf16.msra.mxu0 %v13474_v19  ;;  %9332 = vmatpush1.bf16.msra.mxu1 %v13477_v31  ;;  %v13536_v19 = vld [vmem:[%s14419_s21 + $0x1e54] ss:$20 sps:$4 sm:$0xff]   ;;  %v13539_v31 = vld [vmem:[%s14419_s21 + $0x1e5c] ss:$20 sps:$4 sm:$0xff]  }
 0x4ca   : > { %8800 = vmatprep.subr.bf16.mxu0 %v13482_v51  ;;  %9333 = vmatprep.subr.bf16.mxu1 %v13485_v9  ;;  %v14104_v51 = vmov 0   ;;  %v13534_v9 = vld [vmem:[%s14419_s21 + $0x1e50] ss:$20 sps:$4 sm:$0xff]  }
 0x4cd   : > { %8801 = vmatpush1.bf16.msra.mxu0 %v13480_v48  ;;  %9334 = vmatpush1.bf16.msra.mxu1 %v13483_v54  ;;  %v13537_v48 = vld [vmem:[%s14419_s21 + $0x1e58] ss:$20 sps:$4 sm:$0xff]   ;;  %v13542_v54 = vld [vmem:[%s14419_s21 + $0x1e7c] ss:$20 sps:$4 sm:$0xff]  }
 0x4ce   : > { %8802 = vmatprep.subr.bf16.mxu0 %v13488_v61  ;;  %9335 = vmatprep.subr.bf16.mxu1 %v13491_v63  ;;  %v13545_v61 = vld [vmem:[%s14419_s21 + $0x1e84] ss:$20 sps:$4 sm:$0xff]  }
 0x4cf   : > { %v13540_v63 = vld [vmem:[%s14419_s21 + $0x1e78] ss:$20 sps:$4 sm:$0xff]  }
 0x4d1   : > { %8803 = vmatpush1.bf16.msra.mxu0 %v13486_v60  ;;  %9336 = vmatpush1.bf16.msra.mxu1 %v13489_v3  ;;  %v13543_v60 = vld [vmem:[%s14419_s21 + $0x1e80] ss:$20 sps:$4 sm:$0xff]   ;;  %v13548_v3 = vld [vmem:[%s14419_s21 + $0x1ea4] ss:$20 sps:$4 sm:$0xff]  }
 0x4d2   : > { %8804 = vmatprep.subr.bf16.mxu0 %v13494_v6  ;;  %9337 = vmatprep.subr.bf16.mxu1 %v13497_v55  ;;  %v13551_v6 = vld [vmem:[%s14419_s21 + $0x1eac] ss:$20 sps:$4 sm:$0xff]  }
 0x4d3   : > { %v13546_v55 = vld [vmem:[%s14419_s21 + $0x1ea0] ss:$20 sps:$4 sm:$0xff]  }
 0x4d5   : > { %8805 = vmatpush1.bf16.msra.mxu0 %v13492_v10  ;;  %9338 = vmatpush1.bf16.msra.mxu1 %v13495_v11  ;;  %v13549_v10 = vld [vmem:[%s14419_s21 + $0x1ea8] ss:$20 sps:$4 sm:$0xff]   ;;  %v13554_v11 = vld [vmem:[%s14419_s21 + $0x1ecc] ss:$20 sps:$4 sm:$0xff]  }
 0x4d6   : > { %8806 = vmatprep.subr.bf16.mxu0 %v13500_v14  ;;  %9339 = vmatprep.subr.bf16.mxu1 %v13503_v15  ;;  %v13557_v14 = vld [vmem:[%s14419_s21 + $0x1ed4] ss:$20 sps:$4 sm:$0xff]  }
 0x4d7   : > { %v13552_v15 = vld [vmem:[%s14419_s21 + $0x1ec8] ss:$20 sps:$4 sm:$0xff]  }
 0x4d9   : > { %8807 = vmatpush1.bf16.msra.mxu0 %v13498_v17  ;;  %9340 = vmatpush1.bf16.msra.mxu1 %v13501_v26  ;;  %v13555_v17 = vld [vmem:[%s14419_s21 + $0x1ed0] ss:$20 sps:$4 sm:$0xff]   ;;  %v13560_v26 = vld [vmem:[%s14419_s21 + $0x1ef4] ss:$20 sps:$4 sm:$0xff]  }
 0x4da   : > { %8808 = vmatprep.subr.bf16.mxu0 %v13506_v33  ;;  %9341 = vmatprep.subr.bf16.mxu1 %v13509_v57  ;;  %v13563_v33 = vld [vmem:[%s14419_s21 + $0x1efc] ss:$20 sps:$4 sm:$0xff]  }
 0x4db   : > { %v13558_v57 = vld [vmem:[%s14419_s21 + $0x1ef0] ss:$20 sps:$4 sm:$0xff]  }
 0x4dd   : > { %8809 = vmatpush1.bf16.msra.mxu0 %v13504_v56  ;;  %9342 = vmatpush1.bf16.msra.mxu1 %v13507_v21  ;;  %v13561_v56 = vld [vmem:[%s14419_s21 + $0x1ef8] ss:$20 sps:$4 sm:$0xff]   ;;  %v13566_v21 = vld [vmem:[%s14419_s21 + $0x1f1c] ss:$20 sps:$4 sm:$0xff]  }
 0x4de   : > { %8810 = vmatprep.subr.bf16.mxu0 %v13512_v23  ;;  %9343 = vmatprep.subr.bf16.mxu1 %v13515_v24  ;;  %v13569_v23 = vld [vmem:[%s14419_s21 + $0x1f24] ss:$20 sps:$4 sm:$0xff]  }
 0x4df   : > { %v13564_v24 = vld [vmem:[%s14419_s21 + $0x1f18] ss:$20 sps:$4 sm:$0xff]  }
 0x4e1   : > { %8811 = vmatpush1.bf16.msra.mxu0 %v13510_v25  ;;  %9344 = vmatpush1.bf16.msra.mxu1 %v13513_v27  ;;  %v13567_v25 = vld [vmem:[%s14419_s21 + $0x1f20] ss:$20 sps:$4 sm:$0xff]   ;;  %v10616_v27 = vld.sshfl [vmem:[#allocation2 + $0x18] sm:$0x1 pattern:$0x75316420] }
 0x4e2   : > { %8812 = vmatprep.subr.bf16.mxu0 %v13518_v30  ;;  %9345 = vmatprep.subr.bf16.mxu1 %v13521_v34  ;;  %v13570_v30 = vld [vmem:[%s14419_s21 + $0x150] ss:$20 sps:$4 sm:$0xff]  }
 0x4e3   : > { %v13571_v34 = vld [vmem:[%s14419_s21 + $0x3d0] ss:$20 sps:$4 sm:$0xff]  }
 0x4e5   : > { %8813 = vmatpush1.bf16.msra.mxu0 %v13516_v35  ;;  %9346 = vmatpush1.bf16.msra.mxu1 %v13519_v36  ;;  %v15624_v35 = vrot.slane %v10616_v27, %v14697_v2  ;;  %v13572_v36 = vld [vmem:[%s14419_s21 + $0x10] ss:$20 sps:$4 sm:$0xff]   ;;  %v13576_v2 = vld [vmem:[%s14419_s21 + $0x38] ss:$20 sps:$4 sm:$0xff]  }
 0x4e6   : > { %8823 = vmatprep.subr.bf16.mxu0 %v13524_v37  ;;  %9356 = vmatprep.subr.bf16.mxu1 %v13527_v38  ;;  %v13573_v37 = vld [vmem:[%s14419_s21 + $0x290] ss:$20 sps:$4 sm:$0xff]   ;;  %v13574_v38 = vld [vmem:[%s14419_s21 + $0x178] ss:$20 sps:$4 sm:$0xff]  }
 0x4e7   : > { %v13609_v27 = vld [vmem:[%s14419_s21 + $0x7b8] ss:$20 sps:$4 sm:$0xff]  }
 0x4e8   : > { %8815 = vmatmul.mubr.bf16.vlgmr.msra.gmra.mrb[0].mxu0 %v15587_v41  ;;  %9348 = vmatmul.mubr.bf16.vlgmr.msra.gmra.mrb[0].mxu1 %v15587_v41 }
 0x4e9   : > { %8824 = vmatpush1.bf16.msra.mxu0 %v13522_v42  ;;  %9357 = vmatpush1.bf16.msra.mxu1 %v13525_v43  ;;  %v13575_v42 = vld [vmem:[%s14419_s21 + $0x3f8] ss:$20 sps:$4 sm:$0xff]  }
 0x4ea   : > { %8825 = vmatprep.subr.bf16.mxu0 %v13530_v12  ;;  %9358 = vmatprep.subr.bf16.mxu1 %v13533_v44  ;;  %v13577_v43 = vld [vmem:[%s14419_s21 + $0x2b8] ss:$20 sps:$4 sm:$0xff]   ;;  %v13578_v12 = vld [vmem:[%s14419_s21 + $0x1a0] ss:$20 sps:$4 sm:$0xff]  }
 0x4eb   : > { %8855 = vmatprep.mubr.bf16.mxu0 %v14104_v51  ;;  %9388 = vmatprep.mubr.bf16.mxu1 %v14104_v51  ;;  %v13579_v44 = vld [vmem:[%s14419_s21 + $0x420] ss:$20 sps:$4 sm:$0xff]   ;;  %v13584_v51 = vld [vmem:[%s14419_s21 + $0x88] ss:$20 sps:$4 sm:$0xff]  }
 0x4ed   : > { %8826 = vmatpush1.bf16.msra.mxu0 %v13528_v13  ;;  %9359 = vmatpush1.bf16.msra.mxu1 %v13531_v49  ;;  %v13580_v13 = vld [vmem:[%s14419_s21 + $0x60] ss:$20 sps:$4 sm:$0xff]  }
 0x4ee   : > { %8827 = vmatprep.subr.bf16.mxu0 %v13536_v19  ;;  %9360 = vmatprep.subr.bf16.mxu1 %v13539_v31  ;;  %v13581_v49 = vld [vmem:[%s14419_s21 + $0x2e0] ss:$20 sps:$4 sm:$0xff]   ;;  %v13582_v19 = vld [vmem:[%s14419_s21 + $0x1c8] ss:$20 sps:$4 sm:$0xff]  }
 0x4ef   : > { %v13583_v31 = vld [vmem:[%s14419_s21 + $0x448] ss:$20 sps:$4 sm:$0xff]  }
 0x4f1   : > { %8828 = vmatpush1.bf16.msra.mxu0 %v13534_v9  ;;  %9361 = vmatpush1.bf16.msra.mxu1 %v13537_v48  ;;  %v13587_v9 = vld [vmem:[%s14419_s21 + $0x470] ss:$20 sps:$4 sm:$0xff]  }
 0x4f2   : > { %8829 = vmatprep.subr.bf16.mxu0 %v13542_v54  ;;  %9362 = vmatprep.subr.bf16.mxu1 %v13545_v61  ;;  %v13588_v48 = vld [vmem:[%s14419_s21 + $0xb0] ss:$20 sps:$4 sm:$0xff]   ;;  %v13590_v61 = vld [vmem:[%s14419_s21 + $0x218] ss:$20 sps:$4 sm:$0xff]  }
 0x4f3   : > { %v13589_v54 = vld [vmem:[%s14419_s21 + $0x330] ss:$20 sps:$4 sm:$0xff]  }
 0x4f5   : > { %8830 = vmatpush1.bf16.msra.mxu0 %v13540_v63  ;;  %9363 = vmatpush1.bf16.msra.mxu1 %v13543_v60  ;;  %v13591_v63 = vld [vmem:[%s14419_s21 + $0x498] ss:$20 sps:$4 sm:$0xff]  }
 0x4f6   : > { %8831 = vmatprep.subr.bf16.mxu0 %v13548_v3  ;;  %9364 = vmatprep.subr.bf16.mxu1 %v13551_v6  ;;  %v13592_v60 = vld [vmem:[%s14419_s21 + $0xd8] ss:$20 sps:$4 sm:$0xff]   ;;  %v13594_v6 = vld [vmem:[%s14419_s21 + $0x240] ss:$20 sps:$4 sm:$0xff]  }
 0x4f7   : > { %v13593_v3 = vld [vmem:[%s14419_s21 + $0x358] ss:$20 sps:$4 sm:$0xff]  }
 0x4f9   : > { %8832 = vmatpush1.bf16.msra.mxu0 %v13546_v55  ;;  %9365 = vmatpush1.bf16.msra.mxu1 %v13549_v10  ;;  %v13595_v55 = vld [vmem:[%s14419_s21 + $0x4c0] ss:$20 sps:$4 sm:$0xff]  }
 0x4fa   : > { %8833 = vmatprep.subr.bf16.mxu0 %v13554_v11  ;;  %9366 = vmatprep.subr.bf16.mxu1 %v13557_v14  ;;  %v13596_v10 = vld [vmem:[%s14419_s21 + $0x100] ss:$20 sps:$4 sm:$0xff]   ;;  %v13598_v14 = vld [vmem:[%s14419_s21 + $0x268] ss:$20 sps:$4 sm:$0xff]  }
 0x4fb   : > { %v13597_v11 = vld [vmem:[%s14419_s21 + $0x380] ss:$20 sps:$4 sm:$0xff]  }
 0x4fd   : > { %8834 = vmatpush1.bf16.msra.mxu0 %v13552_v15  ;;  %9367 = vmatpush1.bf16.msra.mxu1 %v13555_v17  ;;  %v13599_v15 = vld [vmem:[%s14419_s21 + $0x4e8] ss:$20 sps:$4 sm:$0xff]  }
 0x4fe   : > { %8835 = vmatprep.subr.bf16.mxu0 %v13560_v26  ;;  %9368 = vmatprep.subr.bf16.mxu1 %v13563_v33  ;;  %v13600_v17 = vld [vmem:[%s14419_s21 + $0x128] ss:$20 sps:$4 sm:$0xff]   ;;  %v13602_v33 = vld [vmem:[%s14419_s21 + $0x650] ss:$20 sps:$4 sm:$0xff]  }
 0x4ff   : > { %v13601_v26 = vld [vmem:[%s14419_s21 + $0x3a8] ss:$20 sps:$4 sm:$0xff]  }
 0x501   : > { %8836 = vmatpush1.bf16.msra.mxu0 %v13558_v57  ;;  %9369 = vmatpush1.bf16.msra.mxu1 %v13561_v56  ;;  %v13603_v57 = vld [vmem:[%s14419_s21 + $0x8d0] ss:$20 sps:$4 sm:$0xff]  }
 0x502   : > { %8837 = vmatprep.subr.bf16.mxu0 %v13566_v21  ;;  %9370 = vmatprep.subr.bf16.mxu1 %v13569_v23  ;;  %v13604_v56 = vld [vmem:[%s14419_s21 + $0x510] ss:$20 sps:$4 sm:$0xff]   ;;  %v13606_v23 = vld [vmem:[%s14419_s21 + $0x678] ss:$20 sps:$4 sm:$0xff]  }
 0x503   : > { %v13605_v21 = vld [vmem:[%s14419_s21 + $0x790] ss:$20 sps:$4 sm:$0xff]  }
 0x505   : > { %8838 = vmatpush1.bf16.msra.mxu0 %v13564_v24  ;;  %9371 = vmatpush1.bf16.msra.mxu1 %v13567_v25  ;;  %v13607_v24 = vld [vmem:[%s14419_s21 + $0x8f8] ss:$20 sps:$4 sm:$0xff]  }
 0x506   : > { %11665 = vmatprep.subr.bf16.mxu0 %v13570_v30  ;;  %11687 = vmatprep.subr.bf16.mxu1 %v13571_v34  ;;  %v13608_v25 = vld [vmem:[%s14419_s21 + $0x538] ss:$20 sps:$4 sm:$0xff]   ;;  %v13610_v30 = vld [vmem:[%s14419_s21 + $0x6a0] ss:$20 sps:$4 sm:$0xff]  }
 0x507   : > { %v13611_v34 = vld [vmem:[%s14419_s21 + $0x920] ss:$20 sps:$4 sm:$0xff]  }
 0x508   : > { %8856 = vmatmul.mubr.bf16.vlgmr.msra.gmra.mrb[0].mxu0 %v15624_v35  ;;  %9389 = vmatmul.mubr.bf16.vlgmr.msra.gmra.mrb[0].mxu1 %v15624_v35 }
 0x509   : > { %11666 = vmatpush3.bf16.msra.mxu0 %v13572_v36  ;;  %11688 = vmatpush3.bf16.msra.mxu1 %v13573_v37  ;;  %v13614_v36 = vld [vmem:[%s14419_s21 + $0x6c8] ss:$20 sps:$4 sm:$0xff]  }
 0x50a   : > { %11667 = vmatprep.subr.bf16.mxu0 %v13574_v38  ;;  %11689 = vmatprep.subr.bf16.mxu1 %v13575_v42  ;;  %v13615_v37 = vld [vmem:[%s14419_s21 + $0x948] ss:$20 sps:$4 sm:$0xff]   ;;  %v13619_v42 = vld [vmem:[%s14419_s21 + $0x970] ss:$20 sps:$4 sm:$0xff]  }
 0x50b   : > { %9429 = vmatprep.mubr.bf16.mxu0 %v14711_v16  ;;  %9469 = vmatprep.mubr.bf16.mxu1 %v14739_v32  ;;  %v13585_v16 = vld [vmem:[%s14419_s21 + $0x308] ss:$20 sps:$4 sm:$0xff]   ;;  %v13586_v32 = vld [vmem:[%s14419_s21 + $0x1f0] ss:$20 sps:$4 sm:$0xff]  }
 0x50c   : > { %v13616_v38 = vld [vmem:[%s14419_s21 + $0x588] ss:$20 sps:$4 sm:$0xff]  }
 0x50d   : > { %11668 = vmatpush3.bf16.msra.mxu0 %v13576_v2  ;;  %11690 = vmatpush3.bf16.msra.mxu1 %v13577_v43  ;;  %v13620_v2 = vld [vmem:[%s14419_s21 + $0x5b0] ss:$20 sps:$4 sm:$0xff]  }
 0x50e   : > { %11669 = vmatprep.subr.bf16.mxu0 %v13578_v12  ;;  %11691 = vmatprep.subr.bf16.mxu1 %v13579_v44  ;;  %v13621_v43 = vld [vmem:[%s14419_s21 + $0x830] ss:$20 sps:$4 sm:$0xff]   ;;  %v13622_v12 = vld [vmem:[%s14419_s21 + $0x718] ss:$20 sps:$4 sm:$0xff]  }
 0x50f   : > { %v13623_v44 = vld [vmem:[%s14419_s21 + $0x998] ss:$20 sps:$4 sm:$0xff]  }
 0x511   : > { %11670 = vmatpush3.bf16.msra.mxu0 %v13580_v13  ;;  %11692 = vmatpush3.bf16.msra.mxu1 %v13581_v49  ;;  %v13624_v13 = vld [vmem:[%s14419_s21 + $0x5d8] ss:$20 sps:$4 sm:$0xff]  }
 0x512   : > { %11671 = vmatprep.subr.bf16.mxu0 %v13582_v19  ;;  %11693 = vmatprep.subr.bf16.mxu1 %v13583_v31  ;;  %v13625_v49 = vld [vmem:[%s14419_s21 + $0x858] ss:$20 sps:$4 sm:$0xff]   ;;  %v13626_v19 = vld [vmem:[%s14419_s21 + $0x740] ss:$20 sps:$4 sm:$0xff]  }
 0x513   : > { %v13627_v31 = vld [vmem:[%s14419_s21 + $0x9c0] ss:$20 sps:$4 sm:$0xff]  }
 0x515   : > { %11672 = vmatpush3.bf16.msra.mxu0 %v13584_v51  ;;  %11694 = vmatpush3.bf16.msra.mxu1 %v13585_v16  ;;  %v13628_v51 = vld [vmem:[%s14419_s21 + $0x600] ss:$20 sps:$4 sm:$0xff]  }
 0x516   : > { %11673 = vmatprep.subr.bf16.mxu0 %v13586_v32  ;;  %11695 = vmatprep.subr.bf16.mxu1 %v13587_v9  ;;  %v13629_v16 = vld [vmem:[%s14419_s21 + $0x880] ss:$20 sps:$4 sm:$0xff]   ;;  %v13630_v32 = vld [vmem:[%s14419_s21 + $0x768] ss:$20 sps:$4 sm:$0xff]  }
 0x517   : > { %v13631_v9 = vld [vmem:[%s14419_s21 + $0x9e8] ss:$20 sps:$4 sm:$0xff]  }
 0x519   : > { %11674 = vmatpush3.bf16.msra.mxu0 %v13588_v48  ;;  %11696 = vmatpush3.bf16.msra.mxu1 %v13589_v54  ;;  %v13632_v48 = vld [vmem:[%s14419_s21 + $0x628] ss:$20 sps:$4 sm:$0xff]  }
 0x51a   : > { %11675 = vmatprep.subr.bf16.mxu0 %v13590_v61  ;;  %11697 = vmatprep.subr.bf16.mxu1 %v13591_v63  ;;  %v13633_v54 = vld [vmem:[%s14419_s21 + $0x8a8] ss:$20 sps:$4 sm:$0xff]   ;;  %v13634_v61 = vld [vmem:[%s14419_s21 + $0xb50] ss:$20 sps:$4 sm:$0xff]  }
 0x51b   : > { %v13635_v63 = vld [vmem:[%s14419_s21 + $0xdd0] ss:$20 sps:$4 sm:$0xff]  }
 0x51d   : > { %11676 = vmatpush3.bf16.msra.mxu0 %v13592_v60  ;;  %11698 = vmatpush3.bf16.msra.mxu1 %v13593_v3  ;;  %v13636_v60 = vld [vmem:[%s14419_s21 + $0xa10] ss:$20 sps:$4 sm:$0xff]  }
 0x51e   : > { %11677 = vmatprep.subr.bf16.mxu0 %v13594_v6  ;;  %11699 = vmatprep.subr.bf16.mxu1 %v13595_v55  ;;  %v13637_v3 = vld [vmem:[%s14419_s21 + $0xc90] ss:$20 sps:$4 sm:$0xff]   ;;  %v13638_v6 = vld [vmem:[%s14419_s21 + $0xb78] ss:$20 sps:$4 sm:$0xff]  }
 0x51f   : > { %v13639_v55 = vld [vmem:[%s14419_s21 + $0xdf8] ss:$20 sps:$4 sm:$0xff]  }
 0x521   : > { %11678 = vmatpush3.bf16.msra.mxu0 %v13596_v10  ;;  %11700 = vmatpush3.bf16.msra.mxu1 %v13597_v11  ;;  %v13640_v10 = vld [vmem:[%s14419_s21 + $0xa38] ss:$20 sps:$4 sm:$0xff]  }
 0x522   : > { %11679 = vmatprep.subr.bf16.mxu0 %v13598_v14  ;;  %11701 = vmatprep.subr.bf16.mxu1 %v13599_v15  ;;  %v13641_v11 = vld [vmem:[%s14419_s21 + $0xcb8] ss:$20 sps:$4 sm:$0xff]   ;;  %v13642_v14 = vld [vmem:[%s14419_s21 + $0xba0] ss:$20 sps:$4 sm:$0xff]  }
 0x523   : > { %v13643_v15 = vld [vmem:[%s14419_s21 + $0xe20] ss:$20 sps:$4 sm:$0xff]  }
 0x525   : > { %11680 = vmatpush3.bf16.msra.mxu0 %v13600_v17  ;;  %11702 = vmatpush3.bf16.msra.mxu1 %v13601_v26  ;;  %v13646_v17 = vld [vmem:[%s14419_s21 + $0xbc8] ss:$20 sps:$4 sm:$0xff]  }
 0x526   : > { %11709 = vmatprep.subr.bf16.mxu0 %v13602_v33  ;;  %11731 = vmatprep.subr.bf16.mxu1 %v13603_v57  ;;  %v13647_v26 = vld [vmem:[%s14419_s21 + $0xe48] ss:$20 sps:$4 sm:$0xff]   ;;  %v13651_v57 = vld [vmem:[%s14419_s21 + $0xe70] ss:$20 sps:$4 sm:$0xff]  }
 0x527   : > { %v13648_v33 = vld [vmem:[%s14419_s21 + $0xa88] ss:$20 sps:$4 sm:$0xff]  }
 0x528   : > { %9430 = vmatmul.mubr.bf16.vlgmr.msra.gmra.mrb[4].mxu0 %v14732_v28  ;;  %9470 = vmatmul.mubr.bf16.vlgmr.msra.gmra.mrb[4].mxu1 %v14815_v39  ;;  %v13612_v28 = vld [vmem:[%s14419_s21 + $0x560] ss:$20 sps:$4 sm:$0xff]  }
 0x529   : > { %11710 = vmatpush3.bf16.msra.mxu0 %v13604_v56  ;;  %11732 = vmatpush3.bf16.msra.mxu1 %v13605_v21  ;;  %v13613_v39 = vld [vmem:[%s14419_s21 + $0x7e0] ss:$20 sps:$4 sm:$0xff]   ;;  %v13652_v56 = vld [vmem:[%s14419_s21 + $0xab0] ss:$20 sps:$4 sm:$0xff]  }
 0x52a   : > { %11711 = vmatprep.subr.bf16.mxu0 %v13606_v23  ;;  %11733 = vmatprep.subr.bf16.mxu1 %v13607_v24  ;;  %v13653_v21 = vld [vmem:[%s14419_s21 + $0xd30] ss:$20 sps:$4 sm:$0xff]   ;;  %v13654_v23 = vld [vmem:[%s14419_s21 + $0xc18] ss:$20 sps:$4 sm:$0xff]  }
 0x52b   : > { %9509 = vmatprep.mubr.bf16.mxu0 %v14821_v7  ;;  %9549 = vmatprep.mubr.bf16.mxu1 %v14897_v50  ;;  %v13617_v7 = vld [vmem:[%s14419_s21 + $0x808] ss:$20 sps:$4 sm:$0xff]   ;;  %v13618_v50 = vld [vmem:[%s14419_s21 + $0x6f0] ss:$20 sps:$4 sm:$0xff]   ;;  %v13655_v24 = vld [vmem:[%s14419_s21 + $0xe98] ss:$20 sps:$4 sm:$0xff]  }
 0x52d   : > { %11712 = vmatpush3.bf16.msra.mxu0 %v13608_v25  ;;  %11734 = vmatpush3.bf16.msra.mxu1 %v13609_v27  ;;  %v13656_v25 = vld [vmem:[%s14419_s21 + $0xad8] ss:$20 sps:$4 sm:$0xff]  }
 0x52e   : > { %11713 = vmatprep.subr.bf16.mxu0 %v13610_v30  ;;  %11735 = vmatprep.subr.bf16.mxu1 %v13611_v34  ;;  %v13657_v27 = vld [vmem:[%s14419_s21 + $0xd58] ss:$20 sps:$4 sm:$0xff]   ;;  %v13658_v30 = vld [vmem:[%s14419_s21 + $0xc40] ss:$20 sps:$4 sm:$0xff]  }
 0x52f   : > { %v13659_v34 = vld [vmem:[%s14419_s21 + $0xec0] ss:$20 sps:$4 sm:$0xff]  }
 0x531   : > { %11714 = vmatpush3.bf16.msra.mxu0 %v13612_v28  ;;  %11736 = vmatpush3.bf16.msra.mxu1 %v13613_v39  ;;  %v13660_v28 = vld [vmem:[%s14419_s21 + $0xb00] ss:$20 sps:$4 sm:$0xff]  }
 0x532   : > { %11715 = vmatprep.subr.bf16.mxu0 %v13614_v36  ;;  %11737 = vmatprep.subr.bf16.mxu1 %v13615_v37  ;;  %v13661_v39 = vld [vmem:[%s14419_s21 + $0xd80] ss:$20 sps:$4 sm:$0xff]   ;;  %v13662_v36 = vld [vmem:[%s14419_s21 + $0xc68] ss:$20 sps:$4 sm:$0xff]  }
 0x533   : > { %v13663_v37 = vld [vmem:[%s14419_s21 + $0xee8] ss:$20 sps:$4 sm:$0xff]  }
 0x535   : > { %11716 = vmatpush3.bf16.msra.mxu0 %v13616_v38  ;;  %11738 = vmatpush3.bf16.msra.mxu1 %v13617_v7  ;;  %v13664_v38 = vld [vmem:[%s14419_s21 + $0xb28] ss:$20 sps:$4 sm:$0xff]  }
 0x536   : > { %11717 = vmatprep.subr.bf16.mxu0 %v13618_v50  ;;  %11739 = vmatprep.subr.bf16.mxu1 %v13619_v42  ;;  %v13665_v7 = vld [vmem:[%s14419_s21 + $0xda8] ss:$20 sps:$4 sm:$0xff]   ;;  %v13666_v50 = vld [vmem:[%s14419_s21 + $0x1050] ss:$20 sps:$4 sm:$0xff]  }
 0x537   : > { %v13667_v42 = vld [vmem:[%s14419_s21 + $0x12d0] ss:$20 sps:$4 sm:$0xff]  }
 0x539   : > { %11718 = vmatpush3.bf16.msra.mxu0 %v13620_v2  ;;  %11740 = vmatpush3.bf16.msra.mxu1 %v13621_v43  ;;  %v13668_v2 = vld [vmem:[%s14419_s21 + $0xf10] ss:$20 sps:$4 sm:$0xff]  }
 0x53a   : > { %11719 = vmatprep.subr.bf16.mxu0 %v13622_v12  ;;  %11741 = vmatprep.subr.bf16.mxu1 %v13623_v44  ;;  %v13669_v43 = vld [vmem:[%s14419_s21 + $0x1190] ss:$20 sps:$4 sm:$0xff]   ;;  %v13670_v12 = vld [vmem:[%s14419_s21 + $0x1078] ss:$20 sps:$4 sm:$0xff]  }
 0x53b   : > { %v13671_v44 = vld [vmem:[%s14419_s21 + $0x12f8] ss:$20 sps:$4 sm:$0xff]  }
 0x53d   : > { %11720 = vmatpush3.bf16.msra.mxu0 %v13624_v13  ;;  %11742 = vmatpush3.bf16.msra.mxu1 %v13625_v49  ;;  %v13672_v13 = vld [vmem:[%s14419_s21 + $0xf38] ss:$20 sps:$4 sm:$0xff]  }
 0x53e   : > { %11721 = vmatprep.subr.bf16.mxu0 %v13626_v19  ;;  %11743 = vmatprep.subr.bf16.mxu1 %v13627_v31  ;;  %v13673_v49 = vld [vmem:[%s14419_s21 + $0x11b8] ss:$20 sps:$4 sm:$0xff]   ;;  %v13674_v19 = vld [vmem:[%s14419_s21 + $0x10a0] ss:$20 sps:$4 sm:$0xff]  }
 0x53f   : > { %v13675_v31 = vld [vmem:[%s14419_s21 + $0x1320] ss:$20 sps:$4 sm:$0xff]  }
 0x541   : > { %11722 = vmatpush3.bf16.msra.mxu0 %v13628_v51  ;;  %11744 = vmatpush3.bf16.msra.mxu1 %v13629_v16  ;;  %v13678_v51 = vld [vmem:[%s14419_s21 + $0x10c8] ss:$20 sps:$4 sm:$0xff]  }
 0x542   : > { %11723 = vmatprep.subr.bf16.mxu0 %v13630_v32  ;;  %11745 = vmatprep.subr.bf16.mxu1 %v13631_v9  ;;  %v13679_v16 = vld [vmem:[%s14419_s21 + $0x1348] ss:$20 sps:$4 sm:$0xff]   ;;  %v13683_v9 = vld [vmem:[%s14419_s21 + $0x1370] ss:$20 sps:$4 sm:$0xff]  }
 0x543   : > { %v13680_v32 = vld [vmem:[%s14419_s21 + $0xf88] ss:$20 sps:$4 sm:$0xff]  }
 0x545   : > { %11724 = vmatpush3.bf16.msra.mxu0 %v13632_v48  ;;  %11746 = vmatpush3.bf16.msra.mxu1 %v13633_v54  ;;  %v13684_v48 = vld [vmem:[%s14419_s21 + $0xfb0] ss:$20 sps:$4 sm:$0xff]  }
 0x546   : > { %11753 = vmatprep.subr.bf16.mxu0 %v13634_v61  ;;  %11775 = vmatprep.subr.bf16.mxu1 %v13635_v63  ;;  %v13685_v54 = vld [vmem:[%s14419_s21 + $0x1230] ss:$20 sps:$4 sm:$0xff]   ;;  %v13686_v61 = vld [vmem:[%s14419_s21 + $0x1118] ss:$20 sps:$4 sm:$0xff]  }
 0x547   : > { %v13687_v63 = vld [vmem:[%s14419_s21 + $0x1398] ss:$20 sps:$4 sm:$0xff]  }
 0x548   : > { %9510 = vmatmul.mubr.bf16.vlgmr.msra.gmra.mrb[8].mxu0 %v14890_v46  ;;  %9550 = vmatmul.mubr.bf16.vlgmr.msra.gmra.mrb[8].mxu1 %v14969_v62  ;;  %v13644_v46 = vld [vmem:[%s14419_s21 + $0xa60] ss:$20 sps:$4 sm:$0xff]  }
 0x549   : > { %11754 = vmatpush3.bf16.msra.mxu0 %v13636_v60  ;;  %11776 = vmatpush3.bf16.msra.mxu1 %v13637_v3  ;;  %v13645_v62 = vld [vmem:[%s14419_s21 + $0xce0] ss:$20 sps:$4 sm:$0xff]   ;;  %v13688_v60 = vld [vmem:[%s14419_s21 + $0xfd8] ss:$20 sps:$4 sm:$0xff]  }
 0x54a   : > { %11755 = vmatprep.subr.bf16.mxu0 %v13638_v6  ;;  %11777 = vmatprep.subr.bf16.mxu1 %v13639_v55  ;;  %v13689_v3 = vld [vmem:[%s14419_s21 + $0x1258] ss:$20 sps:$4 sm:$0xff]   ;;  %v13690_v6 = vld [vmem:[%s14419_s21 + $0x1140] ss:$20 sps:$4 sm:$0xff]  }
 0x54b   : > { %9589 = vmatprep.mubr.bf16.mxu0 %v14976_v4  ;;  %9629 = vmatprep.mubr.bf16.mxu1 %v15052_v20  ;;  %v13649_v4 = vld [vmem:[%s14419_s21 + $0xd08] ss:$20 sps:$4 sm:$0xff]   ;;  %v13650_v20 = vld [vmem:[%s14419_s21 + $0xbf0] ss:$20 sps:$4 sm:$0xff]   ;;  %v13691_v55 = vld [vmem:[%s14419_s21 + $0x13c0] ss:$20 sps:$4 sm:$0xff]  }
 0x54d   : > { %11756 = vmatpush3.bf16.msra.mxu0 %v13640_v10  ;;  %11778 = vmatpush3.bf16.msra.mxu1 %v13641_v11  ;;  %v13692_v10 = vld [vmem:[%s14419_s21 + $0x1000] ss:$20 sps:$4 sm:$0xff]  }
 0x54e   : > { %11757 = vmatprep.subr.bf16.mxu0 %v13642_v14  ;;  %11779 = vmatprep.subr.bf16.mxu1 %v13643_v15  ;;  %v13693_v11 = vld [vmem:[%s14419_s21 + $0x1280] ss:$20 sps:$4 sm:$0xff]   ;;  %v13694_v14 = vld [vmem:[%s14419_s21 + $0x1168] ss:$20 sps:$4 sm:$0xff]  }
 0x54f   : > { %v13695_v15 = vld [vmem:[%s14419_s21 + $0x13e8] ss:$20 sps:$4 sm:$0xff]  }
 0x551   : > { %11758 = vmatpush3.bf16.msra.mxu0 %v13644_v46  ;;  %11780 = vmatpush3.bf16.msra.mxu1 %v13645_v62  ;;  %v13696_v46 = vld [vmem:[%s14419_s21 + $0x1028] ss:$20 sps:$4 sm:$0xff]  }
 0x552   : > { %11759 = vmatprep.subr.bf16.mxu0 %v13646_v17  ;;  %11781 = vmatprep.subr.bf16.mxu1 %v13647_v26  ;;  %v13697_v62 = vld [vmem:[%s14419_s21 + $0x12a8] ss:$20 sps:$4 sm:$0xff]   ;;  %v13698_v17 = vld [vmem:[%s14419_s21 + $0x1550] ss:$20 sps:$4 sm:$0xff]  }
 0x553   : > { %v13699_v26 = vld [vmem:[%s14419_s21 + $0x17d0] ss:$20 sps:$4 sm:$0xff]  }
 0x555   : > { %11760 = vmatpush3.bf16.msra.mxu0 %v13648_v33  ;;  %11782 = vmatpush3.bf16.msra.mxu1 %v13649_v4  ;;  %v13700_v33 = vld [vmem:[%s14419_s21 + $0x1410] ss:$20 sps:$4 sm:$0xff]  }
 0x556   : > { %11761 = vmatprep.subr.bf16.mxu0 %v13650_v20  ;;  %11783 = vmatprep.subr.bf16.mxu1 %v13651_v57  ;;  %v13701_v4 = vld [vmem:[%s14419_s21 + $0x1690] ss:$20 sps:$4 sm:$0xff]   ;;  %v13702_v20 = vld [vmem:[%s14419_s21 + $0x1578] ss:$20 sps:$4 sm:$0xff]  }
 0x557   : > { %v13703_v57 = vld [vmem:[%s14419_s21 + $0x17f8] ss:$20 sps:$4 sm:$0xff]  }
 0x559   : > { %11762 = vmatpush3.bf16.msra.mxu0 %v13652_v56  ;;  %11784 = vmatpush3.bf16.msra.mxu1 %v13653_v21  ;;  %v13704_v56 = vld [vmem:[%s14419_s21 + $0x1438] ss:$20 sps:$4 sm:$0xff]  }
 0x55a   : > { %11763 = vmatprep.subr.bf16.mxu0 %v13654_v23  ;;  %11785 = vmatprep.subr.bf16.mxu1 %v13655_v24  ;;  %v13705_v21 = vld [vmem:[%s14419_s21 + $0x16b8] ss:$20 sps:$4 sm:$0xff]   ;;  %v13706_v23 = vld [vmem:[%s14419_s21 + $0x15a0] ss:$20 sps:$4 sm:$0xff]  }
 0x55b   : > { %v13707_v24 = vld [vmem:[%s14419_s21 + $0x1820] ss:$20 sps:$4 sm:$0xff]  }
 0x55d   : > { %11764 = vmatpush3.bf16.msra.mxu0 %v13656_v25  ;;  %11786 = vmatpush3.bf16.msra.mxu1 %v13657_v27  ;;  %v13710_v25 = vld [vmem:[%s14419_s21 + $0x15c8] ss:$20 sps:$4 sm:$0xff]  }
 0x55e   : > { %11765 = vmatprep.subr.bf16.mxu0 %v13658_v30  ;;  %11787 = vmatprep.subr.bf16.mxu1 %v13659_v34  ;;  %v13711_v27 = vld [vmem:[%s14419_s21 + $0x1848] ss:$20 sps:$4 sm:$0xff]   ;;  %v13715_v34 = vld [vmem:[%s14419_s21 + $0x1870] ss:$20 sps:$4 sm:$0xff]  }
 0x55f   : > { %v13712_v30 = vld [vmem:[%s14419_s21 + $0x1488] ss:$20 sps:$4 sm:$0xff]  }
 0x561   : > { %11766 = vmatpush3.bf16.msra.mxu0 %v13660_v28  ;;  %11788 = vmatpush3.bf16.msra.mxu1 %v13661_v39  ;;  %v13716_v28 = vld [vmem:[%s14419_s21 + $0x14b0] ss:$20 sps:$4 sm:$0xff]  }
 0x562   : > { %11767 = vmatprep.subr.bf16.mxu0 %v13662_v36  ;;  %11789 = vmatprep.subr.bf16.mxu1 %v13663_v37  ;;  %v13717_v39 = vld [vmem:[%s14419_s21 + $0x1730] ss:$20 sps:$4 sm:$0xff]   ;;  %v13718_v36 = vld [vmem:[%s14419_s21 + $0x1618] ss:$20 sps:$4 sm:$0xff]  }
 0x563   : > { %v13719_v37 = vld [vmem:[%s14419_s21 + $0x1898] ss:$20 sps:$4 sm:$0xff]  }
 0x565   : > { %11768 = vmatpush3.bf16.msra.mxu0 %v13664_v38  ;;  %11790 = vmatpush3.bf16.msra.mxu1 %v13665_v7  ;;  %v13720_v38 = vld [vmem:[%s14419_s21 + $0x14d8] ss:$20 sps:$4 sm:$0xff]  }
 0x566   : > { %11797 = vmatprep.subr.bf16.mxu0 %v13666_v50  ;;  %11819 = vmatprep.subr.bf16.mxu1 %v13667_v42  ;;  %v13721_v7 = vld [vmem:[%s14419_s21 + $0x1758] ss:$20 sps:$4 sm:$0xff]   ;;  %v13722_v50 = vld [vmem:[%s14419_s21 + $0x1640] ss:$20 sps:$4 sm:$0xff]  }
 0x567   : > { %v13723_v42 = vld [vmem:[%s14419_s21 + $0x18c0] ss:$20 sps:$4 sm:$0xff]  }
 0x568   : > { %9590 = vmatmul.mubr.bf16.vlgmr.msra.gmra.mrb[12].mxu0 %v15044_v18  ;;  %9630 = vmatmul.mubr.bf16.vlgmr.msra.gmra.mrb[12].mxu1 %v15125_v5  ;;  %v13676_v18 = vld [vmem:[%s14419_s21 + $0xf60] ss:$20 sps:$4 sm:$0xff]  }
 0x569   : > { %11798 = vmatpush3.bf16.msra.mxu0 %v13668_v2  ;;  %11820 = vmatpush3.bf16.msra.mxu1 %v13669_v43  ;;  %v13677_v5 = vld [vmem:[%s14419_s21 + $0x11e0] ss:$20 sps:$4 sm:$0xff]  }
 0x56a   : > { %11799 = vmatprep.subr.bf16.mxu0 %v13670_v12  ;;  %11821 = vmatprep.subr.bf16.mxu1 %v13671_v44  ;;  %v13724_v2 = vld [vmem:[%s14419_s21 + $0x1500] ss:$20 sps:$4 sm:$0xff]   ;;  %v13726_v12 = vld [vmem:[%s14419_s21 + $0x1668] ss:$20 sps:$4 sm:$0xff]  }
 0x56b   : > { %9669 = vmatprep.mubr.bf16.mxu0 %v15132_v40  ;;  %9709 = vmatprep.mubr.bf16.mxu1 %v15208_v0  ;;  %v13681_v40 = vld [vmem:[%s14419_s21 + $0x1208] ss:$20 sps:$4 sm:$0xff]   ;;  %v13682_v0 = vld [vmem:[%s14419_s21 + $0x10f0] ss:$20 sps:$4 sm:$0xff]   ;;  %v13725_v43 = vld [vmem:[%s14419_s21 + $0x1780] ss:$20 sps:$4 sm:$0xff]  }
 0x56c   : > { %v13727_v44 = vld [vmem:[%s14419_s21 + $0x18e8] ss:$20 sps:$4 sm:$0xff]  }
 0x56d   : > { %11800 = vmatpush3.bf16.msra.mxu0 %v13672_v13  ;;  %11822 = vmatpush3.bf16.msra.mxu1 %v13673_v49  ;;  %v13728_v13 = vld [vmem:[%s14419_s21 + $0x1528] ss:$20 sps:$4 sm:$0xff]  }
 0x56e   : > { %11801 = vmatprep.subr.bf16.mxu0 %v13674_v19  ;;  %11823 = vmatprep.subr.bf16.mxu1 %v13675_v31  ;;  %v13729_v49 = vld [vmem:[%s14419_s21 + $0x17a8] ss:$20 sps:$4 sm:$0xff]   ;;  %v13730_v19 = vld [vmem:[%s14419_s21 + $0x1a50] ss:$20 sps:$4 sm:$0xff]  }
 0x56f   : > { %v13731_v31 = vld [vmem:[%s14419_s21 + $0x1cd0] ss:$20 sps:$4 sm:$0xff]  }
 0x571   : > { %11802 = vmatpush3.bf16.msra.mxu0 %v13676_v18  ;;  %11824 = vmatpush3.bf16.msra.mxu1 %v13677_v5  ;;  %v13732_v18 = vld [vmem:[%s14419_s21 + $0x1910] ss:$20 sps:$4 sm:$0xff]  }
 0x572   : > { %11803 = vmatprep.subr.bf16.mxu0 %v13678_v51  ;;  %11825 = vmatprep.subr.bf16.mxu1 %v13679_v16  ;;  %v13733_v5 = vld [vmem:[%s14419_s21 + $0x1b90] ss:$20 sps:$4 sm:$0xff]   ;;  %v13734_v51 = vld [vmem:[%s14419_s21 + $0x1a78] ss:$20 sps:$4 sm:$0xff]  }
 0x573   : > { %v13735_v16 = vld [vmem:[%s14419_s21 + $0x1cf8] ss:$20 sps:$4 sm:$0xff]  }
 0x575   : > { %11804 = vmatpush3.bf16.msra.mxu0 %v13680_v32  ;;  %11826 = vmatpush3.bf16.msra.mxu1 %v13681_v40  ;;  %v13736_v32 = vld [vmem:[%s14419_s21 + $0x1938] ss:$20 sps:$4 sm:$0xff]  }
 0x576   : > { %11805 = vmatprep.subr.bf16.mxu0 %v13682_v0  ;;  %11827 = vmatprep.subr.bf16.mxu1 %v13683_v9  ;;  %v13737_v40 = vld [vmem:[%s14419_s21 + $0x1bb8] ss:$20 sps:$4 sm:$0xff]   ;;  %v13738_v0 = vld [vmem:[%s14419_s21 + $0x1aa0] ss:$20 sps:$4 sm:$0xff]  }
 0x577   : > { %v13739_v9 = vld [vmem:[%s14419_s21 + $0x1d20] ss:$20 sps:$4 sm:$0xff]  }
 0x579   : > { %11806 = vmatpush3.bf16.msra.mxu0 %v13684_v48  ;;  %11828 = vmatpush3.bf16.msra.mxu1 %v13685_v54  ;;  %v13742_v48 = vld [vmem:[%s14419_s21 + $0x1ac8] ss:$20 sps:$4 sm:$0xff]  }
 0x57a   : > { %11807 = vmatprep.subr.bf16.mxu0 %v13686_v61  ;;  %11829 = vmatprep.subr.bf16.mxu1 %v13687_v63  ;;  %v13743_v54 = vld [vmem:[%s14419_s21 + $0x1d48] ss:$20 sps:$4 sm:$0xff]   ;;  %v13747_v63 = vld [vmem:[%s14419_s21 + $0x1d70] ss:$20 sps:$4 sm:$0xff]  }
 0x57b   : > { %v13744_v61 = vld [vmem:[%s14419_s21 + $0x1988] ss:$20 sps:$4 sm:$0xff]  }
 0x57d   : > { %11808 = vmatpush3.bf16.msra.mxu0 %v13688_v60  ;;  %11830 = vmatpush3.bf16.msra.mxu1 %v13689_v3  ;;  %v13748_v60 = vld [vmem:[%s14419_s21 + $0x19b0] ss:$20 sps:$4 sm:$0xff]  }
 0x57e   : > { %11809 = vmatprep.subr.bf16.mxu0 %v13690_v6  ;;  %11831 = vmatprep.subr.bf16.mxu1 %v13691_v55  ;;  %v13749_v3 = vld [vmem:[%s14419_s21 + $0x1c30] ss:$20 sps:$4 sm:$0xff]   ;;  %v13750_v6 = vld [vmem:[%s14419_s21 + $0x1b18] ss:$20 sps:$4 sm:$0xff]  }
 0x57f   : > { %v13751_v55 = vld [vmem:[%s14419_s21 + $0x1d98] ss:$20 sps:$4 sm:$0xff]  }
 0x581   : > { %11810 = vmatpush3.bf16.msra.mxu0 %v13692_v10  ;;  %11832 = vmatpush3.bf16.msra.mxu1 %v13693_v11  ;;  %v13752_v10 = vld [vmem:[%s14419_s21 + $0x19d8] ss:$20 sps:$4 sm:$0xff]  }
 0x582   : > { %11811 = vmatprep.subr.bf16.mxu0 %v13694_v14  ;;  %11833 = vmatprep.subr.bf16.mxu1 %v13695_v15  ;;  %v13753_v11 = vld [vmem:[%s14419_s21 + $0x1c58] ss:$20 sps:$4 sm:$0xff]   ;;  %v13754_v14 = vld [vmem:[%s14419_s21 + $0x1b40] ss:$20 sps:$4 sm:$0xff]  }
 0x583   : > { %v13755_v15 = vld [vmem:[%s14419_s21 + $0x1dc0] ss:$20 sps:$4 sm:$0xff]  }
 0x585   : > { %11812 = vmatpush3.bf16.msra.mxu0 %v13696_v46  ;;  %11834 = vmatpush3.bf16.msra.mxu1 %v13697_v62  ;;  %v13756_v46 = vld [vmem:[%s14419_s21 + $0x1a00] ss:$20 sps:$4 sm:$0xff]  }
 0x586   : > { %11841 = vmatprep.subr.bf16.mxu0 %v13698_v17  ;;  %11863 = vmatprep.subr.bf16.mxu1 %v13699_v26  ;;  %v13757_v62 = vld [vmem:[%s14419_s21 + $0x1c80] ss:$20 sps:$4 sm:$0xff]   ;;  %v13758_v17 = vld [vmem:[%s14419_s21 + $0x1b68] ss:$20 sps:$4 sm:$0xff]  }
 0x587   : > { %v13759_v26 = vld [vmem:[%s14419_s21 + $0x1de8] ss:$20 sps:$4 sm:$0xff]  }
 0x588   : > { %9670 = vmatmul.mubr.bf16.vlgmr.msra.gmra.mrb[16].mxu0 %v15200_v53  ;;  %9710 = vmatmul.mubr.bf16.vlgmr.msra.gmra.mrb[16].mxu1 %v15280_v47  ;;  %v13708_v53 = vld [vmem:[%s14419_s21 + $0x1460] ss:$20 sps:$4 sm:$0xff]  }
 0x589   : > { %11842 = vmatpush3.bf16.msra.mxu0 %v13700_v33  ;;  %11864 = vmatpush3.bf16.msra.mxu1 %v13701_v4  ;;  %v13709_v47 = vld [vmem:[%s14419_s21 + $0x16e0] ss:$20 sps:$4 sm:$0xff]   ;;  %v13760_v33 = vld [vmem:[%s14419_s21 + $0x1a28] ss:$20 sps:$4 sm:$0xff]  }
 0x58a   : > { %11843 = vmatprep.subr.bf16.mxu0 %v13702_v20  ;;  %11865 = vmatprep.subr.bf16.mxu1 %v13703_v57  ;;  %v13761_v4 = vld [vmem:[%s14419_s21 + $0x1ca8] ss:$20 sps:$4 sm:$0xff]   ;;  %v13763_v57 = vld [vmem:[%s14419_s21 + $0x1e10] ss:$20 sps:$4 sm:$0xff]  }
 0x58b   : > { %9749 = vmatprep.mubr.bf16.mxu0 %v15287_v59  ;;  %9789 = vmatprep.mubr.bf16.mxu1 %v15363_v52  ;;  %v13713_v59 = vld [vmem:[%s14419_s21 + $0x1708] ss:$20 sps:$4 sm:$0xff]   ;;  %v13714_v52 = vld [vmem:[%s14419_s21 + $0x15f0] ss:$20 sps:$4 sm:$0xff]  }
 0x58c   : > { %v13762_v20 = vld [vmem:[%s14437_s6 + $0x40] sm:$0xff]  }
 0x58d   : > { %11844 = vmatpush3.bf16.msra.mxu0 %v13704_v56  ;;  %11866 = vmatpush3.bf16.msra.mxu1 %v13705_v21  ;;  %v13764_v56 = vld [vmem:[%s14437_s6] sm:$0xff]   ;;  %v14105_v21 = vmov 0.0  }
 0x58e   : > { %11845 = vmatprep.subr.bf16.mxu0 %v13706_v23  ;;  %11867 = vmatprep.subr.bf16.mxu1 %v13707_v24  ;;  %v13765_v23 = vld [vmem:[%s14437_s6 + $0x48] sm:$0xff]   ;;  %v13766_v24 = vld [vmem:[%s14419_s21 + $0x1e38] ss:$20 sps:$4 sm:$0xff]  }
 0x591   : > { %11846 = vmatpush3.bf16.msra.mxu0 %v13708_v53  ;;  %11868 = vmatpush3.bf16.msra.mxu1 %v13709_v47  ;;  %v13767_v53 = vld [vmem:[%s14437_s6 + $0x8] sm:$0xff]   ;;  %v13768_v47 = vld [vmem:[%s14437_s6 + $0x50] sm:$0xff]  }
 0x592   : > { %11847 = vmatprep.subr.bf16.mxu0 %v13710_v25  ;;  %11869 = vmatprep.subr.bf16.mxu1 %v13711_v27  ;;  %v13771_v25 = vld [vmem:[%s14437_s6 + $0x58] sm:$0xff]   ;;  %v13772_v27 = vld [vmem:[%s14419_s21 + $0x1e88] ss:$20 sps:$4 sm:$0xff]  }
 0x595   : > { %11848 = vmatpush3.bf16.msra.mxu0 %v13712_v30  ;;  %11870 = vmatpush3.bf16.msra.mxu1 %v13713_v59  ;;  %v13773_v30 = vld [vmem:[%s14437_s6 + $0x18] sm:$0xff]   ;;  %v13774_v59 = vld [vmem:[%s14437_s6 + $0x60] sm:$0xff]  }
 0x596   : > { %11849 = vmatprep.subr.bf16.mxu0 %v13714_v52  ;;  %11871 = vmatprep.subr.bf16.mxu1 %v13715_v34  ;;  %v13775_v52 = vld [vmem:[%s14419_s21 + $0x1eb0] ss:$20 sps:$4 sm:$0xff]   ;;  %v13776_v34 = vld [vmem:[%s14437_s6 + $0x20] sm:$0xff]  }
 0x599   : > { %11850 = vmatpush3.bf16.msra.mxu0 %v13716_v28  ;;  %11872 = vmatpush3.bf16.msra.mxu1 %v13717_v39  ;;  %v8312_v28 = vsub.s32 1, %v14689_v58  ;;  %v15867_v39 = vld [vmem:[%s374_s7] sm:$0x1f] }
 0x59a   : > { %11851 = vmatprep.subr.bf16.mxu0 %v13718_v36  ;;  %11873 = vmatprep.subr.bf16.mxu1 %v13719_v37  ;;  %v8308_v36 = vsub.s32 0, %v14689_v58  ;;  %v13777_v37 = vld [vmem:[%s14437_s6 + $0x68] sm:$0xff]  }
 0x59d   : > { %11852 = vmatpush3.bf16.msra.mxu0 %v13720_v38  ;;  %11874 = vmatpush3.bf16.msra.mxu1 %v13721_v7  ;;  %v8320_v38 = vsub.s32 3, %v14689_v58  ;;  %v8313_v7 = vrot.slane %v15867_v39, %v8312_v28 }
 0x59e   : > { %11853 = vmatprep.subr.bf16.mxu0 %v13722_v50  ;;  %11875 = vmatprep.subr.bf16.mxu1 %v13723_v42  ;;  %v13778_v50 = vld [vmem:[%s14419_s21 + $0x1ed8] ss:$20 sps:$4 sm:$0xff]   ;;  %v13779_v42 = vld [vmem:[%s14437_s6 + $0x28] sm:$0xff]  }
 0x5a1   : > { %11854 = vmatpush3.bf16.msra.mxu0 %v13724_v2  ;;  %11876 = vmatpush3.bf16.msra.mxu1 %v13725_v43  ;;  %v8309_v2 = vrot.slane %v15867_v39, %v8308_v36  ;;  %v13780_v43 = vld [vmem:[%s14437_s6 + $0x70] sm:$0xff]  }
 0x5a2   : > { %11855 = vmatprep.subr.bf16.mxu0 %v13726_v12  ;;  %11877 = vmatprep.subr.bf16.mxu1 %v13727_v44 }
 0x5a5   : > { %11856 = vmatpush3.bf16.msra.mxu0 %v13728_v13  ;;  %11878 = vmatpush3.bf16.msra.mxu1 %v13729_v49  ;;  %v8321_v13 = vrot.slane %v15867_v39, %v8320_v38 }
 0x5a6   : > { %11885 = vmatprep.subr.bf16.mxu0 %v13730_v19  ;;  %11907 = vmatprep.subr.bf16.mxu1 %v13731_v31 }
 0x5a8   : > { %9750 = vmatmul.mubr.bf16.vlgmr.msra.gmra.mrb[20].mxu0 %v15355_v45  ;;  %9790 = vmatmul.mubr.bf16.vlgmr.msra.gmra.mrb[20].mxu1 %v15436_v22  ;;  %v13740_v45 = vld [vmem:[%s14419_s21 + $0x1960] ss:$20 sps:$4 sm:$0xff]  }
 0x5a9   : > { %11886 = vmatpush3.bf16.msra.mxu0 %v13732_v18  ;;  %11908 = vmatpush3.bf16.msra.mxu1 %v13733_v5  ;;  %v13741_v22 = vld [vmem:[%s14419_s21 + $0x1be0] ss:$20 sps:$4 sm:$0xff]  }
 0x5aa   : > { %11887 = vmatprep.subr.bf16.mxu0 %v13734_v51  ;;  %11909 = vmatprep.subr.bf16.mxu1 %v13735_v16  ;;  %v13781_v51 = vld [vmem:[%s14419_s21 + $0x1f00] ss:$20 sps:$4 sm:$0xff]   ;;  %v13782_v16 = vld [vmem:[%s14437_s6 + $0x30] sm:$0xff]  }
 0x5ab   : > { %9829 = vmatprep.mubr.bf16.mxu0 %v15443_v29  ;;  %9869 = vmatprep.mubr.bf16.mxu1 %v15519_v8  ;;  %v13745_v29 = vld [vmem:[%s14419_s21 + $0x1c08] ss:$20 sps:$4 sm:$0xff]   ;;  %v13746_v8 = vld [vmem:[%s14419_s21 + $0x1af0] ss:$20 sps:$4 sm:$0xff]  }
 0x5ad   : > { %11888 = vmatpush3.bf16.msra.mxu0 %v13736_v32  ;;  %11910 = vmatpush3.bf16.msra.mxu1 %v13737_v40 }
 0x5ae   : > { %11889 = vmatprep.subr.bf16.mxu0 %v13738_v0  ;;  %11911 = vmatprep.subr.bf16.mxu1 %v13739_v9  ;;  %v13783_v9 = vld [vmem:[%s14437_s6 + $0x78] sm:$0xff]  }
 0x5b1   : > { %11890 = vmatpush3.bf16.msra.mxu0 %v13740_v45  ;;  %11912 = vmatpush3.bf16.msra.mxu1 %v13741_v22 }
 0x5b2   : > { %11891 = vmatprep.subr.bf16.mxu0 %v13742_v48  ;;  %11913 = vmatprep.subr.bf16.mxu1 %v13743_v54  ;;  %v13784_v54 = vld [vmem:[%s14419_s21 + $0x1f28] ss:$20 sps:$4 sm:$0xff]  }
 0x5b5   : > { %11892 = vmatpush3.bf16.msra.mxu0 %v13744_v61  ;;  %11914 = vmatpush3.bf16.msra.mxu1 %v13745_v29  ;;  %v13785_v61 = vld [vmem:[%s14437_s6 + $0x38] sm:$0xff]  }
 0x5b6   : > { %11893 = vmatprep.subr.bf16.mxu0 %v13746_v8  ;;  %11915 = vmatprep.subr.bf16.mxu1 %v13747_v63  ;;  %v13786_v8 = vld [vmem:[%s14437_s6 + $0xc0] sm:$0xff]  }
 0x5b9   : > { %11894 = vmatpush3.bf16.msra.mxu0 %v13748_v60  ;;  %11916 = vmatpush3.bf16.msra.mxu1 %v13749_v3  ;;  %v13787_v60 = vld [vmem:[%s14437_s6 + $0x80] sm:$0xff]  }
 0x5ba   : > { %11895 = vmatprep.subr.bf16.mxu0 %v13750_v6  ;;  %11917 = vmatprep.subr.bf16.mxu1 %v13751_v55  ;;  %v13788_v6 = vld [vmem:[%s14437_s6 + $0xc8] sm:$0xff]  }
 0x5bd   : > { %11896 = vmatpush3.bf16.msra.mxu0 %v13752_v10  ;;  %11918 = vmatpush3.bf16.msra.mxu1 %v13753_v11  ;;  %v13789_v10 = vld [vmem:[%s14437_s6 + $0x88] sm:$0xff]   ;;  %v13790_v11 = vld [vmem:[%s14437_s6 + $0xd0] sm:$0xff]  }
 0x5be   : > { %11897 = vmatprep.subr.bf16.mxu0 %v13754_v14  ;;  %11919 = vmatprep.subr.bf16.mxu1 %v13755_v15  ;;  %v13791_v14 = vld [vmem:[%s14437_s6 + $0x90] sm:$0xff]   ;;  %v13792_v15 = vld [vmem:[%s14437_s6 + $0xd8] sm:$0xff]  }
 0x5c1   : > { %11898 = vmatpush3.bf16.msra.mxu0 %v13756_v46  ;;  %11920 = vmatpush3.bf16.msra.mxu1 %v13757_v62  ;;  %v13793_v46 = vld [vmem:[%s14437_s6 + $0x98] sm:$0xff]   ;;  %v13795_v62 = vld [vmem:[%s14437_s6 + $0xa0] sm:$0xff]  }
 0x5c2   : > { %11899 = vmatprep.subr.bf16.mxu0 %v13758_v17  ;;  %11921 = vmatprep.subr.bf16.mxu1 %v13759_v26  ;;  %v8316_v17 = vsub.s32 2, %v14689_v58  ;;  %v13796_v26 = vld [vmem:[%s14437_s6 + $0xe8] sm:$0xff]  }
 0x5c5   : > { %11900 = vmatpush3.bf16.msra.mxu0 %v13760_v33  ;;  %11922 = vmatpush3.bf16.msra.mxu1 %v13761_v4  ;;  %v8324_v33 = vsub.s32 4, %v14689_v58  ;;  %v13797_v4 = vld [vmem:[%s14437_s6 + $0xa8] sm:$0xff]  }
 0x5c6   : > { %11999 = vmatprep.subr.bf16.mxu0 %v14105_v21  ;;  %11938 = vmatprep.subr.bf16.mxu1 %v13762_v20  ;;  %v8317_v20 = vrot.slane %v15867_v39, %v8316_v17 }
 0x5c8   : > { %9830 = vmatmul.mubr.bf16.vlgmr.msra.gmra.mrb[24].mxu0 %v15513_v1  ;;  %9870 = vmatmul.mubr.bf16.vlgmr.msra.gmra.mrb[24].mxu1 %v15587_v41  ;;  %v13769_v1 = vld [vmem:[%s14419_s21 + $0x1e60] ss:$20 sps:$4 sm:$0xff]   ;;  %v13770_v41 = vld [vmem:[%s14437_s6 + $0x10] sm:$0xff]  }
 0x5c9   : > { %12000 = vmatpush3.bf16.msra.mxu0 %v13763_v57  ;;  %11939 = vmatpush3.bf16.msra.mxu1 %v13764_v56  ;;  %v13798_v57 = vld [vmem:[%s14437_s6 + $0xf0] sm:$0xff]  }
 0x5ca   : > { %12001 = vmatprep.subr.bf16.mxu0 %v14105_v21  ;;  %11940 = vmatprep.subr.bf16.mxu1 %v13765_v23  ;;  %v8325_v23 = vrot.slane %v15867_v39, %v8324_v33  ;;  %v13801_v39 = vld [vmem:[%s14437_s6 + $0xb8] sm:$0xff]  }
 0x5cb   : > { %12015 = vmatprep.mubr.msk.bf16.mxu0 %vm14106_vm7, %v14105_v21 }
 0x5cd   : > { %12002 = vmatpush3.bf16.msra.mxu0 %v13766_v24  ;;  %11941 = vmatpush3.bf16.msra.mxu1 %v13767_v53 }
 0x5ce   : > { %12003 = vmatprep.subr.bf16.mxu0 %v14105_v21  ;;  %11942 = vmatprep.subr.bf16.mxu1 %v13768_v47 }
 0x5d1   : > { %12004 = vmatpush3.bf16.msra.mxu0 %v13769_v1  ;;  %11943 = vmatpush3.bf16.msra.mxu1 %v13770_v41 }
 0x5d2   : > { %12005 = vmatprep.subr.bf16.mxu0 %v14105_v21  ;;  %11944 = vmatprep.subr.bf16.mxu1 %v13771_v25 }
 0x5d5   : > { %12006 = vmatpush3.bf16.msra.mxu0 %v13772_v27  ;;  %11945 = vmatpush3.bf16.msra.mxu1 %v13773_v30  ;;  %v13799_v27 = vld [vmem:[%s14437_s6 + $0xb0] sm:$0xff]  }
 0x5d6   : > { %12007 = vmatprep.subr.bf16.mxu0 %v14105_v21  ;;  %11946 = vmatprep.subr.bf16.mxu1 %v13774_v59 }
 0x5d9   : > { %12008 = vmatpush3.bf16.msra.mxu0 %v13775_v52  ;;  %11947 = vmatpush3.bf16.msra.mxu1 %v13776_v34  ;;  %v13800_v52 = vld [vmem:[%s14437_s6 + $0xf8] sm:$0xff]  }
 0x5da   : > { %12009 = vmatprep.subr.bf16.mxu0 %v14105_v21  ;;  %11948 = vmatprep.subr.bf16.mxu1 %v13777_v37 }
 0x5db   : > { %v8857_v12 = vpop.f32.mrb[0].mxu0  ;;  %v15878_v44 = vpop.f32.mrb[0].mxu1 }
 0x5dc   : > { %v8859_v49 = vpop.f32.mrb[1].mxu0  ;;  %v9392_v19 = vpop.f32.mrb[1].mxu1  ;;  %v12039_v32 = vadd.f32 %v8857_v12, %v8309_v2  ;;  %v12041_v30 = vadd.f32 %v15878_v44, %v8317_v20 }
 0x5dd   : > { %v12040_v31 = vadd.f32 %v8859_v49, %v8313_v7  ;;  %v8861_v18 = vpop.f32.mrb[2].mxu0  ;;  %v9394_v5 = vpop.f32.mrb[2].mxu1  ;;  %12010 = vmatpush3.bf16.msra.mxu0 %v13778_v50  ;;  %11949 = vmatpush3.bf16.msra.mxu1 %v13779_v42  ;;  %v12042_v22 = vadd.f32 %v9392_v19, %v8321_v13 }
 0x5de   : > { %v8862_v40 = vpop.f32.mrb[3].mxu0  ;;  %v9395_v0 = vpop.f32.mrb[3].mxu1  ;;  %12011 = vmatprep.subr.bf16.mxu0 %v14105_v21  ;;  %11950 = vmatprep.subr.bf16.mxu1 %v13780_v43  ;;  %v9917_v29 = vmax.f32 %v12039_v32, 0.0  ;;  %v9919_v37 = vmax.f32 %v12041_v30, 0.0  ;;  %v13802_v18 = vld [vmem:[%s14437_s6 + $0x100] sm:$0xff]   ;;  %v13805_v32 = vld [vmem:[%s14437_s6 + $0x118] sm:$0xff]  }
 0x5df   : > { %v9918_v45 = vmax.f32 %v12040_v31, 0.0  ;;  %v9920_v63 = vmax.f32 %v12042_v22, 0.0  ;;  %v13806_v40 = vld [vmem:[%s14437_s6 + $0x120] sm:$0xff]   ;;  %v13807_v0 = vld [vmem:[%s14437_s6 + $0x128] sm:$0xff]  }
 0x5e0   : > { %v9922_v3 = vpack.c.bf16 %v9917_v29, %v9917_v29  ;;  %v9924_v38 = vpack.c.bf16 %v9919_v37, %v9919_v37 }
 0x5e1   : > { %v9923_v48 = vpack.c.bf16 %v9918_v45, %v9918_v45  ;;  %12012 = vmatpush3.bf16.msra.mxu0 %v13781_v51  ;;  %11951 = vmatpush3.bf16.msra.mxu1 %v13782_v16  ;;  %v9925_v55 = vpack.c.bf16 %v9920_v63, %v9920_v63  ;;  %v13803_v51 = vld [vmem:[%s14437_s6 + $0x108] sm:$0xff]   ;;  %v13804_v16 = vld [vmem:[%s14437_s6 + $0x110] sm:$0xff]  }
 0x5e2   : > { %12013 = vmatprep.subr.bf16.mxu0 %v14105_v21  ;;  %11952 = vmatprep.subr.bf16.mxu1 %v13783_v9  ;;  %v13808_v9 = vld [vmem:[%s14437_s6 + $0x130] sm:$0xff]  }
 0x5e3   : > { %10279 = vmatprep.mubr.bf16.mxu1 %v9923_v48 }
 0x5e5   : > { %12014 = vmatpush3.bf16.msra.mxu0 %v13784_v54  ;;  %11953 = vmatpush3.bf16.msra.mxu1 %v13785_v61 }
 0x5e6   : > { %11960 = vmatprep.subr.bf16.mxu0 %v13786_v8  ;;  %12019 = vmatprep.subr.bf16.mxu1 %v14105_v21 }
 0x5e8   : > { %12016 = vmatmul.mubr.bf16.vlgmr.msra.gmra.mrb[28].mxu0 %v15624_v35  ;;  %10280 = vmatmul.mubr.bf16.vlgmr.msra.gmra.mrb[28].mxu1 %v9922_v3  ;;  %v13794_v35 = vld [vmem:[%s14437_s6 + $0xe0] sm:$0xff]  }
 0x5e9   : > { %11961 = vmatpush3.bf16.msra.mxu0 %v13787_v60  ;;  %10319 = vmatprep.mubr.bf16.mxu0 %v9925_v55  ;;  %v13809_v60 = vld [vmem:[%s14437_s6 + $0x138] sm:$0xff]  }
 0x5ea   : > { %11962 = vmatprep.subr.bf16.mxu0 %v13788_v6  ;;  %12035 = vmatprep.mubr.msk.bf16.mxu1 %vm14106_vm7, %v14105_v21 }
 0x5eb   : > { %12020 = vmatpush3.bf16.msra.mxu1 %v13802_v18 }
 0x5ec   : > { %12021 = vmatprep.subr.bf16.mxu1 %v14105_v21 }
 0x5ed   : > { %11963 = vmatpush3.bf16.msra.mxu0 %v13789_v10 }
 0x5ee   : > { %11964 = vmatprep.subr.bf16.mxu0 %v13790_v11 }
 0x5ef   : > { %12022 = vmatpush3.bf16.msra.mxu1 %v13803_v51 }
 0x5f0   : > { %12023 = vmatprep.subr.bf16.mxu1 %v14105_v21 }
 0x5f1   : > { %11965 = vmatpush3.bf16.msra.mxu0 %v13791_v14 }
 0x5f2   : > { %11966 = vmatprep.subr.bf16.mxu0 %v13792_v15 }
 0x5f3   : > { %12024 = vmatpush3.bf16.msra.mxu1 %v13804_v16 }
 0x5f4   : > { %12025 = vmatprep.subr.bf16.mxu1 %v14105_v21 }
 0x5f5   : > { %11967 = vmatpush3.bf16.msra.mxu0 %v13793_v46 }
 0x5f6   : > { %11968 = vmatprep.subr.bf16.mxu0 %v13794_v35 }
 0x5f7   : > { %12026 = vmatpush3.bf16.msra.mxu1 %v13805_v32 }
 0x5f8   : > { %12027 = vmatprep.subr.bf16.mxu1 %v14105_v21 }
 0x5f9   : > { %11969 = vmatpush3.bf16.msra.mxu0 %v13795_v62 }
 0x5fa   : > { %11970 = vmatprep.subr.bf16.mxu0 %v13796_v26 }
 0x5fb   : > { %v11681_v56 = vpop.f32.mrb[4].mxu0  ;;  %v11703_v24 = vpop.f32.mrb[4].mxu1  ;;  %12028 = vmatpush3.bf16.msra.mxu1 %v13806_v40 }
 0x5fc   : > { %v11682_v53 = vpop.f32.mrb[5].mxu0  ;;  %v11704_v47 = vpop.f32.mrb[5].mxu1  ;;  %12029 = vmatprep.subr.bf16.mxu1 %v14105_v21 }
 0x5fd   : > { %v11683_v1 = vadd.f32 %v11682_v53, %v11681_v56  ;;  %v11684_v41 = vpop.f32.mrb[6].mxu0  ;;  %11971 = vmatpush3.bf16.msra.mxu0 %v13797_v4  ;;  %v11705_v25 = vadd.f32 %v11704_v47, %v11703_v24  ;;  %v11706_v58 = vpop.f32.mrb[6].mxu1 }
 0x5fe   : > { %v11685_v59 = vpop.f32.mrb[7].mxu0  ;;  %11972 = vmatprep.subr.bf16.mxu0 %v13798_v57  ;;  %v11707_v34 = vpop.f32.mrb[7].mxu1 }
 0x5ff   : > { %v9432_v28 = vadd.f32 %v11683_v1, %v8325_v23  ;;  %12030 = vmatpush3.bf16.msra.mxu1 %v13807_v0 }
 0x600   : > { %12031 = vmatprep.subr.bf16.mxu1 %v14105_v21 }
 0x601   : > { %v9472_v36 = vadd.f32 %v11705_v25, %v9432_v28  ;;  %11973 = vmatpush3.bf16.msra.mxu0 %v13799_v27 }
 0x602   : > { %11974 = vmatprep.subr.bf16.mxu0 %v13800_v52 }
 0x603   : > { %12032 = vmatpush3.bf16.msra.mxu1 %v13808_v9 }
 0x604   : > { %12033 = vmatprep.subr.bf16.mxu1 %v14105_v21 }
 0x605   : > { %11975 = vmatpush3.bf16.msra.mxu0 %v13801_v39 }
 0x607   : > { %12034 = vmatpush3.bf16.msra.mxu1 %v13809_v60 }
 0x608   : > { %10320 = vmatmul.mubr.bf16.vlgmr.msra.gmra.mrb[32].mxu0 %v9924_v38 }
 0x61b   : > { %v11725_v7 = vpop.f32.mrb[8].mxu0  ;;  %v11747_v50 = vpop.f32.mrb[8].mxu1 }
 0x61c   : > { %v11726_v42 = vpop.f32.mrb[9].mxu0  ;;  %v11748_v2 = vpop.f32.mrb[9].mxu1 }
 0x61d   : > { %v11727_v43 = vadd.f32 %v11726_v42, %v11725_v7  ;;  %v11728_v12 = vpop.f32.mrb[10].mxu0  ;;  %v11749_v44 = vadd.f32 %v11748_v2, %v11747_v50  ;;  %v11750_v13 = vpop.f32.mrb[10].mxu1 }
 0x61e   : > { %v11729_v49 = vpop.f32.mrb[11].mxu0  ;;  %v11751_v19 = vpop.f32.mrb[11].mxu1 }
 0x61f   : > { %v9512_v31 = vadd.f32 %v11727_v43, %v9472_v36 }
 0x621   : > { %v9552_v5 = vadd.f32 %v11749_v44, %v9512_v31 }
 0x63b   : > { %v11769_v45 = vpop.f32.mrb[12].mxu0  ;;  %v11791_v22 = vpop.f32.mrb[12].mxu1 }
 0x63c   : > { %v11770_v48 = vpop.f32.mrb[13].mxu0  ;;  %v11792_v54 = vpop.f32.mrb[13].mxu1 }
 0x63d   : > { %v11771_v61 = vadd.f32 %v11770_v48, %v11769_v45  ;;  %v11772_v29 = vpop.f32.mrb[14].mxu0  ;;  %v11793_v8 = vadd.f32 %v11792_v54, %v11791_v22  ;;  %v11794_v63 = vpop.f32.mrb[14].mxu1 }
 0x63e   : > { %v11773_v3 = vpop.f32.mrb[15].mxu0  ;;  %v11795_v6 = vpop.f32.mrb[15].mxu1 }
 0x63f   : > { %v9592_v55 = vadd.f32 %v11771_v61, %v9552_v5  ;;  %v10367_v61 = vld [vmem:[%s14442_s3] sm:$0x1] }
 0x641   : > { %v9632_v10 = vadd.f32 %v11793_v8, %v9592_v55 }
 0x65b   : > { %v11813_v11 = vpop.f32.mrb[16].mxu0  ;;  %v11835_v14 = vpop.f32.mrb[16].mxu1 }
 0x65c   : > { %v11814_v15 = vpop.f32.mrb[17].mxu0  ;;  %v11836_v46 = vpop.f32.mrb[17].mxu1 }
 0x65d   : > { %v11815_v35 = vadd.f32 %v11814_v15, %v11813_v11  ;;  %v11816_v62 = vpop.f32.mrb[18].mxu0  ;;  %v11837_v17 = vadd.f32 %v11836_v46, %v11835_v14  ;;  %v11838_v26 = vpop.f32.mrb[18].mxu1 }
 0x65e   : > { %v11817_v33 = vpop.f32.mrb[19].mxu0  ;;  %v11839_v21 = vpop.f32.mrb[19].mxu1 }
 0x65f   : > { %v9672_v4 = vadd.f32 %v11815_v35, %v9632_v10 }
 0x661   : > { %v9712_v20 = vadd.f32 %v11837_v17, %v9672_v4 }
 0x67b   : > { %v11857_v57 = vpop.f32.mrb[20].mxu0  ;;  %v11879_v56 = vpop.f32.mrb[20].mxu1 }
 0x67c   : > { %v11858_v23 = vpop.f32.mrb[21].mxu0  ;;  %v11880_v24 = vpop.f32.mrb[21].mxu1 }
 0x67d   : > { %v11859_v53 = vadd.f32 %v11858_v23, %v11857_v57  ;;  %v11860_v47 = vpop.f32.mrb[22].mxu0  ;;  %v11881_v1 = vadd.f32 %v11880_v24, %v11879_v56  ;;  %v11882_v41 = vpop.f32.mrb[22].mxu1 }
 0x67e   : > { %v11861_v25 = vpop.f32.mrb[23].mxu0  ;;  %v11883_v27 = vpop.f32.mrb[23].mxu1 }
 0x67f   : > { %v9752_v58 = vadd.f32 %v11859_v53, %v9712_v20 }
 0x681   : > { %v9792_v30 = vadd.f32 %v11881_v1, %v9752_v58 }
 0x69b   : > { %v11901_v59 = vpop.f32.mrb[24].mxu0  ;;  %v11923_v52 = vpop.f32.mrb[24].mxu1 }
 0x69c   : > { %v11902_v34 = vpop.f32.mrb[25].mxu0  ;;  %v11924_v28 = vpop.f32.mrb[25].mxu1 }
 0x69d   : > { %v11903_v36 = vadd.f32 %v11902_v34, %v11901_v59  ;;  %v11904_v39 = vpop.f32.mrb[26].mxu0  ;;  %v11925_v37 = vadd.f32 %v11924_v28, %v11923_v52  ;;  %v11926_v38 = vpop.f32.mrb[26].mxu1 }
 0x69e   : > { %v11905_v7 = vpop.f32.mrb[27].mxu0  ;;  %v11927_v50 = vpop.f32.mrb[27].mxu1 }
 0x69f   : > { %v9832_v42 = vadd.f32 %v11903_v36, %v9792_v30 }
 0x6a1   : > { %v9872_v2 = vadd.f32 %v11925_v37, %v9832_v42 }
 0x6bb   : > { %v9911_v43 = vpop.f32.mrb[28].mxu0  ;;  %v11954_v12 = vpop.f32.mrb[28].mxu1 }
 0x6bc   : > { %v9912_v44 = vadd.f32 %v9911_v43, %v9872_v2  ;;  %v12017_v13 = vpop.f32.mrb[29].mxu0  ;;  %v11955_v49 = vpop.f32.mrb[29].mxu1 }
 0x6bd   : > { %v11956_v19 = vadd.f32 %v11955_v49, %v11954_v12  ;;  %v9914_v31 = vpop.f32.mrb[30].mxu0  ;;  %v11957_v18 = vpop.f32.mrb[30].mxu1 }
 0x6be   : > { %v9921_v5 = vmax.f32 %v9912_v44, 0.0  ;;  %v12018_v51 = vpop.f32.mrb[31].mxu0  ;;  %v11958_v16 = vpop.f32.mrb[31].mxu1 }
 0x6c0   : > { %v9926_v32 = vpack.c.bf16 %v9921_v5, %v9921_v5 }
 0x6c2   : > { %12036 = vmatmul.mubr.bf16.vlgmr.msra.gmra.mrb[32].mxu1 %v9926_v32 }
 0x6db   : > { %v11976_v40 = vpop.f32.mrb[32].mxu0 }
 0x6dc   : > { %v11977_v0 = vpop.f32.mrb[33].mxu0 }
 0x6dd   : > { %v11978_v9 = vadd.f32 %v11977_v0, %v11976_v40  ;;  %v11979_v45 = vpop.f32.mrb[34].mxu0 }
 0x6de   : > { %v11980_v22 = vpop.f32.mrb[35].mxu0 }
 0x6df   : > { %v10322_v48 = vadd.f32 %v11978_v9, %v11956_v19 }
 0x795   : > { %v10361_v54 = vpop.f32.mrb[32].mxu1 }
 0x796   : > { %v10362_v29 = vadd.f32 %v10361_v54, %v10322_v48  ;;  %v12037_v8 = vpop.f32.mrb[33].mxu1 }
 0x797   : > { %v10364_v63 = vpop.f32.mrb[34].mxu1 }
 0x798   : > { %v10368_v60 = vadd.f32 %v10367_v61, %v10362_v29  ;;  %v12038_v3 = vpop.f32.mrb[35].mxu1 }
 0x79a   : > { %10370 = vst.msk [vmem:[%s14442_s3] sm:$0x1] %vm10369_vm3, %v10368_v60 }
 0x79b PF: > { %s16088_s5 = sld [smem:[#allocation20_spill]]  ;;  %s16089_s12 = sld [smem:[#allocation24_spill]] }
 0x79c   : > { %s16090_s27 = sld [smem:[#allocation32_spill]]  ;;  %s10384_s21 = sshll.u32 %s14442_s3, 4  ;;  %s10385_s21 = int_to_ptr.vmem [resolvable:$true] %s10384_s21 }
 0x79d   : > { %s10372_s17 = scalar_lea.sflag [#allocation5], %s414_s30  ;;  %s13958_s23 = scalar_lea.vmem %s10385_s21, 16 }
 0x79e   : > { %p13959_p11 = scmp.ne.s32.totalorder %s10385_s21, %s13958_s23  ;;  %s14107_s14 = smov [#allocation12]  }
 0x79f   : > { %s13962_s15 = sshll.u32 %s14107_s14, 4  ;;  %s13963_s15 = int_to_ptr.vmem [resolvable:$false] %s13962_s15 }
 0x7a0   : > { %s13964_s8 = scalar_lea.vmem %s13963_s15, 32  ;;  %p13965_p10 = scmp.lt.s32.totalorder %s10385_s21, %s13963_s15 }
 0x7a1   : > { %s11657_s28 = sshll.u32 %s16088_s5, 4  ;;  %p16092_p4 = scmp.ne.s32.totalorder %s16089_s12, 0 }
 0x7a2   : > { %s16091_s11 = smov %s16090_s27  ;;  %s15934_s16 = scalar_lea.hbm %s16090_s27, %s11657_s28 }
 0x7a3   : > { %p13960_p5 = pnand %p13959_p11, %p16092_p4  ;;  %p13966_p12 = scmp.lt.s32.totalorder %s13964_s8, %s13958_s23 }
 0x7a5   : > { %p13961_p7 = pneg %p13960_p5  ;;  %p13967_p0 = por %p13966_p12, %p13965_p10 }
 0x7a7   : > { %p13968_p8 = pnand %p13967_p0, %p13961_p7 }
 0x7a9   : > { %13971 = shalt.err (!%p13968_p8)
}
 0x7aa   : > { %s13972_s30 = scalar_lea.hbm %s15934_s16, 16  ;;  %s13976_s13 = scalar_lea.hbm %s16091_s11, 32 }
 0x7ab   : > { %p13973_p13 = scmp.ne.s32.totalorder %s15934_s16, %s13972_s30  ;;  %p13977_p3 = scmp.lt.u32.totalorder %s15934_s16, %s16091_s11 }
 0x7ac   : > { %p13978_p6 = scmp.lt.u32.totalorder %s13976_s13, %s13972_s30  ;;  %p13980_p11 = scmp.lt.u32.totalorder %s13972_s30, %s15934_s16 }
 0x7ad   : > { %p13974_p1 = pnand %p13973_p13, %p16092_p4 }
 0x7ae   : > { %p13979_p9 = por %p13978_p6, %p13977_p3 }
 0x7af   : > { %p13975_p2 = pneg %p13974_p1 }
 0x7b0   : > { %p13981_p5 = por %p13980_p11, %p13979_p9 }
 0x7b2   : > { %p13982_p7 = pnand %p13981_p5, %p13975_p2 }
 0x7b4   : > { %13985 = shalt.err (!%p13982_p7)
}
 0x7b5   : > { %12159 = dma.vmem_to_hbm [thread:$0]  (%p16092_p4), %s10385_s21, 16, %s15934_s16, %s10372_s17  }
 0x7b6 PF: > { %s16093_s10 = sld [smem:[#allocation23_spill]]  ;;  %s16094_s6 = sld [smem:[#allocation17_spill]] }
 0x7b7   : > { %s16095_s7 = sld [smem:[#allocation25_spill]] }
 0x7bc   : > { %p12189_p10 = scmp.ge.s32.totalorder %s16093_s10, 2  ;;  %s10396_s3 = sand.u32 1, %s16094_s6  }
 0x7bd   : > { %p16096_p12 = scmp.ne.s32.totalorder %s16095_s7, 0  ;;  %s10397_s5 = scalar_lea.sflag [#allocation5], %s10396_s3 }
 0x7bf   : > { %p12179_p0 = pnand %p12189_p10, %p16096_p12 }
 0x7c1   : > { %14043 = dma.done.wait (!%p12179_p0), %s10397_s5, 16  }
 0x7c2   : > { %14045 = vsyncadd (!%p12179_p0), %s10397_s5, 4294967280  ;;  %s24_s7 = sadd.s32 1, %s16093_s10   ;;  %s16097_s28 = sld [smem:[#allocation18_spill]] }
 0x7c3   : > { %p21_p8 = scmp.ge.s32.totalorder %s24_s7, 8   ;;  %s16098_s23 = sld [smem:[#allocation28_spill]] }
 0x7c4   : > { %s16099_s27 = sld [smem:[#allocation21_spill]]  ;;  %s16100_s12 = sld [smem:[#allocation22_spill]] }
 0x7c5   : > { %s16101_s29 = sld [smem:[#allocation26_spill]]  ;;  %s16102_s30 = sld [smem:[#allocation27_spill]] }
 0x7c6   : > { %s16103_s21 = smov %s14052_s22  ;;  %s16105_s24 = smov %s14064_s25 }
 0x7c7   : > { %s16106_s25 = smov %s14068_s26  ;;  %s16107_s26 = smov %s14348_s18 }
 0x7c8   : > { %s16104_s22 = smov %s16097_s28  ;;  %23 = sbr.rel (!%p21_p8) target bundleno = 16 (0x10), region = 124 }
 0x7ca   : > { %s16108_s28 = smov %s16100_s12 }
 0x7cf   :  { %10401 = vsyncpa [#allocation4], 1 }
 0x7d0   :  { %10403 = vsyncpa [#allocation4 + $0x1], 1 }
 0x7d1   :  { %10404 = vsyncpa [#allocation7], 1 }
 0x7d2   :  { %10405 = vsyncpa [#allocation10], 1 }
 0x7d3   :  { %10407 = vsyncpa [#allocation10 + $0x1], 1 }
 0x7d4   :  { %10408 = vsyncpa [#allocation5], 1 }
 0x7d5   :  { %10410 = vsyncpa [#allocation5 + $0x1], 1 }

</bundles_post_ra>
